<compile_context>
chip_gen: v7x
topology: tpu7x:2x2x1
jax: 0.10.0
libtpu: 0.0.40
codegen_flags: <defaults>
</compile_context>

<pallas_src>
import functools

import jax
import jax.numpy as jnp
from jax.experimental import pallas as pl
from jax.experimental.pallas import tpu as pltpu


# -----------------------------------------------------------------------------
# Fused Pallas kernel: one (batch, timestep) grid step of the whole encoder
# -----------------------------------------------------------------------------
def make_kernel(*, num_layers, cheb_k, embed_dim, num_nodes, hidden):
    """Kernel ref order (inputs, then output, then scratch):

      xp1   : [B, T, 3, N, H]  (block (1,1,3,N,H)) hoisted layer-1 input path
      s2    : [K*N, N]  bf16   folded Chebyshev supports
      ebc   : [D, N, H] f32    node embeddings, column-broadcast over H
      phz1, phr1, phu1 : [D, K, H, H] bf16  layer-1 state-path pools
      per extra layer l >= 2 (7 refs):
        pxz, pxr, pxu  : [D, K, H, H] bf16  input-path pools
        b3             : [3, N, H]   f32    per-node biases (z | r | update)
        phz, phr, phu  : [D, K, H, H] bf16  state-path pools
      out   : [B, N, H] (block (1, N, H))  final top-layer hidden state
      st    : VMEM scratch [num_layers, N, H] f32  recurrent state carries
    """
    K, D, N, H = cheb_k, embed_dim, num_nodes, hidden

    def kernel(*refs):
        xp_ref, s2_ref, ebc_ref = refs[0], refs[1], refs[2]
        phz1_ref, phr1_ref, phu1_ref = refs[3], refs[4], refs[5]
        extra = [refs[6 + 7 * i: 13 + 7 * i] for i in range(num_layers - 1)]
        out_ref = refs[6 + 7 * (num_layers - 1)]
        st_ref = refs[7 + 7 * (num_layers - 1)]

        t = pl.program_id(1)

        @pl.when(t == 0)
        def _init():
            st_ref[...] = jnp.zeros_like(st_ref)

        S2 = s2_ref[...]                                  # [K*N, N] bf16
        EB = [ebc_ref[d] for d in range(D)]               # D x [N, H] f32

        def graph(x_f32):
            # Graph conv of one [N, H] operand over all K supports: a single
            # MXU matmul, then static sublane row-slices per Chebyshev order.
            y = jnp.dot(S2, x_f32.astype(jnp.bfloat16),
                        preferred_element_type=jnp.float32)       # [K*N, H]
            return [y[k * N:(k + 1) * N].astype(jnp.bfloat16) for k in range(K)]

        def pool_mix(ys, pool_ref, base):
            # sum_d E[:, d] * (sum_k ys[k] @ pool[d, k]) + base  ->  [N, H] f32
            # D*K small bf16 MXU matmuls + D VPU row-scale/accumulates.
            acc = base
            for d in range(D):
                td = jnp.dot(ys[0], pool_ref[d, 0],
                             preferred_element_type=jnp.float32)
                for k in range(1, K):
                    td = td + jnp.dot(ys[k], pool_ref[d, k],
                                      preferred_element_type=jnp.float32)
                acc = acc + EB[d] * td
            return acc

        def cell(xz, xr, xu, h, pz_ref, pr_ref, pu_ref):
            # xz/xr/xu: [N, H] f32 input-path pre-activations (bias included).
            ys_h = graph(h)                               # shared by z and r
            z = jax.nn.sigmoid(pool_mix(ys_h, pz_ref, xz))
            r = jax.nn.sigmoid(pool_mix(ys_h, pr_ref, xr))
            ys_c = graph(z * h)
            hc = jnp.tanh(pool_mix(ys_c, pu_ref, xu))
            return r * h + (1.0 - r) * hc

        # Layer 1: state-independent input path precomputed outside the kernel.
        h1 = cell(xp_ref[0, 0, 0], xp_ref[0, 0, 1], xp_ref[0, 0, 2],
                  st_ref[0], phz1_ref, phr1_ref, phu1_ref)
        st_ref[0] = h1

        # Layers >= 2 consume the layer below (same timestep), in-VMEM.
        lower = h1
        for li, (pxz, pxr, pxu, b3, phz, phr, phu) in enumerate(extra):
            ys_x = graph(lower)
            hn = cell(pool_mix(ys_x, pxz, b3[0]),
                      pool_mix(ys_x, pxr, b3[1]),
                      pool_mix(ys_x, pxu, b3[2]),
                      st_ref[li + 1], phz, phr, phu)
            st_ref[li + 1] = hn
            lower = hn

        @pl.when(t == pl.num_programs(1) - 1)
        def _store():
            out_ref[0] = lower

    return kernel


# -----------------------------------------------------------------------------
# Parameter setup (deterministic, synthetic) and XLA-side glue
# -----------------------------------------------------------------------------
def _xavier(key, shape):
    fan_in = shape[-2] if len(shape) >= 2 else shape[-1]
    fan_out = shape[-1]
    limit = (6.0 / (fan_in + fan_out)) ** 0.5
    return jax.random.uniform(key, shape, jnp.float32, -limit, limit)


def init_params(key, num_nodes, embed_dim, in_dim, out_dim, rnn_units,
                num_layers, cheb_k, horizon):
    keys = jax.random.split(key, 3 + 4 * num_layers)
    H = rnn_units
    params = {"E": _xavier(keys[0], (num_nodes, embed_dim)), "layers": []}
    idx = 1
    din = in_dim
    for _ in range(num_layers):
        cin = din + H
        params["layers"].append({
            "gate_pool":    _xavier(keys[idx + 0], (embed_dim, cheb_k, cin, 2 * H)),
            "gate_bpool":   _xavier(keys[idx + 1], (embed_dim, 2 * H)),
            "update_pool":  _xavier(keys[idx + 2], (embed_dim, cheb_k, cin, H)),
            "update_bpool": _xavier(keys[idx + 3], (embed_dim, H)),
        })
        idx += 4
        din = H
    params["conv_w"] = _xavier(keys[idx], (horizon * out_dim, 1, 1, H))
    params["conv_b"] = jax.random.uniform(keys[idx + 1], (horizon * out_dim,),
                                          jnp.float32, 0.0, 1.0)
    return params


def compute_supports(E, cheb_k):
    # supports = softmax(relu(E E^T), dim=1); Chebyshev stack [K, N, N]
    N = E.shape[0]
    A = jax.nn.softmax(jax.nn.relu(jnp.matmul(E, E.T, precision="highest")),
                       axis=1)
    sset = [jnp.eye(N, dtype=jnp.float32), A]
    for _ in range(2, cheb_k):
        sset.append(2.0 * jnp.matmul(A, sset[-1], precision="highest")
                    - sset[-2])
    return jnp.stack(sset, axis=0)


def agcrn_bl_forward(params, x, *, cheb_k, out_dim, horizon):
    # x: [B, T, N, in_dim]  ->  output: [B, horizon, N, out_dim]
    B, T, N, in_dim = x.shape
    H = params["layers"][0]["update_bpool"].shape[-1]
    L = len(params["layers"])
    E = params["E"].astype(jnp.float32)
    D = E.shape[1]
    x = x.astype(jnp.float32)
    bf16 = jnp.bfloat16
    hp = "highest"

    supports = compute_supports(E, cheb_k)                       # [K, N, N]
    s2 = supports.reshape(cheb_k * N, N).astype(bf16)            # [K*N, N]
    ebc = jnp.broadcast_to(E.T[:, :, None], (D, N, H)).astype(jnp.float32)

    # ---- layer 1: hoist the state-independent input path for ALL timesteps --
    lp0 = params["layers"][0]
    gp0, up0 = lp0["gate_pool"], lp0["update_pool"]
    gw_in = jnp.einsum("nd,dkio->nkio", E, gp0[:, :, :in_dim, :], precision=hp)
    uw_in = jnp.einsum("nd,dkio->nkio", E, up0[:, :, :in_dim, :], precision=hp)
    gb = jnp.matmul(E, lp0["gate_bpool"], precision=hp)          # [N, 2H]
    ub = jnp.matmul(E, lp0["update_bpool"], precision=hp)        # [N, H]
    xg = jnp.einsum("knm,btmc->btnkc", supports, x, precision=hp)
    xp_g = jnp.einsum("btnkc,nkco->btno", xg, gw_in, precision=hp) + gb[None, None]
    xp_u = jnp.einsum("btnkc,nkco->btno", xg, uw_in, precision=hp) + ub[None, None]
    # Stack z | r | update pre-activations on a leading axis (no lane fusion).
    xp1 = jnp.stack([xp_g[..., :H], xp_g[..., H:], xp_u], axis=2)  # [B,T,3,N,H]

    # ---- layer-1 state-path pools (pool form, bf16 MXU operands) ------------
    phz1 = gp0[:, :, in_dim:, :H].astype(bf16)                   # [D,K,H,H]
    phr1 = gp0[:, :, in_dim:, H:].astype(bf16)
    phu1 = up0[:, :, in_dim:, :].astype(bf16)

    # ---- layers >= 2: input-path + state-path pools and per-node biases -----
    extra_inputs = []
    for lp in params["layers"][1:]:
        gp, up = lp["gate_pool"], lp["update_pool"]
        gb = jnp.matmul(E, lp["gate_bpool"], precision=hp)
        ub = jnp.matmul(E, lp["update_bpool"], precision=hp)
        b3 = jnp.stack([gb[:, :H], gb[:, H:], ub], axis=0)        # [3, N, H]
        extra_inputs += [
            gp[:, :, :H, :H].astype(bf16),      # input-path z pool
            gp[:, :, :H, H:].astype(bf16),      # input-path r pool
            up[:, :, :H, :].astype(bf16),       # input-path update pool
            b3,
            gp[:, :, H:, :H].astype(bf16),      # state-path z pool
            gp[:, :, H:, H:].astype(bf16),      # state-path r pool
            up[:, :, H:, :].astype(bf16),       # state-path update pool
        ]

    def resident(shape):
        nd = len(shape)
        return pl.BlockSpec(shape, lambda b, t, _n=nd: (0,) * _n)

    pool_spec = resident((D, cheb_k, H, H))
    in_specs = [
        pl.BlockSpec((1, 1, 3, N, H), lambda b, t: (b, t, 0, 0, 0)),  # xp1/step
        resident((cheb_k * N, N)),                                     # s2
        resident((D, N, H)),                                           # ebc
        pool_spec, pool_spec, pool_spec,                               # layer-1
    ]
    for _ in range(L - 1):
        in_specs += [pool_spec, pool_spec, pool_spec,
                     resident((3, N, H)),
                     pool_spec, pool_spec, pool_spec]

    kernel = make_kernel(num_layers=L, cheb_k=cheb_k, embed_dim=D,
                         num_nodes=N, hidden=H)

    h_last = pl.pallas_call(
        kernel,
        out_shape=jax.ShapeDtypeStruct((B, N, H), jnp.float32),
        grid_spec=pltpu.PrefetchScalarGridSpec(
            num_scalar_prefetch=0,
            grid=(B, T),                              # B parallel, T sequential
            in_specs=in_specs,
            out_specs=pl.BlockSpec((1, N, H), lambda b, t: (b, 0, 0)),
            scratch_shapes=[pltpu.VMEM((L, N, H), jnp.float32)],
        ),
        compiler_params=pltpu.CompilerParams(
            dimension_semantics=("parallel", "arbitrary")),
    )(xp1, s2, ebc, phz1, phr1, phu1, *extra_inputs)

    # End projection (Conv2d(1, horizon*out_dim, (1, H)) == per-node linear),
    # kept in XLA so the kernel output stays a dense [B, N, H] slab.
    C = horizon * out_dim
    wend = params["conv_w"].reshape(C, H)
    out2 = jnp.einsum("bnh,ch->bnc", h_last, wend, precision=hp) + params["conv_b"]
    return out2.reshape(B, N, horizon, out_dim).transpose(0, 2, 1, 3)


# -----------------------------------------------------------------------------
# Pure-JAX reference (direct port of the PyTorch forward) for verification
# -----------------------------------------------------------------------------
def reference_forward(params, x, *, cheb_k, out_dim, horizon):
    B, T, N, in_dim = x.shape
    H = params["layers"][0]["update_bpool"].shape[-1]
    E = params["E"]
    hp = "highest"
    supports = compute_supports(E, cheb_k)

    def avwgcn(xin, pool_w, pool_b):
        weights = jnp.einsum("nd,dkio->nkio", E, pool_w, precision=hp)
        bias = jnp.matmul(E, pool_b, precision=hp)
        x_g = jnp.einsum("knm,bmc->bknc", supports, xin, precision=hp)
        x_g = jnp.transpose(x_g, (0, 2, 1, 3))
        return jnp.einsum("bnki,nkio->bno", x_g, weights, precision=hp) + bias

    cur = x.astype(jnp.float32)
    for lp in params["layers"]:
        state = jnp.zeros((B, N, H), jnp.float32)
        outs = []
        for t in range(T):
            xt = cur[:, t]
            ias = jnp.concatenate([xt, state], axis=-1)
            z_r = jax.nn.sigmoid(avwgcn(ias, lp["gate_pool"], lp["gate_bpool"]))
            z, r = z_r[..., :H], z_r[..., H:]
            cand = jnp.concatenate([xt, z * state], axis=-1)
            hc = jnp.tanh(avwgcn(cand, lp["update_pool"], lp["update_bpool"]))
            state = r * state + (1.0 - r) * hc
            outs.append(state)
        cur = jnp.stack(outs, axis=1)

    h_last = cur[:, -1]                                           # [B, N, H]
    w = params["conv_w"].reshape(horizon * out_dim, H)
    out = jnp.einsum("bnh,ch->bnc", h_last, w, precision=hp) + params["conv_b"]
    return out.reshape(B, N, horizon, out_dim).transpose(0, 2, 1, 3)


# -----------------------------------------------------------------------------
if __name__ == "__main__":
    num_nodes, embed_dim = 16, 8
    in_dim, out_dim = 2, 2
    rnn_units, num_layers = 32, 2
    cheb_k, horizon = 2, 3
    B, T = 2, 8

    key = jax.random.PRNGKey(0)
    kp, kx = jax.random.split(key)
    params = init_params(kp, num_nodes, embed_dim, in_dim, out_dim,
                         rnn_units, num_layers, cheb_k, horizon)
    x = jax.random.normal(kx, (B, T, num_nodes, in_dim), jnp.float32)

    fwd = jax.jit(functools.partial(agcrn_bl_forward, cheb_k=cheb_k,
                                    out_dim=out_dim, horizon=horizon))
    out = jax.block_until_ready(fwd(params, x))
    assert out.shape == (B, horizon, num_nodes, out_dim), out.shape

    ref = reference_forward(params, x, cheb_k=cheb_k, out_dim=out_dim,
                            horizon=horizon)
    max_err = float(jnp.max(jnp.abs(out - ref)))
    # Kernel recurrence uses bf16 MXU operands (per the perf review); the
    # reference runs at 'highest' f32 precision, so allow bf16-level error.
    if max_err > 7.5e-2:
        raise SystemExit(f"mismatch vs reference, max abs err = {max_err:e}")

    print("KERNEL_OK")
</pallas_src>

<mosaic_0001>
module attributes {stable_mosaic.version = 11 : i64} {
  func.func @kernel(%arg0: i32, %arg1: i32, %arg2: memref<1x1x3x16x32xf32, #tpu.memory_space<vmem>>, %arg3: memref<32x16xbf16, #tpu.memory_space<vmem>>, %arg4: memref<8x16x32xf32, #tpu.memory_space<vmem>>, %arg5: memref<8x2x32x32xbf16, #tpu.memory_space<vmem>>, %arg6: memref<8x2x32x32xbf16, #tpu.memory_space<vmem>>, %arg7: memref<8x2x32x32xbf16, #tpu.memory_space<vmem>>, %arg8: memref<8x2x32x32xbf16, #tpu.memory_space<vmem>>, %arg9: memref<8x2x32x32xbf16, #tpu.memory_space<vmem>>, %arg10: memref<8x2x32x32xbf16, #tpu.memory_space<vmem>>, %arg11: memref<3x16x32xf32, #tpu.memory_space<vmem>>, %arg12: memref<8x2x32x32xbf16, #tpu.memory_space<vmem>>, %arg13: memref<8x2x32x32xbf16, #tpu.memory_space<vmem>>, %arg14: memref<8x2x32x32xbf16, #tpu.memory_space<vmem>>, %arg15: memref<1x16x32xf32, #tpu.memory_space<vmem>>, %arg16: memref<2x16x32xf32, #tpu.memory_space<vmem>>) attributes {dimension_semantics = [#tpu.dimension_semantics<parallel>, #tpu.dimension_semantics<arbitrary>], iteration_bounds = array<i64: 2, 8>, scalar_prefetch = 0 : i64, scratch_operands = 1 : i64, tpu.core_type = #tpu.core_type<tc>, window_params = [{transform_indices = @transform_0, window_bounds = array<i64: 1, 1, 3, 16, 32>}, {pipeline_mode = #tpu.pipeline_mode<synchronous>, transform_indices = @transform_1, window_bounds = array<i64: 32, 16>}, {pipeline_mode = #tpu.pipeline_mode<synchronous>, transform_indices = @transform_2, window_bounds = array<i64: 8, 16, 32>}, {pipeline_mode = #tpu.pipeline_mode<synchronous>, transform_indices = @transform_3, window_bounds = array<i64: 8, 2, 32, 32>}, {pipeline_mode = #tpu.pipeline_mode<synchronous>, transform_indices = @transform_4, window_bounds = array<i64: 8, 2, 32, 32>}, {pipeline_mode = #tpu.pipeline_mode<synchronous>, transform_indices = @transform_5, window_bounds = array<i64: 8, 2, 32, 32>}, {pipeline_mode = #tpu.pipeline_mode<synchronous>, transform_indices = @transform_6, window_bounds = array<i64: 8, 2, 32, 32>}, {pipeline_mode = #tpu.pipeline_mode<synchronous>, transform_indices = @transform_7, window_bounds = array<i64: 8, 2, 32, 32>}, {pipeline_mode = #tpu.pipeline_mode<synchronous>, transform_indices = @transform_8, window_bounds = array<i64: 8, 2, 32, 32>}, {pipeline_mode = #tpu.pipeline_mode<synchronous>, transform_indices = @transform_9, window_bounds = array<i64: 3, 16, 32>}, {pipeline_mode = #tpu.pipeline_mode<synchronous>, transform_indices = @transform_10, window_bounds = array<i64: 8, 2, 32, 32>}, {pipeline_mode = #tpu.pipeline_mode<synchronous>, transform_indices = @transform_11, window_bounds = array<i64: 8, 2, 32, 32>}, {pipeline_mode = #tpu.pipeline_mode<synchronous>, transform_indices = @transform_12, window_bounds = array<i64: 8, 2, 32, 32>}, {transform_indices = @transform_13, window_bounds = array<i64: 1, 16, 32>}]} {
    %c0_i32 = arith.constant 0 : i32
    %0 = arith.cmpi eq, %arg1, %c0_i32 : i32
    %1 = arith.extui %0 : i1 to i32
    %c0_i32_0 = arith.constant 0 : i32
    %2 = arith.cmpi ne, %1, %c0_i32_0 : i32
    scf.if %2 {
      %cst_786 = arith.constant 0.000000e+00 : f32
      %757 = vector.broadcast %cst_786 : f32 to vector<2x16x32xf32>
      %c0_787 = arith.constant 0 : index
      %c0_788 = arith.constant 0 : index
      %c0_789 = arith.constant 0 : index
      %758 = vector.load %arg16[%c0_787, %c0_788, %c0_789] : memref<2x16x32xf32, #tpu.memory_space<vmem>>, vector<2x16x32xf32>
      tpu.vector_store %arg16[%c0_787, %c0_788, %c0_789], %757 {strides = array<i32>} : memref<2x16x32xf32, #tpu.memory_space<vmem>>, vector<2x16x32xf32>,
    } else {
    }
    %c0 = arith.constant 0 : index
    %c0_1 = arith.constant 0 : index
    %3 = vector.load %arg3[%c0, %c0_1] : memref<32x16xbf16, #tpu.memory_space<vmem>>, vector<32x16xbf16>
    %c0_2 = arith.constant 0 : index
    %c0_3 = arith.constant 0 : index
    %c0_4 = arith.constant 0 : index
    %4 = vector.load %arg4[%c0_2, %c0_3, %c0_4] : memref<8x16x32xf32, #tpu.memory_space<vmem>>, vector<1x16x32xf32>
    %5 = vector.shape_cast %4 : vector<1x16x32xf32> to vector<16x32xf32>
    %c1 = arith.constant 1 : index
    %c0_5 = arith.constant 0 : index
    %c0_6 = arith.constant 0 : index
    %6 = vector.load %arg4[%c1, %c0_5, %c0_6] : memref<8x16x32xf32, #tpu.memory_space<vmem>>, vector<1x16x32xf32>
    %7 = vector.shape_cast %6 : vector<1x16x32xf32> to vector<16x32xf32>
    %c2 = arith.constant 2 : index
    %c0_7 = arith.constant 0 : index
    %c0_8 = arith.constant 0 : index
    %8 = vector.load %arg4[%c2, %c0_7, %c0_8] : memref<8x16x32xf32, #tpu.memory_space<vmem>>, vector<1x16x32xf32>
    %9 = vector.shape_cast %8 : vector<1x16x32xf32> to vector<16x32xf32>
    %c3 = arith.constant 3 : index
    %c0_9 = arith.constant 0 : index
    %c0_10 = arith.constant 0 : index
    %10 = vector.load %arg4[%c3, %c0_9, %c0_10] : memref<8x16x32xf32, #tpu.memory_space<vmem>>, vector<1x16x32xf32>
    %11 = vector.shape_cast %10 : vector<1x16x32xf32> to vector<16x32xf32>
    %c4 = arith.constant 4 : index
    %c0_11 = arith.constant 0 : index
    %c0_12 = arith.constant 0 : index
    %12 = vector.load %arg4[%c4, %c0_11, %c0_12] : memref<8x16x32xf32, #tpu.memory_space<vmem>>, vector<1x16x32xf32>
    %13 = vector.shape_cast %12 : vector<1x16x32xf32> to vector<16x32xf32>
    %c5 = arith.constant 5 : index
    %c0_13 = arith.constant 0 : index
    %c0_14 = arith.constant 0 : index
    %14 = vector.load %arg4[%c5, %c0_13, %c0_14] : memref<8x16x32xf32, #tpu.memory_space<vmem>>, vector<1x16x32xf32>
    %15 = vector.shape_cast %14 : vector<1x16x32xf32> to vector<16x32xf32>
    %c6 = arith.constant 6 : index
    %c0_15 = arith.constant 0 : index
    %c0_16 = arith.constant 0 : index
    %16 = vector.load %arg4[%c6, %c0_15, %c0_16] : memref<8x16x32xf32, #tpu.memory_space<vmem>>, vector<1x16x32xf32>
    %17 = vector.shape_cast %16 : vector<1x16x32xf32> to vector<16x32xf32>
    %c7 = arith.constant 7 : index
    %c0_17 = arith.constant 0 : index
    %c0_18 = arith.constant 0 : index
    %18 = vector.load %arg4[%c7, %c0_17, %c0_18] : memref<8x16x32xf32, #tpu.memory_space<vmem>>, vector<1x16x32xf32>
    %19 = vector.shape_cast %18 : vector<1x16x32xf32> to vector<16x32xf32>
    %c0_19 = arith.constant 0 : index
    %c0_20 = arith.constant 0 : index
    %c0_21 = arith.constant 0 : index
    %c0_22 = arith.constant 0 : index
    %c0_23 = arith.constant 0 : index
    %20 = vector.load %arg2[%c0_19, %c0_20, %c0_21, %c0_22, %c0_23] : memref<1x1x3x16x32xf32, #tpu.memory_space<vmem>>, vector<1x1x1x16x32xf32>
    %21 = vector.shape_cast %20 : vector<1x1x1x16x32xf32> to vector<16x32xf32>
    %c0_24 = arith.constant 0 : index
    %c0_25 = arith.constant 0 : index
    %c1_26 = arith.constant 1 : index
    %c0_27 = arith.constant 0 : index
    %c0_28 = arith.constant 0 : index
    %22 = vector.load %arg2[%c0_24, %c0_25, %c1_26, %c0_27, %c0_28] : memref<1x1x3x16x32xf32, #tpu.memory_space<vmem>>, vector<1x1x1x16x32xf32>
    %23 = vector.shape_cast %22 : vector<1x1x1x16x32xf32> to vector<16x32xf32>
    %c0_29 = arith.constant 0 : index
    %c0_30 = arith.constant 0 : index
    %c2_31 = arith.constant 2 : index
    %c0_32 = arith.constant 0 : index
    %c0_33 = arith.constant 0 : index
    %24 = vector.load %arg2[%c0_29, %c0_30, %c2_31, %c0_32, %c0_33] : memref<1x1x3x16x32xf32, #tpu.memory_space<vmem>>, vector<1x1x1x16x32xf32>
    %25 = vector.shape_cast %24 : vector<1x1x1x16x32xf32> to vector<16x32xf32>
    %c0_34 = arith.constant 0 : index
    %c0_35 = arith.constant 0 : index
    %c0_36 = arith.constant 0 : index
    %26 = vector.load %arg16[%c0_34, %c0_35, %c0_36] : memref<2x16x32xf32, #tpu.memory_space<vmem>>, vector<1x16x32xf32>
    %27 = vector.shape_cast %26 : vector<1x16x32xf32> to vector<16x32xf32>
    %28 = arith.truncf %27 : vector<16x32xf32> to vector<16x32xbf16>
    %cst = arith.constant dense<0.000000e+00> : vector<32x32xf32>
    %29 = tpu.matmul %3, %28, %cst {dimension_numbers = #tpu.dot_dimension_numbers<[1], [0], [0], [1], [0, 0, 1, 1], [], []>} : vector<32x16xbf16>, vector<16x32xbf16>, vector<32x32xf32> -> vector<32x32xf32>
    %30 = vector.extract_strided_slice %29 {offsets = [0, 0], sizes = [16, 32], strides = [1, 1]} : vector<32x32xf32> to vector<16x32xf32>
    %31 = arith.truncf %30 : vector<16x32xf32> to vector<16x32xbf16>
    %32 = vector.extract_strided_slice %29 {offsets = [16, 0], sizes = [16, 32], strides = [1, 1]} : vector<32x32xf32> to vector<16x32xf32>
    %33 = arith.truncf %32 : vector<16x32xf32> to vector<16x32xbf16>
    %c0_37 = arith.constant 0 : index
    %c0_38 = arith.constant 0 : index
    %c0_39 = arith.constant 0 : index
    %c0_40 = arith.constant 0 : index
    %34 = vector.load %arg5[%c0_37, %c0_38, %c0_39, %c0_40] : memref<8x2x32x32xbf16, #tpu.memory_space<vmem>>, vector<1x1x32x32xbf16>
    %35 = vector.shape_cast %34 : vector<1x1x32x32xbf16> to vector<32x32xbf16>
    %cst_41 = arith.constant dense<0.000000e+00> : vector<16x32xf32>
    %36 = tpu.matmul %31, %35, %cst_41 {dimension_numbers = #tpu.dot_dimension_numbers<[1], [0], [0], [1], [0, 0, 1, 1], [], []>} : vector<16x32xbf16>, vector<32x32xbf16>, vector<16x32xf32> -> vector<16x32xf32>
    %c0_42 = arith.constant 0 : index
    %c1_43 = arith.constant 1 : index
    %c0_44 = arith.constant 0 : index
    %c0_45 = arith.constant 0 : index
    %37 = vector.load %arg5[%c0_42, %c1_43, %c0_44, %c0_45] : memref<8x2x32x32xbf16, #tpu.memory_space<vmem>>, vector<1x1x32x32xbf16>
    %38 = vector.shape_cast %37 : vector<1x1x32x32xbf16> to vector<32x32xbf16>
    %cst_46 = arith.constant dense<0.000000e+00> : vector<16x32xf32>
    %39 = tpu.matmul %33, %38, %cst_46 {dimension_numbers = #tpu.dot_dimension_numbers<[1], [0], [0], [1], [0, 0, 1, 1], [], []>} : vector<16x32xbf16>, vector<32x32xbf16>, vector<16x32xf32> -> vector<16x32xf32>
    %40 = arith.addf %36, %39 : vector<16x32xf32>
    %41 = arith.mulf %5, %40 : vector<16x32xf32>
    %42 = arith.addf %21, %41 : vector<16x32xf32>
    %c1_47 = arith.constant 1 : index
    %c0_48 = arith.constant 0 : index
    %c0_49 = arith.constant 0 : index
    %c0_50 = arith.constant 0 : index
    %43 = vector.load %arg5[%c1_47, %c0_48, %c0_49, %c0_50] : memref<8x2x32x32xbf16, #tpu.memory_space<vmem>>, vector<1x1x32x32xbf16>
    %44 = vector.shape_cast %43 : vector<1x1x32x32xbf16> to vector<32x32xbf16>
    %cst_51 = arith.constant dense<0.000000e+00> : vector<16x32xf32>
    %45 = tpu.matmul %31, %44, %cst_51 {dimension_numbers = #tpu.dot_dimension_numbers<[1], [0], [0], [1], [0, 0, 1, 1], [], []>} : vector<16x32xbf16>, vector<32x32xbf16>, vector<16x32xf32> -> vector<16x32xf32>
    %c1_52 = arith.constant 1 : index
    %c1_53 = arith.constant 1 : index
    %c0_54 = arith.constant 0 : index
    %c0_55 = arith.constant 0 : index
    %46 = vector.load %arg5[%c1_52, %c1_53, %c0_54, %c0_55] : memref<8x2x32x32xbf16, #tpu.memory_space<vmem>>, vector<1x1x32x32xbf16>
    %47 = vector.shape_cast %46 : vector<1x1x32x32xbf16> to vector<32x32xbf16>
    %cst_56 = arith.constant dense<0.000000e+00> : vector<16x32xf32>
    %48 = tpu.matmul %33, %47, %cst_56 {dimension_numbers = #tpu.dot_dimension_numbers<[1], [0], [0], [1], [0, 0, 1, 1], [], []>} : vector<16x32xbf16>, vector<32x32xbf16>, vector<16x32xf32> -> vector<16x32xf32>
    %49 = arith.addf %45, %48 : vector<16x32xf32>
    %50 = arith.mulf %7, %49 : vector<16x32xf32>
    %51 = arith.addf %42, %50 : vector<16x32xf32>
    %c2_57 = arith.constant 2 : index
    %c0_58 = arith.constant 0 : index
    %c0_59 = arith.constant 0 : index
    %c0_60 = arith.constant 0 : index
    %52 = vector.load %arg5[%c2_57, %c0_58, %c0_59, %c0_60] : memref<8x2x32x32xbf16, #tpu.memory_space<vmem>>, vector<1x1x32x32xbf16>
    %53 = vector.shape_cast %52 : vector<1x1x32x32xbf16> to vector<32x32xbf16>
    %cst_61 = arith.constant dense<0.000000e+00> : vector<16x32xf32>
    %54 = tpu.matmul %31, %53, %cst_61 {dimension_numbers = #tpu.dot_dimension_numbers<[1], [0], [0], [1], [0, 0, 1, 1], [], []>} : vector<16x32xbf16>, vector<32x32xbf16>, vector<16x32xf32> -> vector<16x32xf32>
    %c2_62 = arith.constant 2 : index
    %c1_63 = arith.constant 1 : index
    %c0_64 = arith.constant 0 : index
    %c0_65 = arith.constant 0 : index
    %55 = vector.load %arg5[%c2_62, %c1_63, %c0_64, %c0_65] : memref<8x2x32x32xbf16, #tpu.memory_space<vmem>>, vector<1x1x32x32xbf16>
    %56 = vector.shape_cast %55 : vector<1x1x32x32xbf16> to vector<32x32xbf16>
    %cst_66 = arith.constant dense<0.000000e+00> : vector<16x32xf32>
    %57 = tpu.matmul %33, %56, %cst_66 {dimension_numbers = #tpu.dot_dimension_numbers<[1], [0], [0], [1], [0, 0, 1, 1], [], []>} : vector<16x32xbf16>, vector<32x32xbf16>, vector<16x32xf32> -> vector<16x32xf32>
    %58 = arith.addf %54, %57 : vector<16x32xf32>
    %59 = arith.mulf %9, %58 : vector<16x32xf32>
    %60 = arith.addf %51, %59 : vector<16x32xf32>
    %c3_67 = arith.constant 3 : index
    %c0_68 = arith.constant 0 : index
    %c0_69 = arith.constant 0 : index
    %c0_70 = arith.constant 0 : index
    %61 = vector.load %arg5[%c3_67, %c0_68, %c0_69, %c0_70] : memref<8x2x32x32xbf16, #tpu.memory_space<vmem>>, vector<1x1x32x32xbf16>
    %62 = vector.shape_cast %61 : vector<1x1x32x32xbf16> to vector<32x32xbf16>
    %cst_71 = arith.constant dense<0.000000e+00> : vector<16x32xf32>
    %63 = tpu.matmul %31, %62, %cst_71 {dimension_numbers = #tpu.dot_dimension_numbers<[1], [0], [0], [1], [0, 0, 1, 1], [], []>} : vector<16x32xbf16>, vector<32x32xbf16>, vector<16x32xf32> -> vector<16x32xf32>
    %c3_72 = arith.constant 3 : index
    %c1_73 = arith.constant 1 : index
    %c0_74 = arith.constant 0 : index
    %c0_75 = arith.constant 0 : index
    %64 = vector.load %arg5[%c3_72, %c1_73, %c0_74, %c0_75] : memref<8x2x32x32xbf16, #tpu.memory_space<vmem>>, vector<1x1x32x32xbf16>
    %65 = vector.shape_cast %64 : vector<1x1x32x32xbf16> to vector<32x32xbf16>
    %cst_76 = arith.constant dense<0.000000e+00> : vector<16x32xf32>
    %66 = tpu.matmul %33, %65, %cst_76 {dimension_numbers = #tpu.dot_dimension_numbers<[1], [0], [0], [1], [0, 0, 1, 1], [], []>} : vector<16x32xbf16>, vector<32x32xbf16>, vector<16x32xf32> -> vector<16x32xf32>
    %67 = arith.addf %63, %66 : vector<16x32xf32>
    %68 = arith.mulf %11, %67 : vector<16x32xf32>
    %69 = arith.addf %60, %68 : vector<16x32xf32>
    %c4_77 = arith.constant 4 : index
    %c0_78 = arith.constant 0 : index
    %c0_79 = arith.constant 0 : index
    %c0_80 = arith.constant 0 : index
    %70 = vector.load %arg5[%c4_77, %c0_78, %c0_79, %c0_80] : memref<8x2x32x32xbf16, #tpu.memory_space<vmem>>, vector<1x1x32x32xbf16>
    %71 = vector.shape_cast %70 : vector<1x1x32x32xbf16> to vector<32x32xbf16>
    %cst_81 = arith.constant dense<0.000000e+00> : vector<16x32xf32>
    %72 = tpu.matmul %31, %71, %cst_81 {dimension_numbers = #tpu.dot_dimension_numbers<[1], [0], [0], [1], [0, 0, 1, 1], [], []>} : vector<16x32xbf16>, vector<32x32xbf16>, vector<16x32xf32> -> vector<16x32xf32>
    %c4_82 = arith.constant 4 : index
    %c1_83 = arith.constant 1 : index
    %c0_84 = arith.constant 0 : index
    %c0_85 = arith.constant 0 : index
    %73 = vector.load %arg5[%c4_82, %c1_83, %c0_84, %c0_85] : memref<8x2x32x32xbf16, #tpu.memory_space<vmem>>, vector<1x1x32x32xbf16>
    %74 = vector.shape_cast %73 : vector<1x1x32x32xbf16> to vector<32x32xbf16>
    %cst_86 = arith.constant dense<0.000000e+00> : vector<16x32xf32>
    %75 = tpu.matmul %33, %74, %cst_86 {dimension_numbers = #tpu.dot_dimension_numbers<[1], [0], [0], [1], [0, 0, 1, 1], [], []>} : vector<16x32xbf16>, vector<32x32xbf16>, vector<16x32xf32> -> vector<16x32xf32>
    %76 = arith.addf %72, %75 : vector<16x32xf32>
    %77 = arith.mulf %13, %76 : vector<16x32xf32>
    %78 = arith.addf %69, %77 : vector<16x32xf32>
    %c5_87 = arith.constant 5 : index
    %c0_88 = arith.constant 0 : index
    %c0_89 = arith.constant 0 : index
    %c0_90 = arith.constant 0 : index
    %79 = vector.load %arg5[%c5_87, %c0_88, %c0_89, %c0_90] : memref<8x2x32x32xbf16, #tpu.memory_space<vmem>>, vector<1x1x32x32xbf16>
    %80 = vector.shape_cast %79 : vector<1x1x32x32xbf16> to vector<32x32xbf16>
    %cst_91 = arith.constant dense<0.000000e+00> : vector<16x32xf32>
    %81 = tpu.matmul %31, %80, %cst_91 {dimension_numbers = #tpu.dot_dimension_numbers<[1], [0], [0], [1], [0, 0, 1, 1], [], []>} : vector<16x32xbf16>, vector<32x32xbf16>, vector<16x32xf32> -> vector<16x32xf32>
    %c5_92 = arith.constant 5 : index
    %c1_93 = arith.constant 1 : index
    %c0_94 = arith.constant 0 : index
    %c0_95 = arith.constant 0 : index
    %82 = vector.load %arg5[%c5_92, %c1_93, %c0_94, %c0_95] : memref<8x2x32x32xbf16, #tpu.memory_space<vmem>>, vector<1x1x32x32xbf16>
    %83 = vector.shape_cast %82 : vector<1x1x32x32xbf16> to vector<32x32xbf16>
    %cst_96 = arith.constant dense<0.000000e+00> : vector<16x32xf32>
    %84 = tpu.matmul %33, %83, %cst_96 {dimension_numbers = #tpu.dot_dimension_numbers<[1], [0], [0], [1], [0, 0, 1, 1], [], []>} : vector<16x32xbf16>, vector<32x32xbf16>, vector<16x32xf32> -> vector<16x32xf32>
    %85 = arith.addf %81, %84 : vector<16x32xf32>
    %86 = arith.mulf %15, %85 : vector<16x32xf32>
    %87 = arith.addf %78, %86 : vector<16x32xf32>
    %c6_97 = arith.constant 6 : index
    %c0_98 = arith.constant 0 : index
    %c0_99 = arith.constant 0 : index
    %c0_100 = arith.constant 0 : index
    %88 = vector.load %arg5[%c6_97, %c0_98, %c0_99, %c0_100] : memref<8x2x32x32xbf16, #tpu.memory_space<vmem>>, vector<1x1x32x32xbf16>
    %89 = vector.shape_cast %88 : vector<1x1x32x32xbf16> to vector<32x32xbf16>
    %cst_101 = arith.constant dense<0.000000e+00> : vector<16x32xf32>
    %90 = tpu.matmul %31, %89, %cst_101 {dimension_numbers = #tpu.dot_dimension_numbers<[1], [0], [0], [1], [0, 0, 1, 1], [], []>} : vector<16x32xbf16>, vector<32x32xbf16>, vector<16x32xf32> -> vector<16x32xf32>
    %c6_102 = arith.constant 6 : index
    %c1_103 = arith.constant 1 : index
    %c0_104 = arith.constant 0 : index
    %c0_105 = arith.constant 0 : index
    %91 = vector.load %arg5[%c6_102, %c1_103, %c0_104, %c0_105] : memref<8x2x32x32xbf16, #tpu.memory_space<vmem>>, vector<1x1x32x32xbf16>
    %92 = vector.shape_cast %91 : vector<1x1x32x32xbf16> to vector<32x32xbf16>
    %cst_106 = arith.constant dense<0.000000e+00> : vector<16x32xf32>
    %93 = tpu.matmul %33, %92, %cst_106 {dimension_numbers = #tpu.dot_dimension_numbers<[1], [0], [0], [1], [0, 0, 1, 1], [], []>} : vector<16x32xbf16>, vector<32x32xbf16>, vector<16x32xf32> -> vector<16x32xf32>
    %94 = arith.addf %90, %93 : vector<16x32xf32>
    %95 = arith.mulf %17, %94 : vector<16x32xf32>
    %96 = arith.addf %87, %95 : vector<16x32xf32>
    %c7_107 = arith.constant 7 : index
    %c0_108 = arith.constant 0 : index
    %c0_109 = arith.constant 0 : index
    %c0_110 = arith.constant 0 : index
    %97 = vector.load %arg5[%c7_107, %c0_108, %c0_109, %c0_110] : memref<8x2x32x32xbf16, #tpu.memory_space<vmem>>, vector<1x1x32x32xbf16>
    %98 = vector.shape_cast %97 : vector<1x1x32x32xbf16> to vector<32x32xbf16>
    %cst_111 = arith.constant dense<0.000000e+00> : vector<16x32xf32>
    %99 = tpu.matmul %31, %98, %cst_111 {dimension_numbers = #tpu.dot_dimension_numbers<[1], [0], [0], [1], [0, 0, 1, 1], [], []>} : vector<16x32xbf16>, vector<32x32xbf16>, vector<16x32xf32> -> vector<16x32xf32>
    %c7_112 = arith.constant 7 : index
    %c1_113 = arith.constant 1 : index
    %c0_114 = arith.constant 0 : index
    %c0_115 = arith.constant 0 : index
    %100 = vector.load %arg5[%c7_112, %c1_113, %c0_114, %c0_115] : memref<8x2x32x32xbf16, #tpu.memory_space<vmem>>, vector<1x1x32x32xbf16>
    %101 = vector.shape_cast %100 : vector<1x1x32x32xbf16> to vector<32x32xbf16>
    %cst_116 = arith.constant dense<0.000000e+00> : vector<16x32xf32>
    %102 = tpu.matmul %33, %101, %cst_116 {dimension_numbers = #tpu.dot_dimension_numbers<[1], [0], [0], [1], [0, 0, 1, 1], [], []>} : vector<16x32xbf16>, vector<32x32xbf16>, vector<16x32xf32> -> vector<16x32xf32>
    %103 = arith.addf %99, %102 : vector<16x32xf32>
    %104 = arith.mulf %19, %103 : vector<16x32xf32>
    %105 = arith.addf %96, %104 : vector<16x32xf32>
    %106 = arith.negf %105 : vector<16x32xf32>
    %107 = math.exp %106 : vector<16x32xf32>
    %cst_117 = arith.constant 1.000000e+00 : f32
    %108 = vector.broadcast %cst_117 : f32 to vector<16x32xf32>
    %109 = arith.addf %108, %107 : vector<16x32xf32>
    %110 = arith.divf %108, %109 : vector<16x32xf32>
    %c0_118 = arith.constant 0 : index
    %c0_119 = arith.constant 0 : index
    %c0_120 = arith.constant 0 : index
    %c0_121 = arith.constant 0 : index
    %111 = vector.load %arg6[%c0_118, %c0_119, %c0_120, %c0_121] : memref<8x2x32x32xbf16, #tpu.memory_space<vmem>>, vector<1x1x32x32xbf16>
    %112 = vector.shape_cast %111 : vector<1x1x32x32xbf16> to vector<32x32xbf16>
    %cst_122 = arith.constant dense<0.000000e+00> : vector<16x32xf32>
    %113 = tpu.matmul %31, %112, %cst_122 {dimension_numbers = #tpu.dot_dimension_numbers<[1], [0], [0], [1], [0, 0, 1, 1], [], []>} : vector<16x32xbf16>, vector<32x32xbf16>, vector<16x32xf32> -> vector<16x32xf32>
    %c0_123 = arith.constant 0 : index
    %c1_124 = arith.constant 1 : index
    %c0_125 = arith.constant 0 : index
    %c0_126 = arith.constant 0 : index
    %114 = vector.load %arg6[%c0_123, %c1_124, %c0_125, %c0_126] : memref<8x2x32x32xbf16, #tpu.memory_space<vmem>>, vector<1x1x32x32xbf16>
    %115 = vector.shape_cast %114 : vector<1x1x32x32xbf16> to vector<32x32xbf16>
    %cst_127 = arith.constant dense<0.000000e+00> : vector<16x32xf32>
    %116 = tpu.matmul %33, %115, %cst_127 {dimension_numbers = #tpu.dot_dimension_numbers<[1], [0], [0], [1], [0, 0, 1, 1], [], []>} : vector<16x32xbf16>, vector<32x32xbf16>, vector<16x32xf32> -> vector<16x32xf32>
    %117 = arith.addf %113, %116 : vector<16x32xf32>
    %118 = arith.mulf %5, %117 : vector<16x32xf32>
    %119 = arith.addf %23, %118 : vector<16x32xf32>
    %c1_128 = arith.constant 1 : index
    %c0_129 = arith.constant 0 : index
    %c0_130 = arith.constant 0 : index
    %c0_131 = arith.constant 0 : index
    %120 = vector.load %arg6[%c1_128, %c0_129, %c0_130, %c0_131] : memref<8x2x32x32xbf16, #tpu.memory_space<vmem>>, vector<1x1x32x32xbf16>
    %121 = vector.shape_cast %120 : vector<1x1x32x32xbf16> to vector<32x32xbf16>
    %cst_132 = arith.constant dense<0.000000e+00> : vector<16x32xf32>
    %122 = tpu.matmul %31, %121, %cst_132 {dimension_numbers = #tpu.dot_dimension_numbers<[1], [0], [0], [1], [0, 0, 1, 1], [], []>} : vector<16x32xbf16>, vector<32x32xbf16>, vector<16x32xf32> -> vector<16x32xf32>
    %c1_133 = arith.constant 1 : index
    %c1_134 = arith.constant 1 : index
    %c0_135 = arith.constant 0 : index
    %c0_136 = arith.constant 0 : index
    %123 = vector.load %arg6[%c1_133, %c1_134, %c0_135, %c0_136] : memref<8x2x32x32xbf16, #tpu.memory_space<vmem>>, vector<1x1x32x32xbf16>
    %124 = vector.shape_cast %123 : vector<1x1x32x32xbf16> to vector<32x32xbf16>
    %cst_137 = arith.constant dense<0.000000e+00> : vector<16x32xf32>
    %125 = tpu.matmul %33, %124, %cst_137 {dimension_numbers = #tpu.dot_dimension_numbers<[1], [0], [0], [1], [0, 0, 1, 1], [], []>} : vector<16x32xbf16>, vector<32x32xbf16>, vector<16x32xf32> -> vector<16x32xf32>
    %126 = arith.addf %122, %125 : vector<16x32xf32>
    %127 = arith.mulf %7, %126 : vector<16x32xf32>
    %128 = arith.addf %119, %127 : vector<16x32xf32>
    %c2_138 = arith.constant 2 : index
    %c0_139 = arith.constant 0 : index
    %c0_140 = arith.constant 0 : index
    %c0_141 = arith.constant 0 : index
    %129 = vector.load %arg6[%c2_138, %c0_139, %c0_140, %c0_141] : memref<8x2x32x32xbf16, #tpu.memory_space<vmem>>, vector<1x1x32x32xbf16>
    %130 = vector.shape_cast %129 : vector<1x1x32x32xbf16> to vector<32x32xbf16>
    %cst_142 = arith.constant dense<0.000000e+00> : vector<16x32xf32>
    %131 = tpu.matmul %31, %130, %cst_142 {dimension_numbers = #tpu.dot_dimension_numbers<[1], [0], [0], [1], [0, 0, 1, 1], [], []>} : vector<16x32xbf16>, vector<32x32xbf16>, vector<16x32xf32> -> vector<16x32xf32>
    %c2_143 = arith.constant 2 : index
    %c1_144 = arith.constant 1 : index
    %c0_145 = arith.constant 0 : index
    %c0_146 = arith.constant 0 : index
    %132 = vector.load %arg6[%c2_143, %c1_144, %c0_145, %c0_146] : memref<8x2x32x32xbf16, #tpu.memory_space<vmem>>, vector<1x1x32x32xbf16>
    %133 = vector.shape_cast %132 : vector<1x1x32x32xbf16> to vector<32x32xbf16>
    %cst_147 = arith.constant dense<0.000000e+00> : vector<16x32xf32>
    %134 = tpu.matmul %33, %133, %cst_147 {dimension_numbers = #tpu.dot_dimension_numbers<[1], [0], [0], [1], [0, 0, 1, 1], [], []>} : vector<16x32xbf16>, vector<32x32xbf16>, vector<16x32xf32> -> vector<16x32xf32>
    %135 = arith.addf %131, %134 : vector<16x32xf32>
    %136 = arith.mulf %9, %135 : vector<16x32xf32>
    %137 = arith.addf %128, %136 : vector<16x32xf32>
    %c3_148 = arith.constant 3 : index
    %c0_149 = arith.constant 0 : index
    %c0_150 = arith.constant 0 : index
    %c0_151 = arith.constant 0 : index
    %138 = vector.load %arg6[%c3_148, %c0_149, %c0_150, %c0_151] : memref<8x2x32x32xbf16, #tpu.memory_space<vmem>>, vector<1x1x32x32xbf16>
    %139 = vector.shape_cast %138 : vector<1x1x32x32xbf16> to vector<32x32xbf16>
    %cst_152 = arith.constant dense<0.000000e+00> : vector<16x32xf32>
    %140 = tpu.matmul %31, %139, %cst_152 {dimension_numbers = #tpu.dot_dimension_numbers<[1], [0], [0], [1], [0, 0, 1, 1], [], []>} : vector<16x32xbf16>, vector<32x32xbf16>, vector<16x32xf32> -> vector<16x32xf32>
    %c3_153 = arith.constant 3 : index
    %c1_154 = arith.constant 1 : index
    %c0_155 = arith.constant 0 : index
    %c0_156 = arith.constant 0 : index
    %141 = vector.load %arg6[%c3_153, %c1_154, %c0_155, %c0_156] : memref<8x2x32x32xbf16, #tpu.memory_space<vmem>>, vector<1x1x32x32xbf16>
    %142 = vector.shape_cast %141 : vector<1x1x32x32xbf16> to vector<32x32xbf16>
    %cst_157 = arith.constant dense<0.000000e+00> : vector<16x32xf32>
    %143 = tpu.matmul %33, %142, %cst_157 {dimension_numbers = #tpu.dot_dimension_numbers<[1], [0], [0], [1], [0, 0, 1, 1], [], []>} : vector<16x32xbf16>, vector<32x32xbf16>, vector<16x32xf32> -> vector<16x32xf32>
    %144 = arith.addf %140, %143 : vector<16x32xf32>
    %145 = arith.mulf %11, %144 : vector<16x32xf32>
    %146 = arith.addf %137, %145 : vector<16x32xf32>
    %c4_158 = arith.constant 4 : index
    %c0_159 = arith.constant 0 : index
    %c0_160 = arith.constant 0 : index
    %c0_161 = arith.constant 0 : index
    %147 = vector.load %arg6[%c4_158, %c0_159, %c0_160, %c0_161] : memref<8x2x32x32xbf16, #tpu.memory_space<vmem>>, vector<1x1x32x32xbf16>
    %148 = vector.shape_cast %147 : vector<1x1x32x32xbf16> to vector<32x32xbf16>
    %cst_162 = arith.constant dense<0.000000e+00> : vector<16x32xf32>
    %149 = tpu.matmul %31, %148, %cst_162 {dimension_numbers = #tpu.dot_dimension_numbers<[1], [0], [0], [1], [0, 0, 1, 1], [], []>} : vector<16x32xbf16>, vector<32x32xbf16>, vector<16x32xf32> -> vector<16x32xf32>
    %c4_163 = arith.constant 4 : index
    %c1_164 = arith.constant 1 : index
    %c0_165 = arith.constant 0 : index
    %c0_166 = arith.constant 0 : index
    %150 = vector.load %arg6[%c4_163, %c1_164, %c0_165, %c0_166] : memref<8x2x32x32xbf16, #tpu.memory_space<vmem>>, vector<1x1x32x32xbf16>
    %151 = vector.shape_cast %150 : vector<1x1x32x32xbf16> to vector<32x32xbf16>
    %cst_167 = arith.constant dense<0.000000e+00> : vector<16x32xf32>
    %152 = tpu.matmul %33, %151, %cst_167 {dimension_numbers = #tpu.dot_dimension_numbers<[1], [0], [0], [1], [0, 0, 1, 1], [], []>} : vector<16x32xbf16>, vector<32x32xbf16>, vector<16x32xf32> -> vector<16x32xf32>
    %153 = arith.addf %149, %152 : vector<16x32xf32>
    %154 = arith.mulf %13, %153 : vector<16x32xf32>
    %155 = arith.addf %146, %154 : vector<16x32xf32>
    %c5_168 = arith.constant 5 : index
    %c0_169 = arith.constant 0 : index
    %c0_170 = arith.constant 0 : index
    %c0_171 = arith.constant 0 : index
    %156 = vector.load %arg6[%c5_168, %c0_169, %c0_170, %c0_171] : memref<8x2x32x32xbf16, #tpu.memory_space<vmem>>, vector<1x1x32x32xbf16>
    %157 = vector.shape_cast %156 : vector<1x1x32x32xbf16> to vector<32x32xbf16>
    %cst_172 = arith.constant dense<0.000000e+00> : vector<16x32xf32>
    %158 = tpu.matmul %31, %157, %cst_172 {dimension_numbers = #tpu.dot_dimension_numbers<[1], [0], [0], [1], [0, 0, 1, 1], [], []>} : vector<16x32xbf16>, vector<32x32xbf16>, vector<16x32xf32> -> vector<16x32xf32>
    %c5_173 = arith.constant 5 : index
    %c1_174 = arith.constant 1 : index
    %c0_175 = arith.constant 0 : index
    %c0_176 = arith.constant 0 : index
    %159 = vector.load %arg6[%c5_173, %c1_174, %c0_175, %c0_176] : memref<8x2x32x32xbf16, #tpu.memory_space<vmem>>, vector<1x1x32x32xbf16>
    %160 = vector.shape_cast %159 : vector<1x1x32x32xbf16> to vector<32x32xbf16>
    %cst_177 = arith.constant dense<0.000000e+00> : vector<16x32xf32>
    %161 = tpu.matmul %33, %160, %cst_177 {dimension_numbers = #tpu.dot_dimension_numbers<[1], [0], [0], [1], [0, 0, 1, 1], [], []>} : vector<16x32xbf16>, vector<32x32xbf16>, vector<16x32xf32> -> vector<16x32xf32>
    %162 = arith.addf %158, %161 : vector<16x32xf32>
    %163 = arith.mulf %15, %162 : vector<16x32xf32>
    %164 = arith.addf %155, %163 : vector<16x32xf32>
    %c6_178 = arith.constant 6 : index
    %c0_179 = arith.constant 0 : index
    %c0_180 = arith.constant 0 : index
    %c0_181 = arith.constant 0 : index
    %165 = vector.load %arg6[%c6_178, %c0_179, %c0_180, %c0_181] : memref<8x2x32x32xbf16, #tpu.memory_space<vmem>>, vector<1x1x32x32xbf16>
    %166 = vector.shape_cast %165 : vector<1x1x32x32xbf16> to vector<32x32xbf16>
    %cst_182 = arith.constant dense<0.000000e+00> : vector<16x32xf32>
    %167 = tpu.matmul %31, %166, %cst_182 {dimension_numbers = #tpu.dot_dimension_numbers<[1], [0], [0], [1], [0, 0, 1, 1], [], []>} : vector<16x32xbf16>, vector<32x32xbf16>, vector<16x32xf32> -> vector<16x32xf32>
    %c6_183 = arith.constant 6 : index
    %c1_184 = arith.constant 1 : index
    %c0_185 = arith.constant 0 : index
    %c0_186 = arith.constant 0 : index
    %168 = vector.load %arg6[%c6_183, %c1_184, %c0_185, %c0_186] : memref<8x2x32x32xbf16, #tpu.memory_space<vmem>>, vector<1x1x32x32xbf16>
    %169 = vector.shape_cast %168 : vector<1x1x32x32xbf16> to vector<32x32xbf16>
    %cst_187 = arith.constant dense<0.000000e+00> : vector<16x32xf32>
    %170 = tpu.matmul %33, %169, %cst_187 {dimension_numbers = #tpu.dot_dimension_numbers<[1], [0], [0], [1], [0, 0, 1, 1], [], []>} : vector<16x32xbf16>, vector<32x32xbf16>, vector<16x32xf32> -> vector<16x32xf32>
    %171 = arith.addf %167, %170 : vector<16x32xf32>
    %172 = arith.mulf %17, %171 : vector<16x32xf32>
    %173 = arith.addf %164, %172 : vector<16x32xf32>
    %c7_188 = arith.constant 7 : index
    %c0_189 = arith.constant 0 : index
    %c0_190 = arith.constant 0 : index
    %c0_191 = arith.constant 0 : index
    %174 = vector.load %arg6[%c7_188, %c0_189, %c0_190, %c0_191] : memref<8x2x32x32xbf16, #tpu.memory_space<vmem>>, vector<1x1x32x32xbf16>
    %175 = vector.shape_cast %174 : vector<1x1x32x32xbf16> to vector<32x32xbf16>
    %cst_192 = arith.constant dense<0.000000e+00> : vector<16x32xf32>
    %176 = tpu.matmul %31, %175, %cst_192 {dimension_numbers = #tpu.dot_dimension_numbers<[1], [0], [0], [1], [0, 0, 1, 1], [], []>} : vector<16x32xbf16>, vector<32x32xbf16>, vector<16x32xf32> -> vector<16x32xf32>
    %c7_193 = arith.constant 7 : index
    %c1_194 = arith.constant 1 : index
    %c0_195 = arith.constant 0 : index
    %c0_196 = arith.constant 0 : index
    %177 = vector.load %arg6[%c7_193, %c1_194, %c0_195, %c0_196] : memref<8x2x32x32xbf16, #tpu.memory_space<vmem>>, vector<1x1x32x32xbf16>
    %178 = vector.shape_cast %177 : vector<1x1x32x32xbf16> to vector<32x32xbf16>
    %cst_197 = arith.constant dense<0.000000e+00> : vector<16x32xf32>
    %179 = tpu.matmul %33, %178, %cst_197 {dimension_numbers = #tpu.dot_dimension_numbers<[1], [0], [0], [1], [0, 0, 1, 1], [], []>} : vector<16x32xbf16>, vector<32x32xbf16>, vector<16x32xf32> -> vector<16x32xf32>
    %180 = arith.addf %176, %179 : vector<16x32xf32>
    %181 = arith.mulf %19, %180 : vector<16x32xf32>
    %182 = arith.addf %173, %181 : vector<16x32xf32>
    %183 = arith.negf %182 : vector<16x32xf32>
    %184 = math.exp %183 : vector<16x32xf32>
    %cst_198 = arith.constant 1.000000e+00 : f32
    %185 = vector.broadcast %cst_198 : f32 to vector<16x32xf32>
    %186 = arith.addf %185, %184 : vector<16x32xf32>
    %187 = arith.divf %185, %186 : vector<16x32xf32>
    %188 = arith.mulf %110, %27 : vector<16x32xf32>
    %189 = arith.truncf %188 : vector<16x32xf32> to vector<16x32xbf16>
    %cst_199 = arith.constant dense<0.000000e+00> : vector<32x32xf32>
    %190 = tpu.matmul %3, %189, %cst_199 {dimension_numbers = #tpu.dot_dimension_numbers<[1], [0], [0], [1], [0, 0, 1, 1], [], []>} : vector<32x16xbf16>, vector<16x32xbf16>, vector<32x32xf32> -> vector<32x32xf32>
    %191 = vector.extract_strided_slice %190 {offsets = [0, 0], sizes = [16, 32], strides = [1, 1]} : vector<32x32xf32> to vector<16x32xf32>
    %192 = arith.truncf %191 : vector<16x32xf32> to vector<16x32xbf16>
    %193 = vector.extract_strided_slice %190 {offsets = [16, 0], sizes = [16, 32], strides = [1, 1]} : vector<32x32xf32> to vector<16x32xf32>
    %194 = arith.truncf %193 : vector<16x32xf32> to vector<16x32xbf16>
    %c0_200 = arith.constant 0 : index
    %c0_201 = arith.constant 0 : index
    %c0_202 = arith.constant 0 : index
    %c0_203 = arith.constant 0 : index
    %195 = vector.load %arg7[%c0_200, %c0_201, %c0_202, %c0_203] : memref<8x2x32x32xbf16, #tpu.memory_space<vmem>>, vector<1x1x32x32xbf16>
    %196 = vector.shape_cast %195 : vector<1x1x32x32xbf16> to vector<32x32xbf16>
    %cst_204 = arith.constant dense<0.000000e+00> : vector<16x32xf32>
    %197 = tpu.matmul %192, %196, %cst_204 {dimension_numbers = #tpu.dot_dimension_numbers<[1], [0], [0], [1], [0, 0, 1, 1], [], []>} : vector<16x32xbf16>, vector<32x32xbf16>, vector<16x32xf32> -> vector<16x32xf32>
    %c0_205 = arith.constant 0 : index
    %c1_206 = arith.constant 1 : index
    %c0_207 = arith.constant 0 : index
    %c0_208 = arith.constant 0 : index
    %198 = vector.load %arg7[%c0_205, %c1_206, %c0_207, %c0_208] : memref<8x2x32x32xbf16, #tpu.memory_space<vmem>>, vector<1x1x32x32xbf16>
    %199 = vector.shape_cast %198 : vector<1x1x32x32xbf16> to vector<32x32xbf16>
    %cst_209 = arith.constant dense<0.000000e+00> : vector<16x32xf32>
    %200 = tpu.matmul %194, %199, %cst_209 {dimension_numbers = #tpu.dot_dimension_numbers<[1], [0], [0], [1], [0, 0, 1, 1], [], []>} : vector<16x32xbf16>, vector<32x32xbf16>, vector<16x32xf32> -> vector<16x32xf32>
    %201 = arith.addf %197, %200 : vector<16x32xf32>
    %202 = arith.mulf %5, %201 : vector<16x32xf32>
    %203 = arith.addf %25, %202 : vector<16x32xf32>
    %c1_210 = arith.constant 1 : index
    %c0_211 = arith.constant 0 : index
    %c0_212 = arith.constant 0 : index
    %c0_213 = arith.constant 0 : index
    %204 = vector.load %arg7[%c1_210, %c0_211, %c0_212, %c0_213] : memref<8x2x32x32xbf16, #tpu.memory_space<vmem>>, vector<1x1x32x32xbf16>
    %205 = vector.shape_cast %204 : vector<1x1x32x32xbf16> to vector<32x32xbf16>
    %cst_214 = arith.constant dense<0.000000e+00> : vector<16x32xf32>
    %206 = tpu.matmul %192, %205, %cst_214 {dimension_numbers = #tpu.dot_dimension_numbers<[1], [0], [0], [1], [0, 0, 1, 1], [], []>} : vector<16x32xbf16>, vector<32x32xbf16>, vector<16x32xf32> -> vector<16x32xf32>
    %c1_215 = arith.constant 1 : index
    %c1_216 = arith.constant 1 : index
    %c0_217 = arith.constant 0 : index
    %c0_218 = arith.constant 0 : index
    %207 = vector.load %arg7[%c1_215, %c1_216, %c0_217, %c0_218] : memref<8x2x32x32xbf16, #tpu.memory_space<vmem>>, vector<1x1x32x32xbf16>
    %208 = vector.shape_cast %207 : vector<1x1x32x32xbf16> to vector<32x32xbf16>
    %cst_219 = arith.constant dense<0.000000e+00> : vector<16x32xf32>
    %209 = tpu.matmul %194, %208, %cst_219 {dimension_numbers = #tpu.dot_dimension_numbers<[1], [0], [0], [1], [0, 0, 1, 1], [], []>} : vector<16x32xbf16>, vector<32x32xbf16>, vector<16x32xf32> -> vector<16x32xf32>
    %210 = arith.addf %206, %209 : vector<16x32xf32>
    %211 = arith.mulf %7, %210 : vector<16x32xf32>
    %212 = arith.addf %203, %211 : vector<16x32xf32>
    %c2_220 = arith.constant 2 : index
    %c0_221 = arith.constant 0 : index
    %c0_222 = arith.constant 0 : index
    %c0_223 = arith.constant 0 : index
    %213 = vector.load %arg7[%c2_220, %c0_221, %c0_222, %c0_223] : memref<8x2x32x32xbf16, #tpu.memory_space<vmem>>, vector<1x1x32x32xbf16>
    %214 = vector.shape_cast %213 : vector<1x1x32x32xbf16> to vector<32x32xbf16>
    %cst_224 = arith.constant dense<0.000000e+00> : vector<16x32xf32>
    %215 = tpu.matmul %192, %214, %cst_224 {dimension_numbers = #tpu.dot_dimension_numbers<[1], [0], [0], [1], [0, 0, 1, 1], [], []>} : vector<16x32xbf16>, vector<32x32xbf16>, vector<16x32xf32> -> vector<16x32xf32>
    %c2_225 = arith.constant 2 : index
    %c1_226 = arith.constant 1 : index
    %c0_227 = arith.constant 0 : index
    %c0_228 = arith.constant 0 : index
    %216 = vector.load %arg7[%c2_225, %c1_226, %c0_227, %c0_228] : memref<8x2x32x32xbf16, #tpu.memory_space<vmem>>, vector<1x1x32x32xbf16>
    %217 = vector.shape_cast %216 : vector<1x1x32x32xbf16> to vector<32x32xbf16>
    %cst_229 = arith.constant dense<0.000000e+00> : vector<16x32xf32>
    %218 = tpu.matmul %194, %217, %cst_229 {dimension_numbers = #tpu.dot_dimension_numbers<[1], [0], [0], [1], [0, 0, 1, 1], [], []>} : vector<16x32xbf16>, vector<32x32xbf16>, vector<16x32xf32> -> vector<16x32xf32>
    %219 = arith.addf %215, %218 : vector<16x32xf32>
    %220 = arith.mulf %9, %219 : vector<16x32xf32>
    %221 = arith.addf %212, %220 : vector<16x32xf32>
    %c3_230 = arith.constant 3 : index
    %c0_231 = arith.constant 0 : index
    %c0_232 = arith.constant 0 : index
    %c0_233 = arith.constant 0 : index
    %222 = vector.load %arg7[%c3_230, %c0_231, %c0_232, %c0_233] : memref<8x2x32x32xbf16, #tpu.memory_space<vmem>>, vector<1x1x32x32xbf16>
    %223 = vector.shape_cast %222 : vector<1x1x32x32xbf16> to vector<32x32xbf16>
    %cst_234 = arith.constant dense<0.000000e+00> : vector<16x32xf32>
    %224 = tpu.matmul %192, %223, %cst_234 {dimension_numbers = #tpu.dot_dimension_numbers<[1], [0], [0], [1], [0, 0, 1, 1], [], []>} : vector<16x32xbf16>, vector<32x32xbf16>, vector<16x32xf32> -> vector<16x32xf32>
    %c3_235 = arith.constant 3 : index
    %c1_236 = arith.constant 1 : index
    %c0_237 = arith.constant 0 : index
    %c0_238 = arith.constant 0 : index
    %225 = vector.load %arg7[%c3_235, %c1_236, %c0_237, %c0_238] : memref<8x2x32x32xbf16, #tpu.memory_space<vmem>>, vector<1x1x32x32xbf16>
    %226 = vector.shape_cast %225 : vector<1x1x32x32xbf16> to vector<32x32xbf16>
    %cst_239 = arith.constant dense<0.000000e+00> : vector<16x32xf32>
    %227 = tpu.matmul %194, %226, %cst_239 {dimension_numbers = #tpu.dot_dimension_numbers<[1], [0], [0], [1], [0, 0, 1, 1], [], []>} : vector<16x32xbf16>, vector<32x32xbf16>, vector<16x32xf32> -> vector<16x32xf32>
    %228 = arith.addf %224, %227 : vector<16x32xf32>
    %229 = arith.mulf %11, %228 : vector<16x32xf32>
    %230 = arith.addf %221, %229 : vector<16x32xf32>
    %c4_240 = arith.constant 4 : index
    %c0_241 = arith.constant 0 : index
    %c0_242 = arith.constant 0 : index
    %c0_243 = arith.constant 0 : index
    %231 = vector.load %arg7[%c4_240, %c0_241, %c0_242, %c0_243] : memref<8x2x32x32xbf16, #tpu.memory_space<vmem>>, vector<1x1x32x32xbf16>
    %232 = vector.shape_cast %231 : vector<1x1x32x32xbf16> to vector<32x32xbf16>
    %cst_244 = arith.constant dense<0.000000e+00> : vector<16x32xf32>
    %233 = tpu.matmul %192, %232, %cst_244 {dimension_numbers = #tpu.dot_dimension_numbers<[1], [0], [0], [1], [0, 0, 1, 1], [], []>} : vector<16x32xbf16>, vector<32x32xbf16>, vector<16x32xf32> -> vector<16x32xf32>
    %c4_245 = arith.constant 4 : index
    %c1_246 = arith.constant 1 : index
    %c0_247 = arith.constant 0 : index
    %c0_248 = arith.constant 0 : index
    %234 = vector.load %arg7[%c4_245, %c1_246, %c0_247, %c0_248] : memref<8x2x32x32xbf16, #tpu.memory_space<vmem>>, vector<1x1x32x32xbf16>
    %235 = vector.shape_cast %234 : vector<1x1x32x32xbf16> to vector<32x32xbf16>
    %cst_249 = arith.constant dense<0.000000e+00> : vector<16x32xf32>
    %236 = tpu.matmul %194, %235, %cst_249 {dimension_numbers = #tpu.dot_dimension_numbers<[1], [0], [0], [1], [0, 0, 1, 1], [], []>} : vector<16x32xbf16>, vector<32x32xbf16>, vector<16x32xf32> -> vector<16x32xf32>
    %237 = arith.addf %233, %236 : vector<16x32xf32>
    %238 = arith.mulf %13, %237 : vector<16x32xf32>
    %239 = arith.addf %230, %238 : vector<16x32xf32>
    %c5_250 = arith.constant 5 : index
    %c0_251 = arith.constant 0 : index
    %c0_252 = arith.constant 0 : index
    %c0_253 = arith.constant 0 : index
    %240 = vector.load %arg7[%c5_250, %c0_251, %c0_252, %c0_253] : memref<8x2x32x32xbf16, #tpu.memory_space<vmem>>, vector<1x1x32x32xbf16>
    %241 = vector.shape_cast %240 : vector<1x1x32x32xbf16> to vector<32x32xbf16>
    %cst_254 = arith.constant dense<0.000000e+00> : vector<16x32xf32>
    %242 = tpu.matmul %192, %241, %cst_254 {dimension_numbers = #tpu.dot_dimension_numbers<[1], [0], [0], [1], [0, 0, 1, 1], [], []>} : vector<16x32xbf16>, vector<32x32xbf16>, vector<16x32xf32> -> vector<16x32xf32>
    %c5_255 = arith.constant 5 : index
    %c1_256 = arith.constant 1 : index
    %c0_257 = arith.constant 0 : index
    %c0_258 = arith.constant 0 : index
    %243 = vector.load %arg7[%c5_255, %c1_256, %c0_257, %c0_258] : memref<8x2x32x32xbf16, #tpu.memory_space<vmem>>, vector<1x1x32x32xbf16>
    %244 = vector.shape_cast %243 : vector<1x1x32x32xbf16> to vector<32x32xbf16>
    %cst_259 = arith.constant dense<0.000000e+00> : vector<16x32xf32>
    %245 = tpu.matmul %194, %244, %cst_259 {dimension_numbers = #tpu.dot_dimension_numbers<[1], [0], [0], [1], [0, 0, 1, 1], [], []>} : vector<16x32xbf16>, vector<32x32xbf16>, vector<16x32xf32> -> vector<16x32xf32>
    %246 = arith.addf %242, %245 : vector<16x32xf32>
    %247 = arith.mulf %15, %246 : vector<16x32xf32>
    %248 = arith.addf %239, %247 : vector<16x32xf32>
    %c6_260 = arith.constant 6 : index
    %c0_261 = arith.constant 0 : index
    %c0_262 = arith.constant 0 : index
    %c0_263 = arith.constant 0 : index
    %249 = vector.load %arg7[%c6_260, %c0_261, %c0_262, %c0_263] : memref<8x2x32x32xbf16, #tpu.memory_space<vmem>>, vector<1x1x32x32xbf16>
    %250 = vector.shape_cast %249 : vector<1x1x32x32xbf16> to vector<32x32xbf16>
    %cst_264 = arith.constant dense<0.000000e+00> : vector<16x32xf32>
    %251 = tpu.matmul %192, %250, %cst_264 {dimension_numbers = #tpu.dot_dimension_numbers<[1], [0], [0], [1], [0, 0, 1, 1], [], []>} : vector<16x32xbf16>, vector<32x32xbf16>, vector<16x32xf32> -> vector<16x32xf32>
    %c6_265 = arith.constant 6 : index
    %c1_266 = arith.constant 1 : index
    %c0_267 = arith.constant 0 : index
    %c0_268 = arith.constant 0 : index
    %252 = vector.load %arg7[%c6_265, %c1_266, %c0_267, %c0_268] : memref<8x2x32x32xbf16, #tpu.memory_space<vmem>>, vector<1x1x32x32xbf16>
    %253 = vector.shape_cast %252 : vector<1x1x32x32xbf16> to vector<32x32xbf16>
    %cst_269 = arith.constant dense<0.000000e+00> : vector<16x32xf32>
    %254 = tpu.matmul %194, %253, %cst_269 {dimension_numbers = #tpu.dot_dimension_numbers<[1], [0], [0], [1], [0, 0, 1, 1], [], []>} : vector<16x32xbf16>, vector<32x32xbf16>, vector<16x32xf32> -> vector<16x32xf32>
    %255 = arith.addf %251, %254 : vector<16x32xf32>
    %256 = arith.mulf %17, %255 : vector<16x32xf32>
    %257 = arith.addf %248, %256 : vector<16x32xf32>
    %c7_270 = arith.constant 7 : index
    %c0_271 = arith.constant 0 : index
    %c0_272 = arith.constant 0 : index
    %c0_273 = arith.constant 0 : index
    %258 = vector.load %arg7[%c7_270, %c0_271, %c0_272, %c0_273] : memref<8x2x32x32xbf16, #tpu.memory_space<vmem>>, vector<1x1x32x32xbf16>
    %259 = vector.shape_cast %258 : vector<1x1x32x32xbf16> to vector<32x32xbf16>
    %cst_274 = arith.constant dense<0.000000e+00> : vector<16x32xf32>
    %260 = tpu.matmul %192, %259, %cst_274 {dimension_numbers = #tpu.dot_dimension_numbers<[1], [0], [0], [1], [0, 0, 1, 1], [], []>} : vector<16x32xbf16>, vector<32x32xbf16>, vector<16x32xf32> -> vector<16x32xf32>
    %c7_275 = arith.constant 7 : index
    %c1_276 = arith.constant 1 : index
    %c0_277 = arith.constant 0 : index
    %c0_278 = arith.constant 0 : index
    %261 = vector.load %arg7[%c7_275, %c1_276, %c0_277, %c0_278] : memref<8x2x32x32xbf16, #tpu.memory_space<vmem>>, vector<1x1x32x32xbf16>
    %262 = vector.shape_cast %261 : vector<1x1x32x32xbf16> to vector<32x32xbf16>
    %cst_279 = arith.constant dense<0.000000e+00> : vector<16x32xf32>
    %263 = tpu.matmul %194, %262, %cst_279 {dimension_numbers = #tpu.dot_dimension_numbers<[1], [0], [0], [1], [0, 0, 1, 1], [], []>} : vector<16x32xbf16>, vector<32x32xbf16>, vector<16x32xf32> -> vector<16x32xf32>
    %264 = arith.addf %260, %263 : vector<16x32xf32>
    %265 = arith.mulf %19, %264 : vector<16x32xf32>
    %266 = arith.addf %257, %265 : vector<16x32xf32>
    %267 = math.tanh %266 : vector<16x32xf32>
    %268 = arith.mulf %187, %27 : vector<16x32xf32>
    %cst_280 = arith.constant 1.000000e+00 : f32
    %269 = vector.broadcast %cst_280 : f32 to vector<16x32xf32>
    %270 = arith.subf %269, %187 : vector<16x32xf32>
    %271 = arith.mulf %270, %267 : vector<16x32xf32>
    %272 = arith.addf %268, %271 : vector<16x32xf32>
    %c0_281 = arith.constant 0 : index
    %c0_282 = arith.constant 0 : index
    %c0_283 = arith.constant 0 : index
    %273 = vector.load %arg16[%c0_281, %c0_282, %c0_283] : memref<2x16x32xf32, #tpu.memory_space<vmem>>, vector<1x16x32xf32>
    %274 = vector.shape_cast %273 : vector<1x16x32xf32> to vector<16x32xf32>
    %275 = vector.shape_cast %272 : vector<16x32xf32> to vector<1x16x32xf32>
    tpu.vector_store %arg16[%c0_281, %c0_282, %c0_283], %275 {strides = array<i32>} : memref<2x16x32xf32, #tpu.memory_space<vmem>>, vector<1x16x32xf32>,
    %276 = arith.truncf %272 : vector<16x32xf32> to vector<16x32xbf16>
    %cst_284 = arith.constant dense<0.000000e+00> : vector<32x32xf32>
    %277 = tpu.matmul %3, %276, %cst_284 {dimension_numbers = #tpu.dot_dimension_numbers<[1], [0], [0], [1], [0, 0, 1, 1], [], []>} : vector<32x16xbf16>, vector<16x32xbf16>, vector<32x32xf32> -> vector<32x32xf32>
    %278 = vector.extract_strided_slice %277 {offsets = [0, 0], sizes = [16, 32], strides = [1, 1]} : vector<32x32xf32> to vector<16x32xf32>
    %279 = arith.truncf %278 : vector<16x32xf32> to vector<16x32xbf16>
    %280 = vector.extract_strided_slice %277 {offsets = [16, 0], sizes = [16, 32], strides = [1, 1]} : vector<32x32xf32> to vector<16x32xf32>
    %281 = arith.truncf %280 : vector<16x32xf32> to vector<16x32xbf16>
    %c0_285 = arith.constant 0 : index
    %c0_286 = arith.constant 0 : index
    %c0_287 = arith.constant 0 : index
    %282 = vector.load %arg11[%c0_285, %c0_286, %c0_287] : memref<3x16x32xf32, #tpu.memory_space<vmem>>, vector<1x16x32xf32>
    %283 = vector.shape_cast %282 : vector<1x16x32xf32> to vector<16x32xf32>
    %c0_288 = arith.constant 0 : index
    %c0_289 = arith.constant 0 : index
    %c0_290 = arith.constant 0 : index
    %c0_291 = arith.constant 0 : index
    %284 = vector.load %arg8[%c0_288, %c0_289, %c0_290, %c0_291] : memref<8x2x32x32xbf16, #tpu.memory_space<vmem>>, vector<1x1x32x32xbf16>
    %285 = vector.shape_cast %284 : vector<1x1x32x32xbf16> to vector<32x32xbf16>
    %cst_292 = arith.constant dense<0.000000e+00> : vector<16x32xf32>
    %286 = tpu.matmul %279, %285, %cst_292 {dimension_numbers = #tpu.dot_dimension_numbers<[1], [0], [0], [1], [0, 0, 1, 1], [], []>} : vector<16x32xbf16>, vector<32x32xbf16>, vector<16x32xf32> -> vector<16x32xf32>
    %c0_293 = arith.constant 0 : index
    %c1_294 = arith.constant 1 : index
    %c0_295 = arith.constant 0 : index
    %c0_296 = arith.constant 0 : index
    %287 = vector.load %arg8[%c0_293, %c1_294, %c0_295, %c0_296] : memref<8x2x32x32xbf16, #tpu.memory_space<vmem>>, vector<1x1x32x32xbf16>
    %288 = vector.shape_cast %287 : vector<1x1x32x32xbf16> to vector<32x32xbf16>
    %cst_297 = arith.constant dense<0.000000e+00> : vector<16x32xf32>
    %289 = tpu.matmul %281, %288, %cst_297 {dimension_numbers = #tpu.dot_dimension_numbers<[1], [0], [0], [1], [0, 0, 1, 1], [], []>} : vector<16x32xbf16>, vector<32x32xbf16>, vector<16x32xf32> -> vector<16x32xf32>
    %290 = arith.addf %286, %289 : vector<16x32xf32>
    %291 = arith.mulf %5, %290 : vector<16x32xf32>
    %292 = arith.addf %283, %291 : vector<16x32xf32>
    %c1_298 = arith.constant 1 : index
    %c0_299 = arith.constant 0 : index
    %c0_300 = arith.constant 0 : index
    %c0_301 = arith.constant 0 : index
    %293 = vector.load %arg8[%c1_298, %c0_299, %c0_300, %c0_301] : memref<8x2x32x32xbf16, #tpu.memory_space<vmem>>, vector<1x1x32x32xbf16>
    %294 = vector.shape_cast %293 : vector<1x1x32x32xbf16> to vector<32x32xbf16>
    %cst_302 = arith.constant dense<0.000000e+00> : vector<16x32xf32>
    %295 = tpu.matmul %279, %294, %cst_302 {dimension_numbers = #tpu.dot_dimension_numbers<[1], [0], [0], [1], [0, 0, 1, 1], [], []>} : vector<16x32xbf16>, vector<32x32xbf16>, vector<16x32xf32> -> vector<16x32xf32>
    %c1_303 = arith.constant 1 : index
    %c1_304 = arith.constant 1 : index
    %c0_305 = arith.constant 0 : index
    %c0_306 = arith.constant 0 : index
    %296 = vector.load %arg8[%c1_303, %c1_304, %c0_305, %c0_306] : memref<8x2x32x32xbf16, #tpu.memory_space<vmem>>, vector<1x1x32x32xbf16>
    %297 = vector.shape_cast %296 : vector<1x1x32x32xbf16> to vector<32x32xbf16>
    %cst_307 = arith.constant dense<0.000000e+00> : vector<16x32xf32>
    %298 = tpu.matmul %281, %297, %cst_307 {dimension_numbers = #tpu.dot_dimension_numbers<[1], [0], [0], [1], [0, 0, 1, 1], [], []>} : vector<16x32xbf16>, vector<32x32xbf16>, vector<16x32xf32> -> vector<16x32xf32>
    %299 = arith.addf %295, %298 : vector<16x32xf32>
    %300 = arith.mulf %7, %299 : vector<16x32xf32>
    %301 = arith.addf %292, %300 : vector<16x32xf32>
    %c2_308 = arith.constant 2 : index
    %c0_309 = arith.constant 0 : index
    %c0_310 = arith.constant 0 : index
    %c0_311 = arith.constant 0 : index
    %302 = vector.load %arg8[%c2_308, %c0_309, %c0_310, %c0_311] : memref<8x2x32x32xbf16, #tpu.memory_space<vmem>>, vector<1x1x32x32xbf16>
    %303 = vector.shape_cast %302 : vector<1x1x32x32xbf16> to vector<32x32xbf16>
    %cst_312 = arith.constant dense<0.000000e+00> : vector<16x32xf32>
    %304 = tpu.matmul %279, %303, %cst_312 {dimension_numbers = #tpu.dot_dimension_numbers<[1], [0], [0], [1], [0, 0, 1, 1], [], []>} : vector<16x32xbf16>, vector<32x32xbf16>, vector<16x32xf32> -> vector<16x32xf32>
    %c2_313 = arith.constant 2 : index
    %c1_314 = arith.constant 1 : index
    %c0_315 = arith.constant 0 : index
    %c0_316 = arith.constant 0 : index
    %305 = vector.load %arg8[%c2_313, %c1_314, %c0_315, %c0_316] : memref<8x2x32x32xbf16, #tpu.memory_space<vmem>>, vector<1x1x32x32xbf16>
    %306 = vector.shape_cast %305 : vector<1x1x32x32xbf16> to vector<32x32xbf16>
    %cst_317 = arith.constant dense<0.000000e+00> : vector<16x32xf32>
    %307 = tpu.matmul %281, %306, %cst_317 {dimension_numbers = #tpu.dot_dimension_numbers<[1], [0], [0], [1], [0, 0, 1, 1], [], []>} : vector<16x32xbf16>, vector<32x32xbf16>, vector<16x32xf32> -> vector<16x32xf32>
    %308 = arith.addf %304, %307 : vector<16x32xf32>
    %309 = arith.mulf %9, %308 : vector<16x32xf32>
    %310 = arith.addf %301, %309 : vector<16x32xf32>
    %c3_318 = arith.constant 3 : index
    %c0_319 = arith.constant 0 : index
    %c0_320 = arith.constant 0 : index
    %c0_321 = arith.constant 0 : index
    %311 = vector.load %arg8[%c3_318, %c0_319, %c0_320, %c0_321] : memref<8x2x32x32xbf16, #tpu.memory_space<vmem>>, vector<1x1x32x32xbf16>
    %312 = vector.shape_cast %311 : vector<1x1x32x32xbf16> to vector<32x32xbf16>
    %cst_322 = arith.constant dense<0.000000e+00> : vector<16x32xf32>
    %313 = tpu.matmul %279, %312, %cst_322 {dimension_numbers = #tpu.dot_dimension_numbers<[1], [0], [0], [1], [0, 0, 1, 1], [], []>} : vector<16x32xbf16>, vector<32x32xbf16>, vector<16x32xf32> -> vector<16x32xf32>
    %c3_323 = arith.constant 3 : index
    %c1_324 = arith.constant 1 : index
    %c0_325 = arith.constant 0 : index
    %c0_326 = arith.constant 0 : index
    %314 = vector.load %arg8[%c3_323, %c1_324, %c0_325, %c0_326] : memref<8x2x32x32xbf16, #tpu.memory_space<vmem>>, vector<1x1x32x32xbf16>
    %315 = vector.shape_cast %314 : vector<1x1x32x32xbf16> to vector<32x32xbf16>
    %cst_327 = arith.constant dense<0.000000e+00> : vector<16x32xf32>
    %316 = tpu.matmul %281, %315, %cst_327 {dimension_numbers = #tpu.dot_dimension_numbers<[1], [0], [0], [1], [0, 0, 1, 1], [], []>} : vector<16x32xbf16>, vector<32x32xbf16>, vector<16x32xf32> -> vector<16x32xf32>
    %317 = arith.addf %313, %316 : vector<16x32xf32>
    %318 = arith.mulf %11, %317 : vector<16x32xf32>
    %319 = arith.addf %310, %318 : vector<16x32xf32>
    %c4_328 = arith.constant 4 : index
    %c0_329 = arith.constant 0 : index
    %c0_330 = arith.constant 0 : index
    %c0_331 = arith.constant 0 : index
    %320 = vector.load %arg8[%c4_328, %c0_329, %c0_330, %c0_331] : memref<8x2x32x32xbf16, #tpu.memory_space<vmem>>, vector<1x1x32x32xbf16>
    %321 = vector.shape_cast %320 : vector<1x1x32x32xbf16> to vector<32x32xbf16>
    %cst_332 = arith.constant dense<0.000000e+00> : vector<16x32xf32>
    %322 = tpu.matmul %279, %321, %cst_332 {dimension_numbers = #tpu.dot_dimension_numbers<[1], [0], [0], [1], [0, 0, 1, 1], [], []>} : vector<16x32xbf16>, vector<32x32xbf16>, vector<16x32xf32> -> vector<16x32xf32>
    %c4_333 = arith.constant 4 : index
    %c1_334 = arith.constant 1 : index
    %c0_335 = arith.constant 0 : index
    %c0_336 = arith.constant 0 : index
    %323 = vector.load %arg8[%c4_333, %c1_334, %c0_335, %c0_336] : memref<8x2x32x32xbf16, #tpu.memory_space<vmem>>, vector<1x1x32x32xbf16>
    %324 = vector.shape_cast %323 : vector<1x1x32x32xbf16> to vector<32x32xbf16>
    %cst_337 = arith.constant dense<0.000000e+00> : vector<16x32xf32>
    %325 = tpu.matmul %281, %324, %cst_337 {dimension_numbers = #tpu.dot_dimension_numbers<[1], [0], [0], [1], [0, 0, 1, 1], [], []>} : vector<16x32xbf16>, vector<32x32xbf16>, vector<16x32xf32> -> vector<16x32xf32>
    %326 = arith.addf %322, %325 : vector<16x32xf32>
    %327 = arith.mulf %13, %326 : vector<16x32xf32>
    %328 = arith.addf %319, %327 : vector<16x32xf32>
    %c5_338 = arith.constant 5 : index
    %c0_339 = arith.constant 0 : index
    %c0_340 = arith.constant 0 : index
    %c0_341 = arith.constant 0 : index
    %329 = vector.load %arg8[%c5_338, %c0_339, %c0_340, %c0_341] : memref<8x2x32x32xbf16, #tpu.memory_space<vmem>>, vector<1x1x32x32xbf16>
    %330 = vector.shape_cast %329 : vector<1x1x32x32xbf16> to vector<32x32xbf16>
    %cst_342 = arith.constant dense<0.000000e+00> : vector<16x32xf32>
    %331 = tpu.matmul %279, %330, %cst_342 {dimension_numbers = #tpu.dot_dimension_numbers<[1], [0], [0], [1], [0, 0, 1, 1], [], []>} : vector<16x32xbf16>, vector<32x32xbf16>, vector<16x32xf32> -> vector<16x32xf32>
    %c5_343 = arith.constant 5 : index
    %c1_344 = arith.constant 1 : index
    %c0_345 = arith.constant 0 : index
    %c0_346 = arith.constant 0 : index
    %332 = vector.load %arg8[%c5_343, %c1_344, %c0_345, %c0_346] : memref<8x2x32x32xbf16, #tpu.memory_space<vmem>>, vector<1x1x32x32xbf16>
    %333 = vector.shape_cast %332 : vector<1x1x32x32xbf16> to vector<32x32xbf16>
    %cst_347 = arith.constant dense<0.000000e+00> : vector<16x32xf32>
    %334 = tpu.matmul %281, %333, %cst_347 {dimension_numbers = #tpu.dot_dimension_numbers<[1], [0], [0], [1], [0, 0, 1, 1], [], []>} : vector<16x32xbf16>, vector<32x32xbf16>, vector<16x32xf32> -> vector<16x32xf32>
    %335 = arith.addf %331, %334 : vector<16x32xf32>
    %336 = arith.mulf %15, %335 : vector<16x32xf32>
    %337 = arith.addf %328, %336 : vector<16x32xf32>
    %c6_348 = arith.constant 6 : index
    %c0_349 = arith.constant 0 : index
    %c0_350 = arith.constant 0 : index
    %c0_351 = arith.constant 0 : index
    %338 = vector.load %arg8[%c6_348, %c0_349, %c0_350, %c0_351] : memref<8x2x32x32xbf16, #tpu.memory_space<vmem>>, vector<1x1x32x32xbf16>
    %339 = vector.shape_cast %338 : vector<1x1x32x32xbf16> to vector<32x32xbf16>
    %cst_352 = arith.constant dense<0.000000e+00> : vector<16x32xf32>
    %340 = tpu.matmul %279, %339, %cst_352 {dimension_numbers = #tpu.dot_dimension_numbers<[1], [0], [0], [1], [0, 0, 1, 1], [], []>} : vector<16x32xbf16>, vector<32x32xbf16>, vector<16x32xf32> -> vector<16x32xf32>
    %c6_353 = arith.constant 6 : index
    %c1_354 = arith.constant 1 : index
    %c0_355 = arith.constant 0 : index
    %c0_356 = arith.constant 0 : index
    %341 = vector.load %arg8[%c6_353, %c1_354, %c0_355, %c0_356] : memref<8x2x32x32xbf16, #tpu.memory_space<vmem>>, vector<1x1x32x32xbf16>
    %342 = vector.shape_cast %341 : vector<1x1x32x32xbf16> to vector<32x32xbf16>
    %cst_357 = arith.constant dense<0.000000e+00> : vector<16x32xf32>
    %343 = tpu.matmul %281, %342, %cst_357 {dimension_numbers = #tpu.dot_dimension_numbers<[1], [0], [0], [1], [0, 0, 1, 1], [], []>} : vector<16x32xbf16>, vector<32x32xbf16>, vector<16x32xf32> -> vector<16x32xf32>
    %344 = arith.addf %340, %343 : vector<16x32xf32>
    %345 = arith.mulf %17, %344 : vector<16x32xf32>
    %346 = arith.addf %337, %345 : vector<16x32xf32>
    %c7_358 = arith.constant 7 : index
    %c0_359 = arith.constant 0 : index
    %c0_360 = arith.constant 0 : index
    %c0_361 = arith.constant 0 : index
    %347 = vector.load %arg8[%c7_358, %c0_359, %c0_360, %c0_361] : memref<8x2x32x32xbf16, #tpu.memory_space<vmem>>, vector<1x1x32x32xbf16>
    %348 = vector.shape_cast %347 : vector<1x1x32x32xbf16> to vector<32x32xbf16>
    %cst_362 = arith.constant dense<0.000000e+00> : vector<16x32xf32>
    %349 = tpu.matmul %279, %348, %cst_362 {dimension_numbers = #tpu.dot_dimension_numbers<[1], [0], [0], [1], [0, 0, 1, 1], [], []>} : vector<16x32xbf16>, vector<32x32xbf16>, vector<16x32xf32> -> vector<16x32xf32>
    %c7_363 = arith.constant 7 : index
    %c1_364 = arith.constant 1 : index
    %c0_365 = arith.constant 0 : index
    %c0_366 = arith.constant 0 : index
    %350 = vector.load %arg8[%c7_363, %c1_364, %c0_365, %c0_366] : memref<8x2x32x32xbf16, #tpu.memory_space<vmem>>, vector<1x1x32x32xbf16>
    %351 = vector.shape_cast %350 : vector<1x1x32x32xbf16> to vector<32x32xbf16>
    %cst_367 = arith.constant dense<0.000000e+00> : vector<16x32xf32>
    %352 = tpu.matmul %281, %351, %cst_367 {dimension_numbers = #tpu.dot_dimension_numbers<[1], [0], [0], [1], [0, 0, 1, 1], [], []>} : vector<16x32xbf16>, vector<32x32xbf16>, vector<16x32xf32> -> vector<16x32xf32>
    %353 = arith.addf %349, %352 : vector<16x32xf32>
    %354 = arith.mulf %19, %353 : vector<16x32xf32>
    %355 = arith.addf %346, %354 : vector<16x32xf32>
    %c1_368 = arith.constant 1 : index
    %c0_369 = arith.constant 0 : index
    %c0_370 = arith.constant 0 : index
    %356 = vector.load %arg11[%c1_368, %c0_369, %c0_370] : memref<3x16x32xf32, #tpu.memory_space<vmem>>, vector<1x16x32xf32>
    %357 = vector.shape_cast %356 : vector<1x16x32xf32> to vector<16x32xf32>
    %c0_371 = arith.constant 0 : index
    %c0_372 = arith.constant 0 : index
    %c0_373 = arith.constant 0 : index
    %c0_374 = arith.constant 0 : index
    %358 = vector.load %arg9[%c0_371, %c0_372, %c0_373, %c0_374] : memref<8x2x32x32xbf16, #tpu.memory_space<vmem>>, vector<1x1x32x32xbf16>
    %359 = vector.shape_cast %358 : vector<1x1x32x32xbf16> to vector<32x32xbf16>
    %cst_375 = arith.constant dense<0.000000e+00> : vector<16x32xf32>
    %360 = tpu.matmul %279, %359, %cst_375 {dimension_numbers = #tpu.dot_dimension_numbers<[1], [0], [0], [1], [0, 0, 1, 1], [], []>} : vector<16x32xbf16>, vector<32x32xbf16>, vector<16x32xf32> -> vector<16x32xf32>
    %c0_376 = arith.constant 0 : index
    %c1_377 = arith.constant 1 : index
    %c0_378 = arith.constant 0 : index
    %c0_379 = arith.constant 0 : index
    %361 = vector.load %arg9[%c0_376, %c1_377, %c0_378, %c0_379] : memref<8x2x32x32xbf16, #tpu.memory_space<vmem>>, vector<1x1x32x32xbf16>
    %362 = vector.shape_cast %361 : vector<1x1x32x32xbf16> to vector<32x32xbf16>
    %cst_380 = arith.constant dense<0.000000e+00> : vector<16x32xf32>
    %363 = tpu.matmul %281, %362, %cst_380 {dimension_numbers = #tpu.dot_dimension_numbers<[1], [0], [0], [1], [0, 0, 1, 1], [], []>} : vector<16x32xbf16>, vector<32x32xbf16>, vector<16x32xf32> -> vector<16x32xf32>
    %364 = arith.addf %360, %363 : vector<16x32xf32>
    %365 = arith.mulf %5, %364 : vector<16x32xf32>
    %366 = arith.addf %357, %365 : vector<16x32xf32>
    %c1_381 = arith.constant 1 : index
    %c0_382 = arith.constant 0 : index
    %c0_383 = arith.constant 0 : index
    %c0_384 = arith.constant 0 : index
    %367 = vector.load %arg9[%c1_381, %c0_382, %c0_383, %c0_384] : memref<8x2x32x32xbf16, #tpu.memory_space<vmem>>, vector<1x1x32x32xbf16>
    %368 = vector.shape_cast %367 : vector<1x1x32x32xbf16> to vector<32x32xbf16>
    %cst_385 = arith.constant dense<0.000000e+00> : vector<16x32xf32>
    %369 = tpu.matmul %279, %368, %cst_385 {dimension_numbers = #tpu.dot_dimension_numbers<[1], [0], [0], [1], [0, 0, 1, 1], [], []>} : vector<16x32xbf16>, vector<32x32xbf16>, vector<16x32xf32> -> vector<16x32xf32>
    %c1_386 = arith.constant 1 : index
    %c1_387 = arith.constant 1 : index
    %c0_388 = arith.constant 0 : index
    %c0_389 = arith.constant 0 : index
    %370 = vector.load %arg9[%c1_386, %c1_387, %c0_388, %c0_389] : memref<8x2x32x32xbf16, #tpu.memory_space<vmem>>, vector<1x1x32x32xbf16>
    %371 = vector.shape_cast %370 : vector<1x1x32x32xbf16> to vector<32x32xbf16>
    %cst_390 = arith.constant dense<0.000000e+00> : vector<16x32xf32>
    %372 = tpu.matmul %281, %371, %cst_390 {dimension_numbers = #tpu.dot_dimension_numbers<[1], [0], [0], [1], [0, 0, 1, 1], [], []>} : vector<16x32xbf16>, vector<32x32xbf16>, vector<16x32xf32> -> vector<16x32xf32>
    %373 = arith.addf %369, %372 : vector<16x32xf32>
    %374 = arith.mulf %7, %373 : vector<16x32xf32>
    %375 = arith.addf %366, %374 : vector<16x32xf32>
    %c2_391 = arith.constant 2 : index
    %c0_392 = arith.constant 0 : index
    %c0_393 = arith.constant 0 : index
    %c0_394 = arith.constant 0 : index
    %376 = vector.load %arg9[%c2_391, %c0_392, %c0_393, %c0_394] : memref<8x2x32x32xbf16, #tpu.memory_space<vmem>>, vector<1x1x32x32xbf16>
    %377 = vector.shape_cast %376 : vector<1x1x32x32xbf16> to vector<32x32xbf16>
    %cst_395 = arith.constant dense<0.000000e+00> : vector<16x32xf32>
    %378 = tpu.matmul %279, %377, %cst_395 {dimension_numbers = #tpu.dot_dimension_numbers<[1], [0], [0], [1], [0, 0, 1, 1], [], []>} : vector<16x32xbf16>, vector<32x32xbf16>, vector<16x32xf32> -> vector<16x32xf32>
    %c2_396 = arith.constant 2 : index
    %c1_397 = arith.constant 1 : index
    %c0_398 = arith.constant 0 : index
    %c0_399 = arith.constant 0 : index
    %379 = vector.load %arg9[%c2_396, %c1_397, %c0_398, %c0_399] : memref<8x2x32x32xbf16, #tpu.memory_space<vmem>>, vector<1x1x32x32xbf16>
    %380 = vector.shape_cast %379 : vector<1x1x32x32xbf16> to vector<32x32xbf16>
    %cst_400 = arith.constant dense<0.000000e+00> : vector<16x32xf32>
    %381 = tpu.matmul %281, %380, %cst_400 {dimension_numbers = #tpu.dot_dimension_numbers<[1], [0], [0], [1], [0, 0, 1, 1], [], []>} : vector<16x32xbf16>, vector<32x32xbf16>, vector<16x32xf32> -> vector<16x32xf32>
    %382 = arith.addf %378, %381 : vector<16x32xf32>
    %383 = arith.mulf %9, %382 : vector<16x32xf32>
    %384 = arith.addf %375, %383 : vector<16x32xf32>
    %c3_401 = arith.constant 3 : index
    %c0_402 = arith.constant 0 : index
    %c0_403 = arith.constant 0 : index
    %c0_404 = arith.constant 0 : index
    %385 = vector.load %arg9[%c3_401, %c0_402, %c0_403, %c0_404] : memref<8x2x32x32xbf16, #tpu.memory_space<vmem>>, vector<1x1x32x32xbf16>
    %386 = vector.shape_cast %385 : vector<1x1x32x32xbf16> to vector<32x32xbf16>
    %cst_405 = arith.constant dense<0.000000e+00> : vector<16x32xf32>
    %387 = tpu.matmul %279, %386, %cst_405 {dimension_numbers = #tpu.dot_dimension_numbers<[1], [0], [0], [1], [0, 0, 1, 1], [], []>} : vector<16x32xbf16>, vector<32x32xbf16>, vector<16x32xf32> -> vector<16x32xf32>
    %c3_406 = arith.constant 3 : index
    %c1_407 = arith.constant 1 : index
    %c0_408 = arith.constant 0 : index
    %c0_409 = arith.constant 0 : index
    %388 = vector.load %arg9[%c3_406, %c1_407, %c0_408, %c0_409] : memref<8x2x32x32xbf16, #tpu.memory_space<vmem>>, vector<1x1x32x32xbf16>
    %389 = vector.shape_cast %388 : vector<1x1x32x32xbf16> to vector<32x32xbf16>
    %cst_410 = arith.constant dense<0.000000e+00> : vector<16x32xf32>
    %390 = tpu.matmul %281, %389, %cst_410 {dimension_numbers = #tpu.dot_dimension_numbers<[1], [0], [0], [1], [0, 0, 1, 1], [], []>} : vector<16x32xbf16>, vector<32x32xbf16>, vector<16x32xf32> -> vector<16x32xf32>
    %391 = arith.addf %387, %390 : vector<16x32xf32>
    %392 = arith.mulf %11, %391 : vector<16x32xf32>
    %393 = arith.addf %384, %392 : vector<16x32xf32>
    %c4_411 = arith.constant 4 : index
    %c0_412 = arith.constant 0 : index
    %c0_413 = arith.constant 0 : index
    %c0_414 = arith.constant 0 : index
    %394 = vector.load %arg9[%c4_411, %c0_412, %c0_413, %c0_414] : memref<8x2x32x32xbf16, #tpu.memory_space<vmem>>, vector<1x1x32x32xbf16>
    %395 = vector.shape_cast %394 : vector<1x1x32x32xbf16> to vector<32x32xbf16>
    %cst_415 = arith.constant dense<0.000000e+00> : vector<16x32xf32>
    %396 = tpu.matmul %279, %395, %cst_415 {dimension_numbers = #tpu.dot_dimension_numbers<[1], [0], [0], [1], [0, 0, 1, 1], [], []>} : vector<16x32xbf16>, vector<32x32xbf16>, vector<16x32xf32> -> vector<16x32xf32>
    %c4_416 = arith.constant 4 : index
    %c1_417 = arith.constant 1 : index
    %c0_418 = arith.constant 0 : index
    %c0_419 = arith.constant 0 : index
    %397 = vector.load %arg9[%c4_416, %c1_417, %c0_418, %c0_419] : memref<8x2x32x32xbf16, #tpu.memory_space<vmem>>, vector<1x1x32x32xbf16>
    %398 = vector.shape_cast %397 : vector<1x1x32x32xbf16> to vector<32x32xbf16>
    %cst_420 = arith.constant dense<0.000000e+00> : vector<16x32xf32>
    %399 = tpu.matmul %281, %398, %cst_420 {dimension_numbers = #tpu.dot_dimension_numbers<[1], [0], [0], [1], [0, 0, 1, 1], [], []>} : vector<16x32xbf16>, vector<32x32xbf16>, vector<16x32xf32> -> vector<16x32xf32>
    %400 = arith.addf %396, %399 : vector<16x32xf32>
    %401 = arith.mulf %13, %400 : vector<16x32xf32>
    %402 = arith.addf %393, %401 : vector<16x32xf32>
    %c5_421 = arith.constant 5 : index
    %c0_422 = arith.constant 0 : index
    %c0_423 = arith.constant 0 : index
    %c0_424 = arith.constant 0 : index
    %403 = vector.load %arg9[%c5_421, %c0_422, %c0_423, %c0_424] : memref<8x2x32x32xbf16, #tpu.memory_space<vmem>>, vector<1x1x32x32xbf16>
    %404 = vector.shape_cast %403 : vector<1x1x32x32xbf16> to vector<32x32xbf16>
    %cst_425 = arith.constant dense<0.000000e+00> : vector<16x32xf32>
    %405 = tpu.matmul %279, %404, %cst_425 {dimension_numbers = #tpu.dot_dimension_numbers<[1], [0], [0], [1], [0, 0, 1, 1], [], []>} : vector<16x32xbf16>, vector<32x32xbf16>, vector<16x32xf32> -> vector<16x32xf32>
    %c5_426 = arith.constant 5 : index
    %c1_427 = arith.constant 1 : index
    %c0_428 = arith.constant 0 : index
    %c0_429 = arith.constant 0 : index
    %406 = vector.load %arg9[%c5_426, %c1_427, %c0_428, %c0_429] : memref<8x2x32x32xbf16, #tpu.memory_space<vmem>>, vector<1x1x32x32xbf16>
    %407 = vector.shape_cast %406 : vector<1x1x32x32xbf16> to vector<32x32xbf16>
    %cst_430 = arith.constant dense<0.000000e+00> : vector<16x32xf32>
    %408 = tpu.matmul %281, %407, %cst_430 {dimension_numbers = #tpu.dot_dimension_numbers<[1], [0], [0], [1], [0, 0, 1, 1], [], []>} : vector<16x32xbf16>, vector<32x32xbf16>, vector<16x32xf32> -> vector<16x32xf32>
    %409 = arith.addf %405, %408 : vector<16x32xf32>
    %410 = arith.mulf %15, %409 : vector<16x32xf32>
    %411 = arith.addf %402, %410 : vector<16x32xf32>
    %c6_431 = arith.constant 6 : index
    %c0_432 = arith.constant 0 : index
    %c0_433 = arith.constant 0 : index
    %c0_434 = arith.constant 0 : index
    %412 = vector.load %arg9[%c6_431, %c0_432, %c0_433, %c0_434] : memref<8x2x32x32xbf16, #tpu.memory_space<vmem>>, vector<1x1x32x32xbf16>
    %413 = vector.shape_cast %412 : vector<1x1x32x32xbf16> to vector<32x32xbf16>
    %cst_435 = arith.constant dense<0.000000e+00> : vector<16x32xf32>
    %414 = tpu.matmul %279, %413, %cst_435 {dimension_numbers = #tpu.dot_dimension_numbers<[1], [0], [0], [1], [0, 0, 1, 1], [], []>} : vector<16x32xbf16>, vector<32x32xbf16>, vector<16x32xf32> -> vector<16x32xf32>
    %c6_436 = arith.constant 6 : index
    %c1_437 = arith.constant 1 : index
    %c0_438 = arith.constant 0 : index
    %c0_439 = arith.constant 0 : index
    %415 = vector.load %arg9[%c6_436, %c1_437, %c0_438, %c0_439] : memref<8x2x32x32xbf16, #tpu.memory_space<vmem>>, vector<1x1x32x32xbf16>
    %416 = vector.shape_cast %415 : vector<1x1x32x32xbf16> to vector<32x32xbf16>
    %cst_440 = arith.constant dense<0.000000e+00> : vector<16x32xf32>
    %417 = tpu.matmul %281, %416, %cst_440 {dimension_numbers = #tpu.dot_dimension_numbers<[1], [0], [0], [1], [0, 0, 1, 1], [], []>} : vector<16x32xbf16>, vector<32x32xbf16>, vector<16x32xf32> -> vector<16x32xf32>
    %418 = arith.addf %414, %417 : vector<16x32xf32>
    %419 = arith.mulf %17, %418 : vector<16x32xf32>
    %420 = arith.addf %411, %419 : vector<16x32xf32>
    %c7_441 = arith.constant 7 : index
    %c0_442 = arith.constant 0 : index
    %c0_443 = arith.constant 0 : index
    %c0_444 = arith.constant 0 : index
    %421 = vector.load %arg9[%c7_441, %c0_442, %c0_443, %c0_444] : memref<8x2x32x32xbf16, #tpu.memory_space<vmem>>, vector<1x1x32x32xbf16>
    %422 = vector.shape_cast %421 : vector<1x1x32x32xbf16> to vector<32x32xbf16>
    %cst_445 = arith.constant dense<0.000000e+00> : vector<16x32xf32>
    %423 = tpu.matmul %279, %422, %cst_445 {dimension_numbers = #tpu.dot_dimension_numbers<[1], [0], [0], [1], [0, 0, 1, 1], [], []>} : vector<16x32xbf16>, vector<32x32xbf16>, vector<16x32xf32> -> vector<16x32xf32>
    %c7_446 = arith.constant 7 : index
    %c1_447 = arith.constant 1 : index
    %c0_448 = arith.constant 0 : index
    %c0_449 = arith.constant 0 : index
    %424 = vector.load %arg9[%c7_446, %c1_447, %c0_448, %c0_449] : memref<8x2x32x32xbf16, #tpu.memory_space<vmem>>, vector<1x1x32x32xbf16>
    %425 = vector.shape_cast %424 : vector<1x1x32x32xbf16> to vector<32x32xbf16>
    %cst_450 = arith.constant dense<0.000000e+00> : vector<16x32xf32>
    %426 = tpu.matmul %281, %425, %cst_450 {dimension_numbers = #tpu.dot_dimension_numbers<[1], [0], [0], [1], [0, 0, 1, 1], [], []>} : vector<16x32xbf16>, vector<32x32xbf16>, vector<16x32xf32> -> vector<16x32xf32>
    %427 = arith.addf %423, %426 : vector<16x32xf32>
    %428 = arith.mulf %19, %427 : vector<16x32xf32>
    %429 = arith.addf %420, %428 : vector<16x32xf32>
    %c2_451 = arith.constant 2 : index
    %c0_452 = arith.constant 0 : index
    %c0_453 = arith.constant 0 : index
    %430 = vector.load %arg11[%c2_451, %c0_452, %c0_453] : memref<3x16x32xf32, #tpu.memory_space<vmem>>, vector<1x16x32xf32>
    %431 = vector.shape_cast %430 : vector<1x16x32xf32> to vector<16x32xf32>
    %c0_454 = arith.constant 0 : index
    %c0_455 = arith.constant 0 : index
    %c0_456 = arith.constant 0 : index
    %c0_457 = arith.constant 0 : index
    %432 = vector.load %arg10[%c0_454, %c0_455, %c0_456, %c0_457] : memref<8x2x32x32xbf16, #tpu.memory_space<vmem>>, vector<1x1x32x32xbf16>
    %433 = vector.shape_cast %432 : vector<1x1x32x32xbf16> to vector<32x32xbf16>
    %cst_458 = arith.constant dense<0.000000e+00> : vector<16x32xf32>
    %434 = tpu.matmul %279, %433, %cst_458 {dimension_numbers = #tpu.dot_dimension_numbers<[1], [0], [0], [1], [0, 0, 1, 1], [], []>} : vector<16x32xbf16>, vector<32x32xbf16>, vector<16x32xf32> -> vector<16x32xf32>
    %c0_459 = arith.constant 0 : index
    %c1_460 = arith.constant 1 : index
    %c0_461 = arith.constant 0 : index
    %c0_462 = arith.constant 0 : index
    %435 = vector.load %arg10[%c0_459, %c1_460, %c0_461, %c0_462] : memref<8x2x32x32xbf16, #tpu.memory_space<vmem>>, vector<1x1x32x32xbf16>
    %436 = vector.shape_cast %435 : vector<1x1x32x32xbf16> to vector<32x32xbf16>
    %cst_463 = arith.constant dense<0.000000e+00> : vector<16x32xf32>
    %437 = tpu.matmul %281, %436, %cst_463 {dimension_numbers = #tpu.dot_dimension_numbers<[1], [0], [0], [1], [0, 0, 1, 1], [], []>} : vector<16x32xbf16>, vector<32x32xbf16>, vector<16x32xf32> -> vector<16x32xf32>
    %438 = arith.addf %434, %437 : vector<16x32xf32>
    %439 = arith.mulf %5, %438 : vector<16x32xf32>
    %440 = arith.addf %431, %439 : vector<16x32xf32>
    %c1_464 = arith.constant 1 : index
    %c0_465 = arith.constant 0 : index
    %c0_466 = arith.constant 0 : index
    %c0_467 = arith.constant 0 : index
    %441 = vector.load %arg10[%c1_464, %c0_465, %c0_466, %c0_467] : memref<8x2x32x32xbf16, #tpu.memory_space<vmem>>, vector<1x1x32x32xbf16>
    %442 = vector.shape_cast %441 : vector<1x1x32x32xbf16> to vector<32x32xbf16>
    %cst_468 = arith.constant dense<0.000000e+00> : vector<16x32xf32>
    %443 = tpu.matmul %279, %442, %cst_468 {dimension_numbers = #tpu.dot_dimension_numbers<[1], [0], [0], [1], [0, 0, 1, 1], [], []>} : vector<16x32xbf16>, vector<32x32xbf16>, vector<16x32xf32> -> vector<16x32xf32>
    %c1_469 = arith.constant 1 : index
    %c1_470 = arith.constant 1 : index
    %c0_471 = arith.constant 0 : index
    %c0_472 = arith.constant 0 : index
    %444 = vector.load %arg10[%c1_469, %c1_470, %c0_471, %c0_472] : memref<8x2x32x32xbf16, #tpu.memory_space<vmem>>, vector<1x1x32x32xbf16>
    %445 = vector.shape_cast %444 : vector<1x1x32x32xbf16> to vector<32x32xbf16>
    %cst_473 = arith.constant dense<0.000000e+00> : vector<16x32xf32>
    %446 = tpu.matmul %281, %445, %cst_473 {dimension_numbers = #tpu.dot_dimension_numbers<[1], [0], [0], [1], [0, 0, 1, 1], [], []>} : vector<16x32xbf16>, vector<32x32xbf16>, vector<16x32xf32> -> vector<16x32xf32>
    %447 = arith.addf %443, %446 : vector<16x32xf32>
    %448 = arith.mulf %7, %447 : vector<16x32xf32>
    %449 = arith.addf %440, %448 : vector<16x32xf32>
    %c2_474 = arith.constant 2 : index
    %c0_475 = arith.constant 0 : index
    %c0_476 = arith.constant 0 : index
    %c0_477 = arith.constant 0 : index
    %450 = vector.load %arg10[%c2_474, %c0_475, %c0_476, %c0_477] : memref<8x2x32x32xbf16, #tpu.memory_space<vmem>>, vector<1x1x32x32xbf16>
    %451 = vector.shape_cast %450 : vector<1x1x32x32xbf16> to vector<32x32xbf16>
    %cst_478 = arith.constant dense<0.000000e+00> : vector<16x32xf32>
    %452 = tpu.matmul %279, %451, %cst_478 {dimension_numbers = #tpu.dot_dimension_numbers<[1], [0], [0], [1], [0, 0, 1, 1], [], []>} : vector<16x32xbf16>, vector<32x32xbf16>, vector<16x32xf32> -> vector<16x32xf32>
    %c2_479 = arith.constant 2 : index
    %c1_480 = arith.constant 1 : index
    %c0_481 = arith.constant 0 : index
    %c0_482 = arith.constant 0 : index
    %453 = vector.load %arg10[%c2_479, %c1_480, %c0_481, %c0_482] : memref<8x2x32x32xbf16, #tpu.memory_space<vmem>>, vector<1x1x32x32xbf16>
    %454 = vector.shape_cast %453 : vector<1x1x32x32xbf16> to vector<32x32xbf16>
    %cst_483 = arith.constant dense<0.000000e+00> : vector<16x32xf32>
    %455 = tpu.matmul %281, %454, %cst_483 {dimension_numbers = #tpu.dot_dimension_numbers<[1], [0], [0], [1], [0, 0, 1, 1], [], []>} : vector<16x32xbf16>, vector<32x32xbf16>, vector<16x32xf32> -> vector<16x32xf32>
    %456 = arith.addf %452, %455 : vector<16x32xf32>
    %457 = arith.mulf %9, %456 : vector<16x32xf32>
    %458 = arith.addf %449, %457 : vector<16x32xf32>
    %c3_484 = arith.constant 3 : index
    %c0_485 = arith.constant 0 : index
    %c0_486 = arith.constant 0 : index
    %c0_487 = arith.constant 0 : index
    %459 = vector.load %arg10[%c3_484, %c0_485, %c0_486, %c0_487] : memref<8x2x32x32xbf16, #tpu.memory_space<vmem>>, vector<1x1x32x32xbf16>
    %460 = vector.shape_cast %459 : vector<1x1x32x32xbf16> to vector<32x32xbf16>
    %cst_488 = arith.constant dense<0.000000e+00> : vector<16x32xf32>
    %461 = tpu.matmul %279, %460, %cst_488 {dimension_numbers = #tpu.dot_dimension_numbers<[1], [0], [0], [1], [0, 0, 1, 1], [], []>} : vector<16x32xbf16>, vector<32x32xbf16>, vector<16x32xf32> -> vector<16x32xf32>
    %c3_489 = arith.constant 3 : index
    %c1_490 = arith.constant 1 : index
    %c0_491 = arith.constant 0 : index
    %c0_492 = arith.constant 0 : index
    %462 = vector.load %arg10[%c3_489, %c1_490, %c0_491, %c0_492] : memref<8x2x32x32xbf16, #tpu.memory_space<vmem>>, vector<1x1x32x32xbf16>
    %463 = vector.shape_cast %462 : vector<1x1x32x32xbf16> to vector<32x32xbf16>
    %cst_493 = arith.constant dense<0.000000e+00> : vector<16x32xf32>
    %464 = tpu.matmul %281, %463, %cst_493 {dimension_numbers = #tpu.dot_dimension_numbers<[1], [0], [0], [1], [0, 0, 1, 1], [], []>} : vector<16x32xbf16>, vector<32x32xbf16>, vector<16x32xf32> -> vector<16x32xf32>
    %465 = arith.addf %461, %464 : vector<16x32xf32>
    %466 = arith.mulf %11, %465 : vector<16x32xf32>
    %467 = arith.addf %458, %466 : vector<16x32xf32>
    %c4_494 = arith.constant 4 : index
    %c0_495 = arith.constant 0 : index
    %c0_496 = arith.constant 0 : index
    %c0_497 = arith.constant 0 : index
    %468 = vector.load %arg10[%c4_494, %c0_495, %c0_496, %c0_497] : memref<8x2x32x32xbf16, #tpu.memory_space<vmem>>, vector<1x1x32x32xbf16>
    %469 = vector.shape_cast %468 : vector<1x1x32x32xbf16> to vector<32x32xbf16>
    %cst_498 = arith.constant dense<0.000000e+00> : vector<16x32xf32>
    %470 = tpu.matmul %279, %469, %cst_498 {dimension_numbers = #tpu.dot_dimension_numbers<[1], [0], [0], [1], [0, 0, 1, 1], [], []>} : vector<16x32xbf16>, vector<32x32xbf16>, vector<16x32xf32> -> vector<16x32xf32>
    %c4_499 = arith.constant 4 : index
    %c1_500 = arith.constant 1 : index
    %c0_501 = arith.constant 0 : index
    %c0_502 = arith.constant 0 : index
    %471 = vector.load %arg10[%c4_499, %c1_500, %c0_501, %c0_502] : memref<8x2x32x32xbf16, #tpu.memory_space<vmem>>, vector<1x1x32x32xbf16>
    %472 = vector.shape_cast %471 : vector<1x1x32x32xbf16> to vector<32x32xbf16>
    %cst_503 = arith.constant dense<0.000000e+00> : vector<16x32xf32>
    %473 = tpu.matmul %281, %472, %cst_503 {dimension_numbers = #tpu.dot_dimension_numbers<[1], [0], [0], [1], [0, 0, 1, 1], [], []>} : vector<16x32xbf16>, vector<32x32xbf16>, vector<16x32xf32> -> vector<16x32xf32>
    %474 = arith.addf %470, %473 : vector<16x32xf32>
    %475 = arith.mulf %13, %474 : vector<16x32xf32>
    %476 = arith.addf %467, %475 : vector<16x32xf32>
    %c5_504 = arith.constant 5 : index
    %c0_505 = arith.constant 0 : index
    %c0_506 = arith.constant 0 : index
    %c0_507 = arith.constant 0 : index
    %477 = vector.load %arg10[%c5_504, %c0_505, %c0_506, %c0_507] : memref<8x2x32x32xbf16, #tpu.memory_space<vmem>>, vector<1x1x32x32xbf16>
    %478 = vector.shape_cast %477 : vector<1x1x32x32xbf16> to vector<32x32xbf16>
    %cst_508 = arith.constant dense<0.000000e+00> : vector<16x32xf32>
    %479 = tpu.matmul %279, %478, %cst_508 {dimension_numbers = #tpu.dot_dimension_numbers<[1], [0], [0], [1], [0, 0, 1, 1], [], []>} : vector<16x32xbf16>, vector<32x32xbf16>, vector<16x32xf32> -> vector<16x32xf32>
    %c5_509 = arith.constant 5 : index
    %c1_510 = arith.constant 1 : index
    %c0_511 = arith.constant 0 : index
    %c0_512 = arith.constant 0 : index
    %480 = vector.load %arg10[%c5_509, %c1_510, %c0_511, %c0_512] : memref<8x2x32x32xbf16, #tpu.memory_space<vmem>>, vector<1x1x32x32xbf16>
    %481 = vector.shape_cast %480 : vector<1x1x32x32xbf16> to vector<32x32xbf16>
    %cst_513 = arith.constant dense<0.000000e+00> : vector<16x32xf32>
    %482 = tpu.matmul %281, %481, %cst_513 {dimension_numbers = #tpu.dot_dimension_numbers<[1], [0], [0], [1], [0, 0, 1, 1], [], []>} : vector<16x32xbf16>, vector<32x32xbf16>, vector<16x32xf32> -> vector<16x32xf32>
    %483 = arith.addf %479, %482 : vector<16x32xf32>
    %484 = arith.mulf %15, %483 : vector<16x32xf32>
    %485 = arith.addf %476, %484 : vector<16x32xf32>
    %c6_514 = arith.constant 6 : index
    %c0_515 = arith.constant 0 : index
    %c0_516 = arith.constant 0 : index
    %c0_517 = arith.constant 0 : index
    %486 = vector.load %arg10[%c6_514, %c0_515, %c0_516, %c0_517] : memref<8x2x32x32xbf16, #tpu.memory_space<vmem>>, vector<1x1x32x32xbf16>
    %487 = vector.shape_cast %486 : vector<1x1x32x32xbf16> to vector<32x32xbf16>
    %cst_518 = arith.constant dense<0.000000e+00> : vector<16x32xf32>
    %488 = tpu.matmul %279, %487, %cst_518 {dimension_numbers = #tpu.dot_dimension_numbers<[1], [0], [0], [1], [0, 0, 1, 1], [], []>} : vector<16x32xbf16>, vector<32x32xbf16>, vector<16x32xf32> -> vector<16x32xf32>
    %c6_519 = arith.constant 6 : index
    %c1_520 = arith.constant 1 : index
    %c0_521 = arith.constant 0 : index
    %c0_522 = arith.constant 0 : index
    %489 = vector.load %arg10[%c6_519, %c1_520, %c0_521, %c0_522] : memref<8x2x32x32xbf16, #tpu.memory_space<vmem>>, vector<1x1x32x32xbf16>
    %490 = vector.shape_cast %489 : vector<1x1x32x32xbf16> to vector<32x32xbf16>
    %cst_523 = arith.constant dense<0.000000e+00> : vector<16x32xf32>
    %491 = tpu.matmul %281, %490, %cst_523 {dimension_numbers = #tpu.dot_dimension_numbers<[1], [0], [0], [1], [0, 0, 1, 1], [], []>} : vector<16x32xbf16>, vector<32x32xbf16>, vector<16x32xf32> -> vector<16x32xf32>
    %492 = arith.addf %488, %491 : vector<16x32xf32>
    %493 = arith.mulf %17, %492 : vector<16x32xf32>
    %494 = arith.addf %485, %493 : vector<16x32xf32>
    %c7_524 = arith.constant 7 : index
    %c0_525 = arith.constant 0 : index
    %c0_526 = arith.constant 0 : index
    %c0_527 = arith.constant 0 : index
    %495 = vector.load %arg10[%c7_524, %c0_525, %c0_526, %c0_527] : memref<8x2x32x32xbf16, #tpu.memory_space<vmem>>, vector<1x1x32x32xbf16>
    %496 = vector.shape_cast %495 : vector<1x1x32x32xbf16> to vector<32x32xbf16>
    %cst_528 = arith.constant dense<0.000000e+00> : vector<16x32xf32>
    %497 = tpu.matmul %279, %496, %cst_528 {dimension_numbers = #tpu.dot_dimension_numbers<[1], [0], [0], [1], [0, 0, 1, 1], [], []>} : vector<16x32xbf16>, vector<32x32xbf16>, vector<16x32xf32> -> vector<16x32xf32>
    %c7_529 = arith.constant 7 : index
    %c1_530 = arith.constant 1 : index
    %c0_531 = arith.constant 0 : index
    %c0_532 = arith.constant 0 : index
    %498 = vector.load %arg10[%c7_529, %c1_530, %c0_531, %c0_532] : memref<8x2x32x32xbf16, #tpu.memory_space<vmem>>, vector<1x1x32x32xbf16>
    %499 = vector.shape_cast %498 : vector<1x1x32x32xbf16> to vector<32x32xbf16>
    %cst_533 = arith.constant dense<0.000000e+00> : vector<16x32xf32>
    %500 = tpu.matmul %281, %499, %cst_533 {dimension_numbers = #tpu.dot_dimension_numbers<[1], [0], [0], [1], [0, 0, 1, 1], [], []>} : vector<16x32xbf16>, vector<32x32xbf16>, vector<16x32xf32> -> vector<16x32xf32>
    %501 = arith.addf %497, %500 : vector<16x32xf32>
    %502 = arith.mulf %19, %501 : vector<16x32xf32>
    %503 = arith.addf %494, %502 : vector<16x32xf32>
    %c1_534 = arith.constant 1 : index
    %c0_535 = arith.constant 0 : index
    %c0_536 = arith.constant 0 : index
    %504 = vector.load %arg16[%c1_534, %c0_535, %c0_536] : memref<2x16x32xf32, #tpu.memory_space<vmem>>, vector<1x16x32xf32>
    %505 = vector.shape_cast %504 : vector<1x16x32xf32> to vector<16x32xf32>
    %506 = arith.truncf %505 : vector<16x32xf32> to vector<16x32xbf16>
    %cst_537 = arith.constant dense<0.000000e+00> : vector<32x32xf32>
    %507 = tpu.matmul %3, %506, %cst_537 {dimension_numbers = #tpu.dot_dimension_numbers<[1], [0], [0], [1], [0, 0, 1, 1], [], []>} : vector<32x16xbf16>, vector<16x32xbf16>, vector<32x32xf32> -> vector<32x32xf32>
    %508 = vector.extract_strided_slice %507 {offsets = [0, 0], sizes = [16, 32], strides = [1, 1]} : vector<32x32xf32> to vector<16x32xf32>
    %509 = arith.truncf %508 : vector<16x32xf32> to vector<16x32xbf16>
    %510 = vector.extract_strided_slice %507 {offsets = [16, 0], sizes = [16, 32], strides = [1, 1]} : vector<32x32xf32> to vector<16x32xf32>
    %511 = arith.truncf %510 : vector<16x32xf32> to vector<16x32xbf16>
    %c0_538 = arith.constant 0 : index
    %c0_539 = arith.constant 0 : index
    %c0_540 = arith.constant 0 : index
    %c0_541 = arith.constant 0 : index
    %512 = vector.load %arg12[%c0_538, %c0_539, %c0_540, %c0_541] : memref<8x2x32x32xbf16, #tpu.memory_space<vmem>>, vector<1x1x32x32xbf16>
    %513 = vector.shape_cast %512 : vector<1x1x32x32xbf16> to vector<32x32xbf16>
    %cst_542 = arith.constant dense<0.000000e+00> : vector<16x32xf32>
    %514 = tpu.matmul %509, %513, %cst_542 {dimension_numbers = #tpu.dot_dimension_numbers<[1], [0], [0], [1], [0, 0, 1, 1], [], []>} : vector<16x32xbf16>, vector<32x32xbf16>, vector<16x32xf32> -> vector<16x32xf32>
    %c0_543 = arith.constant 0 : index
    %c1_544 = arith.constant 1 : index
    %c0_545 = arith.constant 0 : index
    %c0_546 = arith.constant 0 : index
    %515 = vector.load %arg12[%c0_543, %c1_544, %c0_545, %c0_546] : memref<8x2x32x32xbf16, #tpu.memory_space<vmem>>, vector<1x1x32x32xbf16>
    %516 = vector.shape_cast %515 : vector<1x1x32x32xbf16> to vector<32x32xbf16>
    %cst_547 = arith.constant dense<0.000000e+00> : vector<16x32xf32>
    %517 = tpu.matmul %511, %516, %cst_547 {dimension_numbers = #tpu.dot_dimension_numbers<[1], [0], [0], [1], [0, 0, 1, 1], [], []>} : vector<16x32xbf16>, vector<32x32xbf16>, vector<16x32xf32> -> vector<16x32xf32>
    %518 = arith.addf %514, %517 : vector<16x32xf32>
    %519 = arith.mulf %5, %518 : vector<16x32xf32>
    %520 = arith.addf %355, %519 : vector<16x32xf32>
    %c1_548 = arith.constant 1 : index
    %c0_549 = arith.constant 0 : index
    %c0_550 = arith.constant 0 : index
    %c0_551 = arith.constant 0 : index
    %521 = vector.load %arg12[%c1_548, %c0_549, %c0_550, %c0_551] : memref<8x2x32x32xbf16, #tpu.memory_space<vmem>>, vector<1x1x32x32xbf16>
    %522 = vector.shape_cast %521 : vector<1x1x32x32xbf16> to vector<32x32xbf16>
    %cst_552 = arith.constant dense<0.000000e+00> : vector<16x32xf32>
    %523 = tpu.matmul %509, %522, %cst_552 {dimension_numbers = #tpu.dot_dimension_numbers<[1], [0], [0], [1], [0, 0, 1, 1], [], []>} : vector<16x32xbf16>, vector<32x32xbf16>, vector<16x32xf32> -> vector<16x32xf32>
    %c1_553 = arith.constant 1 : index
    %c1_554 = arith.constant 1 : index
    %c0_555 = arith.constant 0 : index
    %c0_556 = arith.constant 0 : index
    %524 = vector.load %arg12[%c1_553, %c1_554, %c0_555, %c0_556] : memref<8x2x32x32xbf16, #tpu.memory_space<vmem>>, vector<1x1x32x32xbf16>
    %525 = vector.shape_cast %524 : vector<1x1x32x32xbf16> to vector<32x32xbf16>
    %cst_557 = arith.constant dense<0.000000e+00> : vector<16x32xf32>
    %526 = tpu.matmul %511, %525, %cst_557 {dimension_numbers = #tpu.dot_dimension_numbers<[1], [0], [0], [1], [0, 0, 1, 1], [], []>} : vector<16x32xbf16>, vector<32x32xbf16>, vector<16x32xf32> -> vector<16x32xf32>
    %527 = arith.addf %523, %526 : vector<16x32xf32>
    %528 = arith.mulf %7, %527 : vector<16x32xf32>
    %529 = arith.addf %520, %528 : vector<16x32xf32>
    %c2_558 = arith.constant 2 : index
    %c0_559 = arith.constant 0 : index
    %c0_560 = arith.constant 0 : index
    %c0_561 = arith.constant 0 : index
    %530 = vector.load %arg12[%c2_558, %c0_559, %c0_560, %c0_561] : memref<8x2x32x32xbf16, #tpu.memory_space<vmem>>, vector<1x1x32x32xbf16>
    %531 = vector.shape_cast %530 : vector<1x1x32x32xbf16> to vector<32x32xbf16>
    %cst_562 = arith.constant dense<0.000000e+00> : vector<16x32xf32>
    %532 = tpu.matmul %509, %531, %cst_562 {dimension_numbers = #tpu.dot_dimension_numbers<[1], [0], [0], [1], [0, 0, 1, 1], [], []>} : vector<16x32xbf16>, vector<32x32xbf16>, vector<16x32xf32> -> vector<16x32xf32>
    %c2_563 = arith.constant 2 : index
    %c1_564 = arith.constant 1 : index
    %c0_565 = arith.constant 0 : index
    %c0_566 = arith.constant 0 : index
    %533 = vector.load %arg12[%c2_563, %c1_564, %c0_565, %c0_566] : memref<8x2x32x32xbf16, #tpu.memory_space<vmem>>, vector<1x1x32x32xbf16>
    %534 = vector.shape_cast %533 : vector<1x1x32x32xbf16> to vector<32x32xbf16>
    %cst_567 = arith.constant dense<0.000000e+00> : vector<16x32xf32>
    %535 = tpu.matmul %511, %534, %cst_567 {dimension_numbers = #tpu.dot_dimension_numbers<[1], [0], [0], [1], [0, 0, 1, 1], [], []>} : vector<16x32xbf16>, vector<32x32xbf16>, vector<16x32xf32> -> vector<16x32xf32>
    %536 = arith.addf %532, %535 : vector<16x32xf32>
    %537 = arith.mulf %9, %536 : vector<16x32xf32>
    %538 = arith.addf %529, %537 : vector<16x32xf32>
    %c3_568 = arith.constant 3 : index
    %c0_569 = arith.constant 0 : index
    %c0_570 = arith.constant 0 : index
    %c0_571 = arith.constant 0 : index
    %539 = vector.load %arg12[%c3_568, %c0_569, %c0_570, %c0_571] : memref<8x2x32x32xbf16, #tpu.memory_space<vmem>>, vector<1x1x32x32xbf16>
    %540 = vector.shape_cast %539 : vector<1x1x32x32xbf16> to vector<32x32xbf16>
    %cst_572 = arith.constant dense<0.000000e+00> : vector<16x32xf32>
    %541 = tpu.matmul %509, %540, %cst_572 {dimension_numbers = #tpu.dot_dimension_numbers<[1], [0], [0], [1], [0, 0, 1, 1], [], []>} : vector<16x32xbf16>, vector<32x32xbf16>, vector<16x32xf32> -> vector<16x32xf32>
    %c3_573 = arith.constant 3 : index
    %c1_574 = arith.constant 1 : index
    %c0_575 = arith.constant 0 : index
    %c0_576 = arith.constant 0 : index
    %542 = vector.load %arg12[%c3_573, %c1_574, %c0_575, %c0_576] : memref<8x2x32x32xbf16, #tpu.memory_space<vmem>>, vector<1x1x32x32xbf16>
    %543 = vector.shape_cast %542 : vector<1x1x32x32xbf16> to vector<32x32xbf16>
    %cst_577 = arith.constant dense<0.000000e+00> : vector<16x32xf32>
    %544 = tpu.matmul %511, %543, %cst_577 {dimension_numbers = #tpu.dot_dimension_numbers<[1], [0], [0], [1], [0, 0, 1, 1], [], []>} : vector<16x32xbf16>, vector<32x32xbf16>, vector<16x32xf32> -> vector<16x32xf32>
    %545 = arith.addf %541, %544 : vector<16x32xf32>
    %546 = arith.mulf %11, %545 : vector<16x32xf32>
    %547 = arith.addf %538, %546 : vector<16x32xf32>
    %c4_578 = arith.constant 4 : index
    %c0_579 = arith.constant 0 : index
    %c0_580 = arith.constant 0 : index
    %c0_581 = arith.constant 0 : index
    %548 = vector.load %arg12[%c4_578, %c0_579, %c0_580, %c0_581] : memref<8x2x32x32xbf16, #tpu.memory_space<vmem>>, vector<1x1x32x32xbf16>
    %549 = vector.shape_cast %548 : vector<1x1x32x32xbf16> to vector<32x32xbf16>
    %cst_582 = arith.constant dense<0.000000e+00> : vector<16x32xf32>
    %550 = tpu.matmul %509, %549, %cst_582 {dimension_numbers = #tpu.dot_dimension_numbers<[1], [0], [0], [1], [0, 0, 1, 1], [], []>} : vector<16x32xbf16>, vector<32x32xbf16>, vector<16x32xf32> -> vector<16x32xf32>
    %c4_583 = arith.constant 4 : index
    %c1_584 = arith.constant 1 : index
    %c0_585 = arith.constant 0 : index
    %c0_586 = arith.constant 0 : index
    %551 = vector.load %arg12[%c4_583, %c1_584, %c0_585, %c0_586] : memref<8x2x32x32xbf16, #tpu.memory_space<vmem>>, vector<1x1x32x32xbf16>
    %552 = vector.shape_cast %551 : vector<1x1x32x32xbf16> to vector<32x32xbf16>
    %cst_587 = arith.constant dense<0.000000e+00> : vector<16x32xf32>
    %553 = tpu.matmul %511, %552, %cst_587 {dimension_numbers = #tpu.dot_dimension_numbers<[1], [0], [0], [1], [0, 0, 1, 1], [], []>} : vector<16x32xbf16>, vector<32x32xbf16>, vector<16x32xf32> -> vector<16x32xf32>
    %554 = arith.addf %550, %553 : vector<16x32xf32>
    %555 = arith.mulf %13, %554 : vector<16x32xf32>
    %556 = arith.addf %547, %555 : vector<16x32xf32>
    %c5_588 = arith.constant 5 : index
    %c0_589 = arith.constant 0 : index
    %c0_590 = arith.constant 0 : index
    %c0_591 = arith.constant 0 : index
    %557 = vector.load %arg12[%c5_588, %c0_589, %c0_590, %c0_591] : memref<8x2x32x32xbf16, #tpu.memory_space<vmem>>, vector<1x1x32x32xbf16>
    %558 = vector.shape_cast %557 : vector<1x1x32x32xbf16> to vector<32x32xbf16>
    %cst_592 = arith.constant dense<0.000000e+00> : vector<16x32xf32>
    %559 = tpu.matmul %509, %558, %cst_592 {dimension_numbers = #tpu.dot_dimension_numbers<[1], [0], [0], [1], [0, 0, 1, 1], [], []>} : vector<16x32xbf16>, vector<32x32xbf16>, vector<16x32xf32> -> vector<16x32xf32>
    %c5_593 = arith.constant 5 : index
    %c1_594 = arith.constant 1 : index
    %c0_595 = arith.constant 0 : index
    %c0_596 = arith.constant 0 : index
    %560 = vector.load %arg12[%c5_593, %c1_594, %c0_595, %c0_596] : memref<8x2x32x32xbf16, #tpu.memory_space<vmem>>, vector<1x1x32x32xbf16>
    %561 = vector.shape_cast %560 : vector<1x1x32x32xbf16> to vector<32x32xbf16>
    %cst_597 = arith.constant dense<0.000000e+00> : vector<16x32xf32>
    %562 = tpu.matmul %511, %561, %cst_597 {dimension_numbers = #tpu.dot_dimension_numbers<[1], [0], [0], [1], [0, 0, 1, 1], [], []>} : vector<16x32xbf16>, vector<32x32xbf16>, vector<16x32xf32> -> vector<16x32xf32>
    %563 = arith.addf %559, %562 : vector<16x32xf32>
    %564 = arith.mulf %15, %563 : vector<16x32xf32>
    %565 = arith.addf %556, %564 : vector<16x32xf32>
    %c6_598 = arith.constant 6 : index
    %c0_599 = arith.constant 0 : index
    %c0_600 = arith.constant 0 : index
    %c0_601 = arith.constant 0 : index
    %566 = vector.load %arg12[%c6_598, %c0_599, %c0_600, %c0_601] : memref<8x2x32x32xbf16, #tpu.memory_space<vmem>>, vector<1x1x32x32xbf16>
    %567 = vector.shape_cast %566 : vector<1x1x32x32xbf16> to vector<32x32xbf16>
    %cst_602 = arith.constant dense<0.000000e+00> : vector<16x32xf32>
    %568 = tpu.matmul %509, %567, %cst_602 {dimension_numbers = #tpu.dot_dimension_numbers<[1], [0], [0], [1], [0, 0, 1, 1], [], []>} : vector<16x32xbf16>, vector<32x32xbf16>, vector<16x32xf32> -> vector<16x32xf32>
    %c6_603 = arith.constant 6 : index
    %c1_604 = arith.constant 1 : index
    %c0_605 = arith.constant 0 : index
    %c0_606 = arith.constant 0 : index
    %569 = vector.load %arg12[%c6_603, %c1_604, %c0_605, %c0_606] : memref<8x2x32x32xbf16, #tpu.memory_space<vmem>>, vector<1x1x32x32xbf16>
    %570 = vector.shape_cast %569 : vector<1x1x32x32xbf16> to vector<32x32xbf16>
    %cst_607 = arith.constant dense<0.000000e+00> : vector<16x32xf32>
    %571 = tpu.matmul %511, %570, %cst_607 {dimension_numbers = #tpu.dot_dimension_numbers<[1], [0], [0], [1], [0, 0, 1, 1], [], []>} : vector<16x32xbf16>, vector<32x32xbf16>, vector<16x32xf32> -> vector<16x32xf32>
    %572 = arith.addf %568, %571 : vector<16x32xf32>
    %573 = arith.mulf %17, %572 : vector<16x32xf32>
    %574 = arith.addf %565, %573 : vector<16x32xf32>
    %c7_608 = arith.constant 7 : index
    %c0_609 = arith.constant 0 : index
    %c0_610 = arith.constant 0 : index
    %c0_611 = arith.constant 0 : index
    %575 = vector.load %arg12[%c7_608, %c0_609, %c0_610, %c0_611] : memref<8x2x32x32xbf16, #tpu.memory_space<vmem>>, vector<1x1x32x32xbf16>
    %576 = vector.shape_cast %575 : vector<1x1x32x32xbf16> to vector<32x32xbf16>
    %cst_612 = arith.constant dense<0.000000e+00> : vector<16x32xf32>
    %577 = tpu.matmul %509, %576, %cst_612 {dimension_numbers = #tpu.dot_dimension_numbers<[1], [0], [0], [1], [0, 0, 1, 1], [], []>} : vector<16x32xbf16>, vector<32x32xbf16>, vector<16x32xf32> -> vector<16x32xf32>
    %c7_613 = arith.constant 7 : index
    %c1_614 = arith.constant 1 : index
    %c0_615 = arith.constant 0 : index
    %c0_616 = arith.constant 0 : index
    %578 = vector.load %arg12[%c7_613, %c1_614, %c0_615, %c0_616] : memref<8x2x32x32xbf16, #tpu.memory_space<vmem>>, vector<1x1x32x32xbf16>
    %579 = vector.shape_cast %578 : vector<1x1x32x32xbf16> to vector<32x32xbf16>
    %cst_617 = arith.constant dense<0.000000e+00> : vector<16x32xf32>
    %580 = tpu.matmul %511, %579, %cst_617 {dimension_numbers = #tpu.dot_dimension_numbers<[1], [0], [0], [1], [0, 0, 1, 1], [], []>} : vector<16x32xbf16>, vector<32x32xbf16>, vector<16x32xf32> -> vector<16x32xf32>
    %581 = arith.addf %577, %580 : vector<16x32xf32>
    %582 = arith.mulf %19, %581 : vector<16x32xf32>
    %583 = arith.addf %574, %582 : vector<16x32xf32>
    %584 = arith.negf %583 : vector<16x32xf32>
    %585 = math.exp %584 : vector<16x32xf32>
    %cst_618 = arith.constant 1.000000e+00 : f32
    %586 = vector.broadcast %cst_618 : f32 to vector<16x32xf32>
    %587 = arith.addf %586, %585 : vector<16x32xf32>
    %588 = arith.divf %586, %587 : vector<16x32xf32>
    %c0_619 = arith.constant 0 : index
    %c0_620 = arith.constant 0 : index
    %c0_621 = arith.constant 0 : index
    %c0_622 = arith.constant 0 : index
    %589 = vector.load %arg13[%c0_619, %c0_620, %c0_621, %c0_622] : memref<8x2x32x32xbf16, #tpu.memory_space<vmem>>, vector<1x1x32x32xbf16>
    %590 = vector.shape_cast %589 : vector<1x1x32x32xbf16> to vector<32x32xbf16>
    %cst_623 = arith.constant dense<0.000000e+00> : vector<16x32xf32>
    %591 = tpu.matmul %509, %590, %cst_623 {dimension_numbers = #tpu.dot_dimension_numbers<[1], [0], [0], [1], [0, 0, 1, 1], [], []>} : vector<16x32xbf16>, vector<32x32xbf16>, vector<16x32xf32> -> vector<16x32xf32>
    %c0_624 = arith.constant 0 : index
    %c1_625 = arith.constant 1 : index
    %c0_626 = arith.constant 0 : index
    %c0_627 = arith.constant 0 : index
    %592 = vector.load %arg13[%c0_624, %c1_625, %c0_626, %c0_627] : memref<8x2x32x32xbf16, #tpu.memory_space<vmem>>, vector<1x1x32x32xbf16>
    %593 = vector.shape_cast %592 : vector<1x1x32x32xbf16> to vector<32x32xbf16>
    %cst_628 = arith.constant dense<0.000000e+00> : vector<16x32xf32>
    %594 = tpu.matmul %511, %593, %cst_628 {dimension_numbers = #tpu.dot_dimension_numbers<[1], [0], [0], [1], [0, 0, 1, 1], [], []>} : vector<16x32xbf16>, vector<32x32xbf16>, vector<16x32xf32> -> vector<16x32xf32>
    %595 = arith.addf %591, %594 : vector<16x32xf32>
    %596 = arith.mulf %5, %595 : vector<16x32xf32>
    %597 = arith.addf %429, %596 : vector<16x32xf32>
    %c1_629 = arith.constant 1 : index
    %c0_630 = arith.constant 0 : index
    %c0_631 = arith.constant 0 : index
    %c0_632 = arith.constant 0 : index
    %598 = vector.load %arg13[%c1_629, %c0_630, %c0_631, %c0_632] : memref<8x2x32x32xbf16, #tpu.memory_space<vmem>>, vector<1x1x32x32xbf16>
    %599 = vector.shape_cast %598 : vector<1x1x32x32xbf16> to vector<32x32xbf16>
    %cst_633 = arith.constant dense<0.000000e+00> : vector<16x32xf32>
    %600 = tpu.matmul %509, %599, %cst_633 {dimension_numbers = #tpu.dot_dimension_numbers<[1], [0], [0], [1], [0, 0, 1, 1], [], []>} : vector<16x32xbf16>, vector<32x32xbf16>, vector<16x32xf32> -> vector<16x32xf32>
    %c1_634 = arith.constant 1 : index
    %c1_635 = arith.constant 1 : index
    %c0_636 = arith.constant 0 : index
    %c0_637 = arith.constant 0 : index
    %601 = vector.load %arg13[%c1_634, %c1_635, %c0_636, %c0_637] : memref<8x2x32x32xbf16, #tpu.memory_space<vmem>>, vector<1x1x32x32xbf16>
    %602 = vector.shape_cast %601 : vector<1x1x32x32xbf16> to vector<32x32xbf16>
    %cst_638 = arith.constant dense<0.000000e+00> : vector<16x32xf32>
    %603 = tpu.matmul %511, %602, %cst_638 {dimension_numbers = #tpu.dot_dimension_numbers<[1], [0], [0], [1], [0, 0, 1, 1], [], []>} : vector<16x32xbf16>, vector<32x32xbf16>, vector<16x32xf32> -> vector<16x32xf32>
    %604 = arith.addf %600, %603 : vector<16x32xf32>
    %605 = arith.mulf %7, %604 : vector<16x32xf32>
    %606 = arith.addf %597, %605 : vector<16x32xf32>
    %c2_639 = arith.constant 2 : index
    %c0_640 = arith.constant 0 : index
    %c0_641 = arith.constant 0 : index
    %c0_642 = arith.constant 0 : index
    %607 = vector.load %arg13[%c2_639, %c0_640, %c0_641, %c0_642] : memref<8x2x32x32xbf16, #tpu.memory_space<vmem>>, vector<1x1x32x32xbf16>
    %608 = vector.shape_cast %607 : vector<1x1x32x32xbf16> to vector<32x32xbf16>
    %cst_643 = arith.constant dense<0.000000e+00> : vector<16x32xf32>
    %609 = tpu.matmul %509, %608, %cst_643 {dimension_numbers = #tpu.dot_dimension_numbers<[1], [0], [0], [1], [0, 0, 1, 1], [], []>} : vector<16x32xbf16>, vector<32x32xbf16>, vector<16x32xf32> -> vector<16x32xf32>
    %c2_644 = arith.constant 2 : index
    %c1_645 = arith.constant 1 : index
    %c0_646 = arith.constant 0 : index
    %c0_647 = arith.constant 0 : index
    %610 = vector.load %arg13[%c2_644, %c1_645, %c0_646, %c0_647] : memref<8x2x32x32xbf16, #tpu.memory_space<vmem>>, vector<1x1x32x32xbf16>
    %611 = vector.shape_cast %610 : vector<1x1x32x32xbf16> to vector<32x32xbf16>
    %cst_648 = arith.constant dense<0.000000e+00> : vector<16x32xf32>
    %612 = tpu.matmul %511, %611, %cst_648 {dimension_numbers = #tpu.dot_dimension_numbers<[1], [0], [0], [1], [0, 0, 1, 1], [], []>} : vector<16x32xbf16>, vector<32x32xbf16>, vector<16x32xf32> -> vector<16x32xf32>
    %613 = arith.addf %609, %612 : vector<16x32xf32>
    %614 = arith.mulf %9, %613 : vector<16x32xf32>
    %615 = arith.addf %606, %614 : vector<16x32xf32>
    %c3_649 = arith.constant 3 : index
    %c0_650 = arith.constant 0 : index
    %c0_651 = arith.constant 0 : index
    %c0_652 = arith.constant 0 : index
    %616 = vector.load %arg13[%c3_649, %c0_650, %c0_651, %c0_652] : memref<8x2x32x32xbf16, #tpu.memory_space<vmem>>, vector<1x1x32x32xbf16>
    %617 = vector.shape_cast %616 : vector<1x1x32x32xbf16> to vector<32x32xbf16>
    %cst_653 = arith.constant dense<0.000000e+00> : vector<16x32xf32>
    %618 = tpu.matmul %509, %617, %cst_653 {dimension_numbers = #tpu.dot_dimension_numbers<[1], [0], [0], [1], [0, 0, 1, 1], [], []>} : vector<16x32xbf16>, vector<32x32xbf16>, vector<16x32xf32> -> vector<16x32xf32>
    %c3_654 = arith.constant 3 : index
    %c1_655 = arith.constant 1 : index
    %c0_656 = arith.constant 0 : index
    %c0_657 = arith.constant 0 : index
    %619 = vector.load %arg13[%c3_654, %c1_655, %c0_656, %c0_657] : memref<8x2x32x32xbf16, #tpu.memory_space<vmem>>, vector<1x1x32x32xbf16>
    %620 = vector.shape_cast %619 : vector<1x1x32x32xbf16> to vector<32x32xbf16>
    %cst_658 = arith.constant dense<0.000000e+00> : vector<16x32xf32>
    %621 = tpu.matmul %511, %620, %cst_658 {dimension_numbers = #tpu.dot_dimension_numbers<[1], [0], [0], [1], [0, 0, 1, 1], [], []>} : vector<16x32xbf16>, vector<32x32xbf16>, vector<16x32xf32> -> vector<16x32xf32>
    %622 = arith.addf %618, %621 : vector<16x32xf32>
    %623 = arith.mulf %11, %622 : vector<16x32xf32>
    %624 = arith.addf %615, %623 : vector<16x32xf32>
    %c4_659 = arith.constant 4 : index
    %c0_660 = arith.constant 0 : index
    %c0_661 = arith.constant 0 : index
    %c0_662 = arith.constant 0 : index
    %625 = vector.load %arg13[%c4_659, %c0_660, %c0_661, %c0_662] : memref<8x2x32x32xbf16, #tpu.memory_space<vmem>>, vector<1x1x32x32xbf16>
    %626 = vector.shape_cast %625 : vector<1x1x32x32xbf16> to vector<32x32xbf16>
    %cst_663 = arith.constant dense<0.000000e+00> : vector<16x32xf32>
    %627 = tpu.matmul %509, %626, %cst_663 {dimension_numbers = #tpu.dot_dimension_numbers<[1], [0], [0], [1], [0, 0, 1, 1], [], []>} : vector<16x32xbf16>, vector<32x32xbf16>, vector<16x32xf32> -> vector<16x32xf32>
    %c4_664 = arith.constant 4 : index
    %c1_665 = arith.constant 1 : index
    %c0_666 = arith.constant 0 : index
    %c0_667 = arith.constant 0 : index
    %628 = vector.load %arg13[%c4_664, %c1_665, %c0_666, %c0_667] : memref<8x2x32x32xbf16, #tpu.memory_space<vmem>>, vector<1x1x32x32xbf16>
    %629 = vector.shape_cast %628 : vector<1x1x32x32xbf16> to vector<32x32xbf16>
    %cst_668 = arith.constant dense<0.000000e+00> : vector<16x32xf32>
    %630 = tpu.matmul %511, %629, %cst_668 {dimension_numbers = #tpu.dot_dimension_numbers<[1], [0], [0], [1], [0, 0, 1, 1], [], []>} : vector<16x32xbf16>, vector<32x32xbf16>, vector<16x32xf32> -> vector<16x32xf32>
    %631 = arith.addf %627, %630 : vector<16x32xf32>
    %632 = arith.mulf %13, %631 : vector<16x32xf32>
    %633 = arith.addf %624, %632 : vector<16x32xf32>
    %c5_669 = arith.constant 5 : index
    %c0_670 = arith.constant 0 : index
    %c0_671 = arith.constant 0 : index
    %c0_672 = arith.constant 0 : index
    %634 = vector.load %arg13[%c5_669, %c0_670, %c0_671, %c0_672] : memref<8x2x32x32xbf16, #tpu.memory_space<vmem>>, vector<1x1x32x32xbf16>
    %635 = vector.shape_cast %634 : vector<1x1x32x32xbf16> to vector<32x32xbf16>
    %cst_673 = arith.constant dense<0.000000e+00> : vector<16x32xf32>
    %636 = tpu.matmul %509, %635, %cst_673 {dimension_numbers = #tpu.dot_dimension_numbers<[1], [0], [0], [1], [0, 0, 1, 1], [], []>} : vector<16x32xbf16>, vector<32x32xbf16>, vector<16x32xf32> -> vector<16x32xf32>
    %c5_674 = arith.constant 5 : index
    %c1_675 = arith.constant 1 : index
    %c0_676 = arith.constant 0 : index
    %c0_677 = arith.constant 0 : index
    %637 = vector.load %arg13[%c5_674, %c1_675, %c0_676, %c0_677] : memref<8x2x32x32xbf16, #tpu.memory_space<vmem>>, vector<1x1x32x32xbf16>
    %638 = vector.shape_cast %637 : vector<1x1x32x32xbf16> to vector<32x32xbf16>
    %cst_678 = arith.constant dense<0.000000e+00> : vector<16x32xf32>
    %639 = tpu.matmul %511, %638, %cst_678 {dimension_numbers = #tpu.dot_dimension_numbers<[1], [0], [0], [1], [0, 0, 1, 1], [], []>} : vector<16x32xbf16>, vector<32x32xbf16>, vector<16x32xf32> -> vector<16x32xf32>
    %640 = arith.addf %636, %639 : vector<16x32xf32>
    %641 = arith.mulf %15, %640 : vector<16x32xf32>
    %642 = arith.addf %633, %641 : vector<16x32xf32>
    %c6_679 = arith.constant 6 : index
    %c0_680 = arith.constant 0 : index
    %c0_681 = arith.constant 0 : index
    %c0_682 = arith.constant 0 : index
    %643 = vector.load %arg13[%c6_679, %c0_680, %c0_681, %c0_682] : memref<8x2x32x32xbf16, #tpu.memory_space<vmem>>, vector<1x1x32x32xbf16>
    %644 = vector.shape_cast %643 : vector<1x1x32x32xbf16> to vector<32x32xbf16>
    %cst_683 = arith.constant dense<0.000000e+00> : vector<16x32xf32>
    %645 = tpu.matmul %509, %644, %cst_683 {dimension_numbers = #tpu.dot_dimension_numbers<[1], [0], [0], [1], [0, 0, 1, 1], [], []>} : vector<16x32xbf16>, vector<32x32xbf16>, vector<16x32xf32> -> vector<16x32xf32>
    %c6_684 = arith.constant 6 : index
    %c1_685 = arith.constant 1 : index
    %c0_686 = arith.constant 0 : index
    %c0_687 = arith.constant 0 : index
    %646 = vector.load %arg13[%c6_684, %c1_685, %c0_686, %c0_687] : memref<8x2x32x32xbf16, #tpu.memory_space<vmem>>, vector<1x1x32x32xbf16>
    %647 = vector.shape_cast %646 : vector<1x1x32x32xbf16> to vector<32x32xbf16>
    %cst_688 = arith.constant dense<0.000000e+00> : vector<16x32xf32>
    %648 = tpu.matmul %511, %647, %cst_688 {dimension_numbers = #tpu.dot_dimension_numbers<[1], [0], [0], [1], [0, 0, 1, 1], [], []>} : vector<16x32xbf16>, vector<32x32xbf16>, vector<16x32xf32> -> vector<16x32xf32>
    %649 = arith.addf %645, %648 : vector<16x32xf32>
    %650 = arith.mulf %17, %649 : vector<16x32xf32>
    %651 = arith.addf %642, %650 : vector<16x32xf32>
    %c7_689 = arith.constant 7 : index
    %c0_690 = arith.constant 0 : index
    %c0_691 = arith.constant 0 : index
    %c0_692 = arith.constant 0 : index
    %652 = vector.load %arg13[%c7_689, %c0_690, %c0_691, %c0_692] : memref<8x2x32x32xbf16, #tpu.memory_space<vmem>>, vector<1x1x32x32xbf16>
    %653 = vector.shape_cast %652 : vector<1x1x32x32xbf16> to vector<32x32xbf16>
    %cst_693 = arith.constant dense<0.000000e+00> : vector<16x32xf32>
    %654 = tpu.matmul %509, %653, %cst_693 {dimension_numbers = #tpu.dot_dimension_numbers<[1], [0], [0], [1], [0, 0, 1, 1], [], []>} : vector<16x32xbf16>, vector<32x32xbf16>, vector<16x32xf32> -> vector<16x32xf32>
    %c7_694 = arith.constant 7 : index
    %c1_695 = arith.constant 1 : index
    %c0_696 = arith.constant 0 : index
    %c0_697 = arith.constant 0 : index
    %655 = vector.load %arg13[%c7_694, %c1_695, %c0_696, %c0_697] : memref<8x2x32x32xbf16, #tpu.memory_space<vmem>>, vector<1x1x32x32xbf16>
    %656 = vector.shape_cast %655 : vector<1x1x32x32xbf16> to vector<32x32xbf16>
    %cst_698 = arith.constant dense<0.000000e+00> : vector<16x32xf32>
    %657 = tpu.matmul %511, %656, %cst_698 {dimension_numbers = #tpu.dot_dimension_numbers<[1], [0], [0], [1], [0, 0, 1, 1], [], []>} : vector<16x32xbf16>, vector<32x32xbf16>, vector<16x32xf32> -> vector<16x32xf32>
    %658 = arith.addf %654, %657 : vector<16x32xf32>
    %659 = arith.mulf %19, %658 : vector<16x32xf32>
    %660 = arith.addf %651, %659 : vector<16x32xf32>
    %661 = arith.negf %660 : vector<16x32xf32>
    %662 = math.exp %661 : vector<16x32xf32>
    %cst_699 = arith.constant 1.000000e+00 : f32
    %663 = vector.broadcast %cst_699 : f32 to vector<16x32xf32>
    %664 = arith.addf %663, %662 : vector<16x32xf32>
    %665 = arith.divf %663, %664 : vector<16x32xf32>
    %666 = arith.mulf %588, %505 : vector<16x32xf32>
    %667 = arith.truncf %666 : vector<16x32xf32> to vector<16x32xbf16>
    %cst_700 = arith.constant dense<0.000000e+00> : vector<32x32xf32>
    %668 = tpu.matmul %3, %667, %cst_700 {dimension_numbers = #tpu.dot_dimension_numbers<[1], [0], [0], [1], [0, 0, 1, 1], [], []>} : vector<32x16xbf16>, vector<16x32xbf16>, vector<32x32xf32> -> vector<32x32xf32>
    %669 = vector.extract_strided_slice %668 {offsets = [0, 0], sizes = [16, 32], strides = [1, 1]} : vector<32x32xf32> to vector<16x32xf32>
    %670 = arith.truncf %669 : vector<16x32xf32> to vector<16x32xbf16>
    %671 = vector.extract_strided_slice %668 {offsets = [16, 0], sizes = [16, 32], strides = [1, 1]} : vector<32x32xf32> to vector<16x32xf32>
    %672 = arith.truncf %671 : vector<16x32xf32> to vector<16x32xbf16>
    %c0_701 = arith.constant 0 : index
    %c0_702 = arith.constant 0 : index
    %c0_703 = arith.constant 0 : index
    %c0_704 = arith.constant 0 : index
    %673 = vector.load %arg14[%c0_701, %c0_702, %c0_703, %c0_704] : memref<8x2x32x32xbf16, #tpu.memory_space<vmem>>, vector<1x1x32x32xbf16>
    %674 = vector.shape_cast %673 : vector<1x1x32x32xbf16> to vector<32x32xbf16>
    %cst_705 = arith.constant dense<0.000000e+00> : vector<16x32xf32>
    %675 = tpu.matmul %670, %674, %cst_705 {dimension_numbers = #tpu.dot_dimension_numbers<[1], [0], [0], [1], [0, 0, 1, 1], [], []>} : vector<16x32xbf16>, vector<32x32xbf16>, vector<16x32xf32> -> vector<16x32xf32>
    %c0_706 = arith.constant 0 : index
    %c1_707 = arith.constant 1 : index
    %c0_708 = arith.constant 0 : index
    %c0_709 = arith.constant 0 : index
    %676 = vector.load %arg14[%c0_706, %c1_707, %c0_708, %c0_709] : memref<8x2x32x32xbf16, #tpu.memory_space<vmem>>, vector<1x1x32x32xbf16>
    %677 = vector.shape_cast %676 : vector<1x1x32x32xbf16> to vector<32x32xbf16>
    %cst_710 = arith.constant dense<0.000000e+00> : vector<16x32xf32>
    %678 = tpu.matmul %672, %677, %cst_710 {dimension_numbers = #tpu.dot_dimension_numbers<[1], [0], [0], [1], [0, 0, 1, 1], [], []>} : vector<16x32xbf16>, vector<32x32xbf16>, vector<16x32xf32> -> vector<16x32xf32>
    %679 = arith.addf %675, %678 : vector<16x32xf32>
    %680 = arith.mulf %5, %679 : vector<16x32xf32>
    %681 = arith.addf %503, %680 : vector<16x32xf32>
    %c1_711 = arith.constant 1 : index
    %c0_712 = arith.constant 0 : index
    %c0_713 = arith.constant 0 : index
    %c0_714 = arith.constant 0 : index
    %682 = vector.load %arg14[%c1_711, %c0_712, %c0_713, %c0_714] : memref<8x2x32x32xbf16, #tpu.memory_space<vmem>>, vector<1x1x32x32xbf16>
    %683 = vector.shape_cast %682 : vector<1x1x32x32xbf16> to vector<32x32xbf16>
    %cst_715 = arith.constant dense<0.000000e+00> : vector<16x32xf32>
    %684 = tpu.matmul %670, %683, %cst_715 {dimension_numbers = #tpu.dot_dimension_numbers<[1], [0], [0], [1], [0, 0, 1, 1], [], []>} : vector<16x32xbf16>, vector<32x32xbf16>, vector<16x32xf32> -> vector<16x32xf32>
    %c1_716 = arith.constant 1 : index
    %c1_717 = arith.constant 1 : index
    %c0_718 = arith.constant 0 : index
    %c0_719 = arith.constant 0 : index
    %685 = vector.load %arg14[%c1_716, %c1_717, %c0_718, %c0_719] : memref<8x2x32x32xbf16, #tpu.memory_space<vmem>>, vector<1x1x32x32xbf16>
    %686 = vector.shape_cast %685 : vector<1x1x32x32xbf16> to vector<32x32xbf16>
    %cst_720 = arith.constant dense<0.000000e+00> : vector<16x32xf32>
    %687 = tpu.matmul %672, %686, %cst_720 {dimension_numbers = #tpu.dot_dimension_numbers<[1], [0], [0], [1], [0, 0, 1, 1], [], []>} : vector<16x32xbf16>, vector<32x32xbf16>, vector<16x32xf32> -> vector<16x32xf32>
    %688 = arith.addf %684, %687 : vector<16x32xf32>
    %689 = arith.mulf %7, %688 : vector<16x32xf32>
    %690 = arith.addf %681, %689 : vector<16x32xf32>
    %c2_721 = arith.constant 2 : index
    %c0_722 = arith.constant 0 : index
    %c0_723 = arith.constant 0 : index
    %c0_724 = arith.constant 0 : index
    %691 = vector.load %arg14[%c2_721, %c0_722, %c0_723, %c0_724] : memref<8x2x32x32xbf16, #tpu.memory_space<vmem>>, vector<1x1x32x32xbf16>
    %692 = vector.shape_cast %691 : vector<1x1x32x32xbf16> to vector<32x32xbf16>
    %cst_725 = arith.constant dense<0.000000e+00> : vector<16x32xf32>
    %693 = tpu.matmul %670, %692, %cst_725 {dimension_numbers = #tpu.dot_dimension_numbers<[1], [0], [0], [1], [0, 0, 1, 1], [], []>} : vector<16x32xbf16>, vector<32x32xbf16>, vector<16x32xf32> -> vector<16x32xf32>
    %c2_726 = arith.constant 2 : index
    %c1_727 = arith.constant 1 : index
    %c0_728 = arith.constant 0 : index
    %c0_729 = arith.constant 0 : index
    %694 = vector.load %arg14[%c2_726, %c1_727, %c0_728, %c0_729] : memref<8x2x32x32xbf16, #tpu.memory_space<vmem>>, vector<1x1x32x32xbf16>
    %695 = vector.shape_cast %694 : vector<1x1x32x32xbf16> to vector<32x32xbf16>
    %cst_730 = arith.constant dense<0.000000e+00> : vector<16x32xf32>
    %696 = tpu.matmul %672, %695, %cst_730 {dimension_numbers = #tpu.dot_dimension_numbers<[1], [0], [0], [1], [0, 0, 1, 1], [], []>} : vector<16x32xbf16>, vector<32x32xbf16>, vector<16x32xf32> -> vector<16x32xf32>
    %697 = arith.addf %693, %696 : vector<16x32xf32>
    %698 = arith.mulf %9, %697 : vector<16x32xf32>
    %699 = arith.addf %690, %698 : vector<16x32xf32>
    %c3_731 = arith.constant 3 : index
    %c0_732 = arith.constant 0 : index
    %c0_733 = arith.constant 0 : index
    %c0_734 = arith.constant 0 : index
    %700 = vector.load %arg14[%c3_731, %c0_732, %c0_733, %c0_734] : memref<8x2x32x32xbf16, #tpu.memory_space<vmem>>, vector<1x1x32x32xbf16>
    %701 = vector.shape_cast %700 : vector<1x1x32x32xbf16> to vector<32x32xbf16>
    %cst_735 = arith.constant dense<0.000000e+00> : vector<16x32xf32>
    %702 = tpu.matmul %670, %701, %cst_735 {dimension_numbers = #tpu.dot_dimension_numbers<[1], [0], [0], [1], [0, 0, 1, 1], [], []>} : vector<16x32xbf16>, vector<32x32xbf16>, vector<16x32xf32> -> vector<16x32xf32>
    %c3_736 = arith.constant 3 : index
    %c1_737 = arith.constant 1 : index
    %c0_738 = arith.constant 0 : index
    %c0_739 = arith.constant 0 : index
    %703 = vector.load %arg14[%c3_736, %c1_737, %c0_738, %c0_739] : memref<8x2x32x32xbf16, #tpu.memory_space<vmem>>, vector<1x1x32x32xbf16>
    %704 = vector.shape_cast %703 : vector<1x1x32x32xbf16> to vector<32x32xbf16>
    %cst_740 = arith.constant dense<0.000000e+00> : vector<16x32xf32>
    %705 = tpu.matmul %672, %704, %cst_740 {dimension_numbers = #tpu.dot_dimension_numbers<[1], [0], [0], [1], [0, 0, 1, 1], [], []>} : vector<16x32xbf16>, vector<32x32xbf16>, vector<16x32xf32> -> vector<16x32xf32>
    %706 = arith.addf %702, %705 : vector<16x32xf32>
    %707 = arith.mulf %11, %706 : vector<16x32xf32>
    %708 = arith.addf %699, %707 : vector<16x32xf32>
    %c4_741 = arith.constant 4 : index
    %c0_742 = arith.constant 0 : index
    %c0_743 = arith.constant 0 : index
    %c0_744 = arith.constant 0 : index
    %709 = vector.load %arg14[%c4_741, %c0_742, %c0_743, %c0_744] : memref<8x2x32x32xbf16, #tpu.memory_space<vmem>>, vector<1x1x32x32xbf16>
    %710 = vector.shape_cast %709 : vector<1x1x32x32xbf16> to vector<32x32xbf16>
    %cst_745 = arith.constant dense<0.000000e+00> : vector<16x32xf32>
    %711 = tpu.matmul %670, %710, %cst_745 {dimension_numbers = #tpu.dot_dimension_numbers<[1], [0], [0], [1], [0, 0, 1, 1], [], []>} : vector<16x32xbf16>, vector<32x32xbf16>, vector<16x32xf32> -> vector<16x32xf32>
    %c4_746 = arith.constant 4 : index
    %c1_747 = arith.constant 1 : index
    %c0_748 = arith.constant 0 : index
    %c0_749 = arith.constant 0 : index
    %712 = vector.load %arg14[%c4_746, %c1_747, %c0_748, %c0_749] : memref<8x2x32x32xbf16, #tpu.memory_space<vmem>>, vector<1x1x32x32xbf16>
    %713 = vector.shape_cast %712 : vector<1x1x32x32xbf16> to vector<32x32xbf16>
    %cst_750 = arith.constant dense<0.000000e+00> : vector<16x32xf32>
    %714 = tpu.matmul %672, %713, %cst_750 {dimension_numbers = #tpu.dot_dimension_numbers<[1], [0], [0], [1], [0, 0, 1, 1], [], []>} : vector<16x32xbf16>, vector<32x32xbf16>, vector<16x32xf32> -> vector<16x32xf32>
    %715 = arith.addf %711, %714 : vector<16x32xf32>
    %716 = arith.mulf %13, %715 : vector<16x32xf32>
    %717 = arith.addf %708, %716 : vector<16x32xf32>
    %c5_751 = arith.constant 5 : index
    %c0_752 = arith.constant 0 : index
    %c0_753 = arith.constant 0 : index
    %c0_754 = arith.constant 0 : index
    %718 = vector.load %arg14[%c5_751, %c0_752, %c0_753, %c0_754] : memref<8x2x32x32xbf16, #tpu.memory_space<vmem>>, vector<1x1x32x32xbf16>
    %719 = vector.shape_cast %718 : vector<1x1x32x32xbf16> to vector<32x32xbf16>
    %cst_755 = arith.constant dense<0.000000e+00> : vector<16x32xf32>
    %720 = tpu.matmul %670, %719, %cst_755 {dimension_numbers = #tpu.dot_dimension_numbers<[1], [0], [0], [1], [0, 0, 1, 1], [], []>} : vector<16x32xbf16>, vector<32x32xbf16>, vector<16x32xf32> -> vector<16x32xf32>
    %c5_756 = arith.constant 5 : index
    %c1_757 = arith.constant 1 : index
    %c0_758 = arith.constant 0 : index
    %c0_759 = arith.constant 0 : index
    %721 = vector.load %arg14[%c5_756, %c1_757, %c0_758, %c0_759] : memref<8x2x32x32xbf16, #tpu.memory_space<vmem>>, vector<1x1x32x32xbf16>
    %722 = vector.shape_cast %721 : vector<1x1x32x32xbf16> to vector<32x32xbf16>
    %cst_760 = arith.constant dense<0.000000e+00> : vector<16x32xf32>
    %723 = tpu.matmul %672, %722, %cst_760 {dimension_numbers = #tpu.dot_dimension_numbers<[1], [0], [0], [1], [0, 0, 1, 1], [], []>} : vector<16x32xbf16>, vector<32x32xbf16>, vector<16x32xf32> -> vector<16x32xf32>
    %724 = arith.addf %720, %723 : vector<16x32xf32>
    %725 = arith.mulf %15, %724 : vector<16x32xf32>
    %726 = arith.addf %717, %725 : vector<16x32xf32>
    %c6_761 = arith.constant 6 : index
    %c0_762 = arith.constant 0 : index
    %c0_763 = arith.constant 0 : index
    %c0_764 = arith.constant 0 : index
    %727 = vector.load %arg14[%c6_761, %c0_762, %c0_763, %c0_764] : memref<8x2x32x32xbf16, #tpu.memory_space<vmem>>, vector<1x1x32x32xbf16>
    %728 = vector.shape_cast %727 : vector<1x1x32x32xbf16> to vector<32x32xbf16>
    %cst_765 = arith.constant dense<0.000000e+00> : vector<16x32xf32>
    %729 = tpu.matmul %670, %728, %cst_765 {dimension_numbers = #tpu.dot_dimension_numbers<[1], [0], [0], [1], [0, 0, 1, 1], [], []>} : vector<16x32xbf16>, vector<32x32xbf16>, vector<16x32xf32> -> vector<16x32xf32>
    %c6_766 = arith.constant 6 : index
    %c1_767 = arith.constant 1 : index
    %c0_768 = arith.constant 0 : index
    %c0_769 = arith.constant 0 : index
    %730 = vector.load %arg14[%c6_766, %c1_767, %c0_768, %c0_769] : memref<8x2x32x32xbf16, #tpu.memory_space<vmem>>, vector<1x1x32x32xbf16>
    %731 = vector.shape_cast %730 : vector<1x1x32x32xbf16> to vector<32x32xbf16>
    %cst_770 = arith.constant dense<0.000000e+00> : vector<16x32xf32>
    %732 = tpu.matmul %672, %731, %cst_770 {dimension_numbers = #tpu.dot_dimension_numbers<[1], [0], [0], [1], [0, 0, 1, 1], [], []>} : vector<16x32xbf16>, vector<32x32xbf16>, vector<16x32xf32> -> vector<16x32xf32>
    %733 = arith.addf %729, %732 : vector<16x32xf32>
    %734 = arith.mulf %17, %733 : vector<16x32xf32>
    %735 = arith.addf %726, %734 : vector<16x32xf32>
    %c7_771 = arith.constant 7 : index
    %c0_772 = arith.constant 0 : index
    %c0_773 = arith.constant 0 : index
    %c0_774 = arith.constant 0 : index
    %736 = vector.load %arg14[%c7_771, %c0_772, %c0_773, %c0_774] : memref<8x2x32x32xbf16, #tpu.memory_space<vmem>>, vector<1x1x32x32xbf16>
    %737 = vector.shape_cast %736 : vector<1x1x32x32xbf16> to vector<32x32xbf16>
    %cst_775 = arith.constant dense<0.000000e+00> : vector<16x32xf32>
    %738 = tpu.matmul %670, %737, %cst_775 {dimension_numbers = #tpu.dot_dimension_numbers<[1], [0], [0], [1], [0, 0, 1, 1], [], []>} : vector<16x32xbf16>, vector<32x32xbf16>, vector<16x32xf32> -> vector<16x32xf32>
    %c7_776 = arith.constant 7 : index
    %c1_777 = arith.constant 1 : index
    %c0_778 = arith.constant 0 : index
    %c0_779 = arith.constant 0 : index
    %739 = vector.load %arg14[%c7_776, %c1_777, %c0_778, %c0_779] : memref<8x2x32x32xbf16, #tpu.memory_space<vmem>>, vector<1x1x32x32xbf16>
    %740 = vector.shape_cast %739 : vector<1x1x32x32xbf16> to vector<32x32xbf16>
    %cst_780 = arith.constant dense<0.000000e+00> : vector<16x32xf32>
    %741 = tpu.matmul %672, %740, %cst_780 {dimension_numbers = #tpu.dot_dimension_numbers<[1], [0], [0], [1], [0, 0, 1, 1], [], []>} : vector<16x32xbf16>, vector<32x32xbf16>, vector<16x32xf32> -> vector<16x32xf32>
    %742 = arith.addf %738, %741 : vector<16x32xf32>
    %743 = arith.mulf %19, %742 : vector<16x32xf32>
    %744 = arith.addf %735, %743 : vector<16x32xf32>
    %745 = math.tanh %744 : vector<16x32xf32>
    %746 = arith.mulf %665, %505 : vector<16x32xf32>
    %cst_781 = arith.constant 1.000000e+00 : f32
    %747 = vector.broadcast %cst_781 : f32 to vector<16x32xf32>
    %748 = arith.subf %747, %665 : vector<16x32xf32>
    %749 = arith.mulf %748, %745 : vector<16x32xf32>
    %750 = arith.addf %746, %749 : vector<16x32xf32>
    %c1_782 = arith.constant 1 : index
    %c0_783 = arith.constant 0 : index
    %c0_784 = arith.constant 0 : index
    %751 = vector.load %arg16[%c1_782, %c0_783, %c0_784] : memref<2x16x32xf32, #tpu.memory_space<vmem>>, vector<1x16x32xf32>
    %752 = vector.shape_cast %751 : vector<1x16x32xf32> to vector<16x32xf32>
    %753 = vector.shape_cast %750 : vector<16x32xf32> to vector<1x16x32xf32>
    tpu.vector_store %arg16[%c1_782, %c0_783, %c0_784], %753 {strides = array<i32>} : memref<2x16x32xf32, #tpu.memory_space<vmem>>, vector<1x16x32xf32>,
    %c7_i32 = arith.constant 7 : i32
    %754 = arith.cmpi eq, %arg1, %c7_i32 : i32
    %755 = arith.extui %754 : i1 to i32
    %c0_i32_785 = arith.constant 0 : i32
    %756 = arith.cmpi ne, %755, %c0_i32_785 : i32
    scf.if %756 {
      %c0_786 = arith.constant 0 : index
      %c0_787 = arith.constant 0 : index
      %c0_788 = arith.constant 0 : index
      %757 = vector.load %arg15[%c0_786, %c0_787, %c0_788] : memref<1x16x32xf32, #tpu.memory_space<vmem>>, vector<1x16x32xf32>
      %758 = vector.shape_cast %757 : vector<1x16x32xf32> to vector<16x32xf32>
      %759 = vector.shape_cast %750 : vector<16x32xf32> to vector<1x16x32xf32>
      tpu.vector_store %arg15[%c0_786, %c0_787, %c0_788], %759 {strides = array<i32>} : memref<1x16x32xf32, #tpu.memory_space<vmem>>, vector<1x16x32xf32>,
    } else {
    }
    return
  }
  func.func @transform_0(%arg0: i32, %arg1: i32) -> (i32, i32, i32, i32, i32) {
    %c0_i32 = arith.constant 0 : i32
    %c0_i32_0 = arith.constant 0 : i32
    %c0_i32_1 = arith.constant 0 : i32
    %c0_i32_2 = arith.constant 0 : i32
    return %arg0, %arg1, %c0_i32, %c0_i32_0, %c0_i32_1 : i32, i32, i32, i32, i32
  }
  func.func @transform_1(%arg0: i32, %arg1: i32) -> (i32, i32) {
    %c0_i32 = arith.constant 0 : i32
    %c0_i32_0 = arith.constant 0 : i32
    %c0_i32_1 = arith.constant 0 : i32
    return %c0_i32, %c0_i32_0 : i32, i32
  }
  func.func @transform_2(%arg0: i32, %arg1: i32) -> (i32, i32, i32) {
    %c0_i32 = arith.constant 0 : i32
    %c0_i32_0 = arith.constant 0 : i32
    %c0_i32_1 = arith.constant 0 : i32
    %c0_i32_2 = arith.constant 0 : i32
    return %c0_i32, %c0_i32_0, %c0_i32_1 : i32, i32, i32
  }
  func.func @transform_3(%arg0: i32, %arg1: i32) -> (i32, i32, i32, i32) {
    %c0_i32 = arith.constant 0 : i32
    %c0_i32_0 = arith.constant 0 : i32
    %c0_i32_1 = arith.constant 0 : i32
    %c0_i32_2 = arith.constant 0 : i32
    %c0_i32_3 = arith.constant 0 : i32
    return %c0_i32, %c0_i32_0, %c0_i32_1, %c0_i32_2 : i32, i32, i32, i32
  }
  func.func @transform_4(%arg0: i32, %arg1: i32) -> (i32, i32, i32, i32) {
    %c0_i32 = arith.constant 0 : i32
    %c0_i32_0 = arith.constant 0 : i32
    %c0_i32_1 = arith.constant 0 : i32
    %c0_i32_2 = arith.constant 0 : i32
    %c0_i32_3 = arith.constant 0 : i32
    return %c0_i32, %c0_i32_0, %c0_i32_1, %c0_i32_2 : i32, i32, i32, i32
  }
  func.func @transform_5(%arg0: i32, %arg1: i32) -> (i32, i32, i32, i32) {
    %c0_i32 = arith.constant 0 : i32
    %c0_i32_0 = arith.constant 0 : i32
    %c0_i32_1 = arith.constant 0 : i32
    %c0_i32_2 = arith.constant 0 : i32
    %c0_i32_3 = arith.constant 0 : i32
    return %c0_i32, %c0_i32_0, %c0_i32_1, %c0_i32_2 : i32, i32, i32, i32
  }
  func.func @transform_6(%arg0: i32, %arg1: i32) -> (i32, i32, i32, i32) {
    %c0_i32 = arith.constant 0 : i32
    %c0_i32_0 = arith.constant 0 : i32
    %c0_i32_1 = arith.constant 0 : i32
    %c0_i32_2 = arith.constant 0 : i32
    %c0_i32_3 = arith.constant 0 : i32
    return %c0_i32, %c0_i32_0, %c0_i32_1, %c0_i32_2 : i32, i32, i32, i32
  }
  func.func @transform_7(%arg0: i32, %arg1: i32) -> (i32, i32, i32, i32) {
    %c0_i32 = arith.constant 0 : i32
    %c0_i32_0 = arith.constant 0 : i32
    %c0_i32_1 = arith.constant 0 : i32
    %c0_i32_2 = arith.constant 0 : i32
    %c0_i32_3 = arith.constant 0 : i32
    return %c0_i32, %c0_i32_0, %c0_i32_1, %c0_i32_2 : i32, i32, i32, i32
  }
  func.func @transform_8(%arg0: i32, %arg1: i32) -> (i32, i32, i32, i32) {
    %c0_i32 = arith.constant 0 : i32
    %c0_i32_0 = arith.constant 0 : i32
    %c0_i32_1 = arith.constant 0 : i32
    %c0_i32_2 = arith.constant 0 : i32
    %c0_i32_3 = arith.constant 0 : i32
    return %c0_i32, %c0_i32_0, %c0_i32_1, %c0_i32_2 : i32, i32, i32, i32
  }
  func.func @transform_9(%arg0: i32, %arg1: i32) -> (i32, i32, i32) {
    %c0_i32 = arith.constant 0 : i32
    %c0_i32_0 = arith.constant 0 : i32
    %c0_i32_1 = arith.constant 0 : i32
    %c0_i32_2 = arith.constant 0 : i32
    return %c0_i32, %c0_i32_0, %c0_i32_1 : i32, i32, i32
  }
  func.func @transform_10(%arg0: i32, %arg1: i32) -> (i32, i32, i32, i32) {
    %c0_i32 = arith.constant 0 : i32
    %c0_i32_0 = arith.constant 0 : i32
    %c0_i32_1 = arith.constant 0 : i32
    %c0_i32_2 = arith.constant 0 : i32
    %c0_i32_3 = arith.constant 0 : i32
    return %c0_i32, %c0_i32_0, %c0_i32_1, %c0_i32_2 : i32, i32, i32, i32
  }
  func.func @transform_11(%arg0: i32, %arg1: i32) -> (i32, i32, i32, i32) {
    %c0_i32 = arith.constant 0 : i32
    %c0_i32_0 = arith.constant 0 : i32
    %c0_i32_1 = arith.constant 0 : i32
    %c0_i32_2 = arith.constant 0 : i32
    %c0_i32_3 = arith.constant 0 : i32
    return %c0_i32, %c0_i32_0, %c0_i32_1, %c0_i32_2 : i32, i32, i32, i32
  }
  func.func @transform_12(%arg0: i32, %arg1: i32) -> (i32, i32, i32, i32) {
    %c0_i32 = arith.constant 0 : i32
    %c0_i32_0 = arith.constant 0 : i32
    %c0_i32_1 = arith.constant 0 : i32
    %c0_i32_2 = arith.constant 0 : i32
    %c0_i32_3 = arith.constant 0 : i32
    return %c0_i32, %c0_i32_0, %c0_i32_1, %c0_i32_2 : i32, i32, i32, i32
  }
  func.func @transform_13(%arg0: i32, %arg1: i32) -> (i32, i32, i32) {
    %c0_i32 = arith.constant 0 : i32
    %c0_i32_0 = arith.constant 0 : i32
    %c0_i32_1 = arith.constant 0 : i32
    return %arg0, %c0_i32, %c0_i32_0 : i32, i32, i32
  }
}

</mosaic_0001>

<bundles_post_ra>
// kernel: agcrn_bl_forward.1
= control target key start
LH: loop header
LB: loop body
LE: loop exit
PB: predicated region body
PF: predicated region fallthrough
CT: control target
= control target key end

     0   :  { %s13094_s25 = smov 0   ;;  %s13096_s26 = smov 0   ;;  %s15408_s0 = inlined_call_operand.vmem [shape: f32[2,8,3,16,32], index: 0, kind: input, shape index: {}]   ;;  %s15409_s1 = inlined_call_operand.vmem [shape: bf16[32,16], index: 1, kind: input, shape index: {}]   ;;  %s15410_s2 = inlined_call_operand.vmem [shape: f32[8,16,32], index: 2, kind: input, shape index: {}]   ;;  %s15411_s3 = inlined_call_operand.vmem [shape: bf16[8,2,32,32], index: 3, kind: input, shape index: {}]   ;;  %s15412_s4 = inlined_call_operand.vmem [shape: bf16[8,2,32,32], index: 4, kind: input, shape index: {}]   ;;  %s15413_s5 = inlined_call_operand.vmem [shape: bf16[8,2,32,32], index: 5, kind: input, shape index: {}]   ;;  %s15414_s6 = inlined_call_operand.vmem [shape: bf16[8,2,32,32], index: 6, kind: input, shape index: {}]   ;;  %s15415_s7 = inlined_call_operand.vmem [shape: bf16[8,2,32,32], index: 7, kind: input, shape index: {}]   ;;  %s15416_s8 = inlined_call_operand.vmem [shape: bf16[8,2,32,32], index: 8, kind: input, shape index: {}]   ;;  %s15417_s9 = inlined_call_operand.vmem [shape: f32[3,16,32], index: 9, kind: input, shape index: {}]   ;;  %s15418_s10 = inlined_call_operand.vmem [shape: bf16[8,2,32,32], index: 10, kind: input, shape index: {}]   ;;  %s15419_s11 = inlined_call_operand.vmem [shape: bf16[8,2,32,32], index: 11, kind: input, shape index: {}]   ;;  %s15420_s12 = inlined_call_operand.vmem [shape: bf16[8,2,32,32], index: 12, kind: input, shape index: {}]   ;;  %s15421_s13 = inlined_call_operand.vmem [shape: f32[2,16,32], index: 13, kind: output, shape index: {}]  }
   0x1   :  { %s13098_s27 = smov 0   ;;  %s13100_s28 = smov 0  }
   0x2   :  { %s13102_s29 = smov 0  }
   0x3 LB: > { %s32_s30 = sadd.s32 1, %s13011_s27  ;;  %s35_s14 = sadd.s32 1, %s13015_s28  ;;  %s13019_s29 = sphi %s13102_s29, %s23_s29   ;;  %s13015_s28 = sphi %s13100_s28, %s15429_s28   ;;  %s13011_s27 = sphi %s13098_s27, %s15428_s27   ;;  %s13007_s26 = sphi %s13096_s26, %s15427_s26   ;;  %s13003_s25 = sphi %s13094_s25, %s15426_s25  }
   0x4   : > { %p33_p0 = scmp.ge.s32.totalorder %s32_s30, 8  ;;  %p9625_p1 = scmp.ge.s32.totalorder %s13019_s29, 1 }
   0x5   : > { %p405_p2 = scmp.lt.s32.totalorder %s13019_s29, 17 }
   0x6   : > { %s15431_s30 = smov (%p33_p0, %s32_s30), 0  ;;  %s15433_s14 = smov (!%p33_p0, %s35_s14), %s13015_s28 }
   0x7   : > { %15422 = sst [smem:[#allocation3_spill]] %s15431_s30  ;;  %p406_p3 = pnand %p9625_p1, %p405_p2 }
   0x8   : > { %p37_p4 = scmp.ge.s32.totalorder %s15433_s14, 2  ;;  %p453_p5 = scmp.lt.s32.totalorder (!%p406_p3), %s13007_s26, 1 }
   0x9   : > { %409 = sbr.rel (%p406_p3) target bundleno = 2627 (0xa43), region = 72  ;;  %p455_p6 = scmp.lt.s32.totalorder (!%p406_p3), %s13003_s25, 7 }
   0xa   : > { %s15435_s14 = smov (%p37_p4, %s15433_s14), 0  ;;  %p9629_p7 = scmp.ne.s32.totalorder (!%p406_p3), %s13003_s25, 0 }
   0xb   : > { %15423 = sst [smem:[#allocation4_spill]] %s15435_s14 }
  0x10   : > { %s15437_s26 = smov (!%p453_p5, %s13007_s26), 1  ;;  %vm472_vm0 = vcmask (!%p9629_p7), 261120   ;;  %v13021_v0 = vmov (!%p9629_p7), 0.0  }
  0x11   : > { %s456_s15 = scalar_select %p455_p6, %s13003_s25, 7 }
  0x12   : > { %s12566_s16 = smul.u32 48, %s15437_s26  ;;  %s10647_s17 = sshll.u32 %s15437_s26, 4  ;;  %473 = vst.msk [vmem:[#allocation2] sm:$0xff] (!%p9629_p7), %vm472_vm0, %v13021_v0  ;;  %474 = vst.msk [vmem:[#allocation2 + $0x8] sm:$0xff] (!%p9629_p7), %vm472_vm0, %v13021_v0 }
  0x13   : > { %s12565_s18 = smul.u32 6, %s456_s15  ;;  %s13131_s21 = scalar_lea.vmem %s15421_s13, %s10647_s17  ;;  %475 = vst.msk [vmem:[#allocation2 + $0x10] sm:$0xff] (!%p9629_p7), %vm472_vm0, %v13021_v0  ;;  %476 = vst.msk [vmem:[#allocation2 + $0x18] sm:$0xff] (!%p9629_p7), %vm472_vm0, %v13021_v0 }
  0x14   : > { %471 = sbr.rel (%p9629_p7) target bundleno = 27 (0x1b), region = 76 }
  0x15   : > { %s459_s22 = sadd.s32 %s12566_s16, %s12565_s18 }
  0x16   : > { %s9626_s23 = sshll.u32 %s459_s22, 3 }
  0x17   : > { %s13136_s14 = scalar_lea.vmem %s15408_s0, %s9626_s23 }
  0x1b PF: > { %v512_v1 = vld [vmem:[#allocation2] sm:$0xff]  ;;  %v513_v2 = vld [vmem:[#allocation2 + $0x8] sm:$0xff]  ;;  %vm525_vm1 = vcmask 130048   ;;  %v13022_v5 = vmov 0.0   ;;  %v12612_v7 = vld [vmem:[%s15411_s3 + $0x10] sm:$0xff]   ;;  %vm13023_vm2 = vmmov 0  }
  0x1c   : > { %v514_v3 = vpack.c.bf16 %v513_v2, %v512_v1  ;;  %v12610_v4 = vld [vmem:[%s15409_s1] sm:$0xff]   ;;  %11101 = vmatprep.subr.bf16.mxu1 %v13022_v5  ;;  %v12611_v6 = vld [vmem:[%s15409_s1 + $0x8] sm:$0xff]   ;;  %v12613_v8 = vld [vmem:[%s15411_s3 + $0x30] sm:$0xff]   ;;  %11105 = vmatprep.mubr.msk.bf16.mxu1 %vm13023_vm2, %v13022_v5  ;;  %vm604_vm3 = vcmask 261120   ;;  %p10644_p8 = scmp.ne.s32.totalorder %s13003_s25, 7 }
  0x1d   : > { %11097 = vmatprep.mubr.msk.bf16.mxu0 %vm525_vm1, %v12610_v4  ;;  %11102 = vmatpush3.bf16.msra.mxu1 %v12612_v7  ;;  %v12614_v9 = vld [vmem:[%s15411_s3 + $0x18] sm:$0xff]   ;;  %v12616_v14 = vld [vmem:[%s15411_s3] sm:$0xff]   ;;  %v12618_v19 = vld [vmem:[%s15411_s3 + $0x8] sm:$0xff]  }
  0x1e   : > { %11095 = vmatprep.subr.bf16.mxu0 %v514_v3  ;;  %11103 = vmatprep.subr.bf16.mxu1 %v13022_v5  ;;  %v12615_v10 = vld [vmem:[%s15411_s3 + $0x38] sm:$0xff]   ;;  %v12617_v15 = vld [vmem:[%s15411_s3 + $0x20] sm:$0xff]   ;;  %v12619_v20 = vld [vmem:[%s15411_s3 + $0x28] sm:$0xff]  }
  0x1f   : > { %11096 = vmatpush3.bf16.msra.mxu0 %v514_v3  ;;  %v12620_v21 = vld [vmem:[%s15411_s3 + $0x50] sm:$0xff]   ;;  %v12622_v23 = vld [vmem:[%s15411_s3 + $0x58] sm:$0xff]   ;;  %v12624_v25 = vld [vmem:[%s15411_s3 + $0x40] sm:$0xff]  }
  0x20   : > { %11117 = vmatprep.subr.bf16.mxu0 %v13022_v5  ;;  %v12621_v22 = vld [vmem:[%s15411_s3 + $0x70] sm:$0xff]   ;;  %v12623_v24 = vld [vmem:[%s15411_s3 + $0x78] sm:$0xff]   ;;  %v12625_v26 = vld [vmem:[%s15411_s3 + $0x60] sm:$0xff]  }
  0x21   : > { %11104 = vmatpush3.bf16.msra.mxu1 %v12614_v9  ;;  %v12626_v27 = vld [vmem:[%s15411_s3 + $0x48] sm:$0xff]   ;;  %v12628_v29 = vld [vmem:[%s15411_s3 + $0x90] sm:$0xff]   ;;  %v12630_v31 = vld [vmem:[%s15411_s3 + $0x98] sm:$0xff]  }
  0x22   : > { %11098 = vmatmul.mubr.msk.bf16.vlgmr.msra.gmra.mrb[0].mxu0 %vm525_vm1, %v12611_v6  ;;  %11109 = vmatprep.subr.bf16.mxu1 %v13022_v5  ;;  %v12627_v28 = vld [vmem:[%s15411_s3 + $0x68] sm:$0xff]   ;;  %v12629_v30 = vld [vmem:[%s15411_s3 + $0xb0] sm:$0xff]   ;;  %v12631_v32 = vld [vmem:[%s15411_s3 + $0xb8] sm:$0xff]  }
  0x23   : > { %11118 = vmatpush3.bf16.msra.mxu0 %v12613_v8  ;;  %11121 = vmatprep.mubr.msk.bf16.mxu0 %vm13023_vm2, %v13022_v5  ;;  %v12632_v33 = vld [vmem:[%s15411_s3 + $0x80] sm:$0xff]   ;;  %v12634_v35 = vld [vmem:[%s15411_s3 + $0x88] sm:$0xff]   ;;  %v12636_v37 = vld [vmem:[%s15411_s3 + $0xd0] sm:$0xff]  }
  0x24   : > { %11119 = vmatprep.subr.bf16.mxu0 %v13022_v5  ;;  %v12633_v34 = vld [vmem:[%s15411_s3 + $0xa0] sm:$0xff]   ;;  %v12635_v36 = vld [vmem:[%s15411_s3 + $0xa8] sm:$0xff]   ;;  %v12637_v38 = vld [vmem:[%s15411_s3 + $0xf0] sm:$0xff]  }
  0x25   : > { %v12638_v39 = vld [vmem:[%s15411_s3 + $0xd8] sm:$0xff]   ;;  %v12640_v41 = vld [vmem:[%s15411_s3 + $0xc0] sm:$0xff]   ;;  %v12642_v43 = vld [vmem:[%s15411_s3 + $0xc8] sm:$0xff]  }
  0x26   : > { %v12639_v40 = vld [vmem:[%s15411_s3 + $0xf8] sm:$0xff]   ;;  %v12641_v42 = vld [vmem:[%s15411_s3 + $0xe0] sm:$0xff]   ;;  %v12643_v44 = vld [vmem:[%s15411_s3 + $0xe8] sm:$0xff]  }
  0x27   : > { %11120 = vmatpush3.bf16.msra.mxu0 %v12615_v10  ;;  %v12644_v45 = vld [vmem:[%s15412_s4 + $0x10] sm:$0xff]   ;;  %v12646_v47 = vld [vmem:[%s15412_s4 + $0x18] sm:$0xff]   ;;  %v12648_v49 = vld [vmem:[%s15412_s4] sm:$0xff]  }
  0x28   : > { %11125 = vmatprep.subr.bf16.mxu0 %v13022_v5  ;;  %v12645_v46 = vld [vmem:[%s15412_s4 + $0x30] sm:$0xff]   ;;  %v12647_v48 = vld [vmem:[%s15412_s4 + $0x38] sm:$0xff]   ;;  %v12649_v50 = vld [vmem:[%s15412_s4 + $0x20] sm:$0xff]  }
  0x29   : > { %v12650_v51 = vld [vmem:[%s15412_s4 + $0x8] sm:$0xff]   ;;  %v12652_v53 = vld [vmem:[%s15412_s4 + $0x50] sm:$0xff]   ;;  %v12654_v55 = vld [vmem:[%s15412_s4 + $0x58] sm:$0xff]  }
  0x2a   : > { %v12651_v52 = vld [vmem:[%s15412_s4 + $0x28] sm:$0xff]   ;;  %v12653_v54 = vld [vmem:[%s15412_s4 + $0x70] sm:$0xff]   ;;  %v12655_v56 = vld [vmem:[%s15412_s4 + $0x78] sm:$0xff]  }
  0x2b   : > { %v12656_v57 = vld [vmem:[%s15412_s4 + $0x40] sm:$0xff]   ;;  %v12658_v59 = vld [vmem:[%s15412_s4 + $0x48] sm:$0xff]   ;;  %v12660_v61 = vld [vmem:[%s15412_s4 + $0x90] sm:$0xff]  }
  0x2c   : > { %v12657_v58 = vld [vmem:[%s15412_s4 + $0x60] sm:$0xff]   ;;  %v12659_v60 = vld [vmem:[%s15412_s4 + $0x68] sm:$0xff]   ;;  %v12661_v62 = vld [vmem:[%s15412_s4 + $0xb0] sm:$0xff]  }
  0x2d   : > { %v12662_v63 = vld [vmem:[%s15412_s4 + $0x98] sm:$0xff]   ;;  %v12664_v1 = vld [vmem:[%s15412_s4 + $0x80] sm:$0xff]   ;;  %v12666_v3 = vld [vmem:[%s15412_s4 + $0x88] sm:$0xff]  }
  0x2e   : > { %v12663_v0 = vld [vmem:[%s15412_s4 + $0xb8] sm:$0xff]   ;;  %v12665_v2 = vld [vmem:[%s15412_s4 + $0xa0] sm:$0xff]   ;;  %v12667_v4 = vld [vmem:[%s15412_s4 + $0xa8] sm:$0xff]  }
  0x2f   : > { %v12668_v6 = vld [vmem:[%s15412_s4 + $0xd0] sm:$0xff]   ;;  %v12670_v8 = vld [vmem:[%s15412_s4 + $0xd8] sm:$0xff]   ;;  %v12672_v10 = vld [vmem:[%s15412_s4 + $0xc0] sm:$0xff]  }
  0x30   : > { %v12669_v7 = vld [vmem:[%s15412_s4 + $0xf0] sm:$0xff]   ;;  %v12671_v9 = vld [vmem:[%s15412_s4 + $0xf8] sm:$0xff]  }
  0xf5   : > { %v11099_v11 = vpop.f32.mrb[0].mxu0 }
  0xf6   : > { %v566_v12 = vpop.f32.mrb[1].mxu0 }
  0xf7   : > { %v11100_v13 = vpop.f32.mrb[2].mxu0 }
  0xf8   : > { %v13175_v16 = vpack.c.bf16 %v11100_v13, %v11099_v11  ;;  %v569_v17 = vpop.f32.mrb[3].mxu0  ;;  %v12673_v11 = vld [vmem:[%s15412_s4 + $0xe0] sm:$0xff]   ;;  %v12675_v13 = vld [vmem:[%s15412_s4 + $0xe8] sm:$0xff]  }
  0xf9   : > { %v13177_v18 = vpack.c.bf16 %v569_v17, %v566_v12  ;;  %v12674_v12 = vld [vmem:[%s15412_s4 + $0xc8] sm:$0xff]  }
  0xfa   : > { %11106 = vmatmul.mubr.msk.bf16.vlgmr.msra.gmra.mrb[0].mxu1 %vm604_vm3, %v13175_v16  ;;  %11122 = vmatmul.mubr.msk.bf16.vlgmr.msra.gmra.mrb[4].mxu0 %vm604_vm3, %v13175_v16 }
  0xfb   : > { %11110 = vmatpush3.bf16.msra.mxu1 %v12616_v14  ;;  %11126 = vmatpush3.bf16.msra.mxu0 %v12617_v15  ;;  %v13539_v14 = vld [vmem:[%s15409_s1] sm:$0xff]  }
  0xfc   : > { %11111 = vmatprep.subr.bf16.mxu1 %v13022_v5  ;;  %11127 = vmatprep.subr.bf16.mxu0 %v13022_v5  ;;  %v13548_v15 = vld [vmem:[%s15410_s2] sm:$0xff] }
  0xfd   : > { %11113 = vmatprep.mubr.msk.bf16.mxu1 %vm13023_vm2, %v13022_v5  ;;  %11129 = vmatprep.mubr.msk.bf16.mxu0 %vm13023_vm2, %v13022_v5 }
  0xff   : > { %11112 = vmatpush3.bf16.msra.mxu1 %v12618_v19  ;;  %11128 = vmatpush3.bf16.msra.mxu0 %v12619_v20  ;;  %v13559_v20 = vld [vmem:[%s15410_s2 + $0x8] sm:$0xff] }
 0x100   : > { %11133 = vmatprep.subr.bf16.mxu1 %v13022_v5  ;;  %11149 = vmatprep.subr.bf16.mxu0 %v13022_v5 }
 0x106   : > { %11114 = vmatmul.mubr.msk.bf16.vlgmr.msra.gmra.mrb[0].mxu1 %vm604_vm3, %v13177_v18  ;;  %11130 = vmatmul.mubr.msk.bf16.vlgmr.msra.gmra.mrb[4].mxu0 %vm604_vm3, %v13177_v18 }
 0x107   : > { %11134 = vmatpush3.bf16.msra.mxu1 %v12620_v21  ;;  %11150 = vmatpush3.bf16.msra.mxu0 %v12621_v22 }
 0x108   : > { %11135 = vmatprep.subr.bf16.mxu1 %v13022_v5  ;;  %11151 = vmatprep.subr.bf16.mxu0 %v13022_v5 }
 0x109   : > { %11137 = vmatprep.mubr.msk.bf16.mxu1 %vm13023_vm2, %v13022_v5  ;;  %11153 = vmatprep.mubr.msk.bf16.mxu0 %vm13023_vm2, %v13022_v5 }
 0x10b   : > { %11136 = vmatpush3.bf16.msra.mxu1 %v12622_v23  ;;  %11152 = vmatpush3.bf16.msra.mxu0 %v12623_v24  ;;  %v505_v24 = vld [vmem:[%s13136_s14 + $0x8] sm:$0xff] }
 0x10c   : > { %11141 = vmatprep.subr.bf16.mxu1 %v13022_v5  ;;  %11157 = vmatprep.subr.bf16.mxu0 %v13022_v5 }
 0x10e   : > { %11138 = vmatmul.mubr.msk.bf16.vlgmr.msra.gmra.mrb[4].mxu1 %vm604_vm3, %v13175_v16  ;;  %11154 = vmatmul.mubr.msk.bf16.vlgmr.msra.gmra.mrb[8].mxu0 %vm604_vm3, %v13175_v16 }
 0x10f   : > { %11142 = vmatpush3.bf16.msra.mxu1 %v12624_v25  ;;  %11158 = vmatpush3.bf16.msra.mxu0 %v12625_v26  ;;  %v13566_v26 = vld [vmem:[%s15410_s2 + $0x18] sm:$0xff] }
 0x110   : > { %11143 = vmatprep.subr.bf16.mxu1 %v13022_v5  ;;  %11159 = vmatprep.subr.bf16.mxu0 %v13022_v5 }
 0x111   : > { %11145 = vmatprep.mubr.msk.bf16.mxu1 %vm13023_vm2, %v13022_v5  ;;  %11161 = vmatprep.mubr.msk.bf16.mxu0 %vm13023_vm2, %v13022_v5 }
 0x113   : > { %11144 = vmatpush3.bf16.msra.mxu1 %v12626_v27  ;;  %11160 = vmatpush3.bf16.msra.mxu0 %v12627_v28 }
 0x114   : > { %11165 = vmatprep.subr.bf16.mxu1 %v13022_v5  ;;  %11181 = vmatprep.subr.bf16.mxu0 %v13022_v5 }
 0x11a   : > { %11146 = vmatmul.mubr.msk.bf16.vlgmr.msra.gmra.mrb[4].mxu1 %vm604_vm3, %v13177_v18  ;;  %11162 = vmatmul.mubr.msk.bf16.vlgmr.msra.gmra.mrb[8].mxu0 %vm604_vm3, %v13177_v18 }
 0x11b   : > { %11166 = vmatpush3.bf16.msra.mxu1 %v12628_v29  ;;  %11182 = vmatpush3.bf16.msra.mxu0 %v12629_v30 }
 0x11c   : > { %11167 = vmatprep.subr.bf16.mxu1 %v13022_v5  ;;  %11183 = vmatprep.subr.bf16.mxu0 %v13022_v5 }
 0x11d   : > { %11169 = vmatprep.mubr.msk.bf16.mxu1 %vm13023_vm2, %v13022_v5  ;;  %11185 = vmatprep.mubr.msk.bf16.mxu0 %vm13023_vm2, %v13022_v5 }
 0x11f   : > { %11168 = vmatpush3.bf16.msra.mxu1 %v12630_v31  ;;  %11184 = vmatpush3.bf16.msra.mxu0 %v12631_v32 }
 0x120   : > { %11173 = vmatprep.subr.bf16.mxu1 %v13022_v5  ;;  %11189 = vmatprep.subr.bf16.mxu0 %v13022_v5 }
 0x122   : > { %11170 = vmatmul.mubr.msk.bf16.vlgmr.msra.gmra.mrb[8].mxu1 %vm604_vm3, %v13175_v16  ;;  %11186 = vmatmul.mubr.msk.bf16.vlgmr.msra.gmra.mrb[12].mxu0 %vm604_vm3, %v13175_v16 }
 0x123   : > { %11174 = vmatpush3.bf16.msra.mxu1 %v12632_v33  ;;  %11190 = vmatpush3.bf16.msra.mxu0 %v12633_v34 }
 0x124   : > { %11175 = vmatprep.subr.bf16.mxu1 %v13022_v5  ;;  %11191 = vmatprep.subr.bf16.mxu0 %v13022_v5 }
 0x125   : > { %11177 = vmatprep.mubr.msk.bf16.mxu1 %vm13023_vm2, %v13022_v5  ;;  %11193 = vmatprep.mubr.msk.bf16.mxu0 %vm13023_vm2, %v13022_v5 }
 0x127   : > { %11176 = vmatpush3.bf16.msra.mxu1 %v12634_v35  ;;  %11192 = vmatpush3.bf16.msra.mxu0 %v12635_v36 }
 0x128   : > { %11197 = vmatprep.subr.bf16.mxu1 %v13022_v5  ;;  %11213 = vmatprep.subr.bf16.mxu0 %v13022_v5 }
 0x12e   : > { %11178 = vmatmul.mubr.msk.bf16.vlgmr.msra.gmra.mrb[8].mxu1 %vm604_vm3, %v13177_v18  ;;  %11194 = vmatmul.mubr.msk.bf16.vlgmr.msra.gmra.mrb[12].mxu0 %vm604_vm3, %v13177_v18 }
 0x12f   : > { %11198 = vmatpush3.bf16.msra.mxu1 %v12636_v37  ;;  %11214 = vmatpush3.bf16.msra.mxu0 %v12637_v38  ;;  %v13574_v37 = vld [vmem:[%s15410_s2 + $0x20] sm:$0xff] }
 0x130   : > { %11199 = vmatprep.subr.bf16.mxu1 %v13022_v5  ;;  %11215 = vmatprep.subr.bf16.mxu0 %v13022_v5 }
 0x131   : > { %11201 = vmatprep.mubr.msk.bf16.mxu1 %vm13023_vm2, %v13022_v5  ;;  %11217 = vmatprep.mubr.msk.bf16.mxu0 %vm13023_vm2, %v13022_v5 }
 0x133   : > { %11200 = vmatpush3.bf16.msra.mxu1 %v12638_v39  ;;  %11216 = vmatpush3.bf16.msra.mxu0 %v12639_v40  ;;  %v13579_v39 = vld [vmem:[%s15410_s2 + $0x30] sm:$0xff] }
 0x134   : > { %11205 = vmatprep.subr.bf16.mxu1 %v13022_v5  ;;  %11221 = vmatprep.subr.bf16.mxu0 %v13022_v5 }
 0x136   : > { %11202 = vmatmul.mubr.msk.bf16.vlgmr.msra.gmra.mrb[12].mxu1 %vm604_vm3, %v13175_v16  ;;  %11218 = vmatmul.mubr.msk.bf16.vlgmr.msra.gmra.mrb[16].mxu0 %vm604_vm3, %v13175_v16 }
 0x137   : > { %11206 = vmatpush3.bf16.msra.mxu1 %v12640_v41  ;;  %11222 = vmatpush3.bf16.msra.mxu0 %v12641_v42  ;;  %v13584_v41 = vld [vmem:[%s15410_s2 + $0x28] sm:$0xff] }
 0x138   : > { %11207 = vmatprep.subr.bf16.mxu1 %v13022_v5  ;;  %11223 = vmatprep.subr.bf16.mxu0 %v13022_v5 }
 0x139   : > { %11209 = vmatprep.mubr.msk.bf16.mxu1 %vm13023_vm2, %v13022_v5  ;;  %11225 = vmatprep.mubr.msk.bf16.mxu0 %vm13023_vm2, %v13022_v5 }
 0x13b   : > { %11208 = vmatpush3.bf16.msra.mxu1 %v12642_v43  ;;  %11224 = vmatpush3.bf16.msra.mxu0 %v12643_v44 }
 0x13c   : > { %11229 = vmatprep.subr.bf16.mxu1 %v13022_v5  ;;  %11245 = vmatprep.subr.bf16.mxu0 %v13022_v5 }
 0x142   : > { %11210 = vmatmul.mubr.msk.bf16.vlgmr.msra.gmra.mrb[12].mxu1 %vm604_vm3, %v13177_v18  ;;  %11226 = vmatmul.mubr.msk.bf16.vlgmr.msra.gmra.mrb[16].mxu0 %vm604_vm3, %v13177_v18 }
 0x143   : > { %11230 = vmatpush3.bf16.msra.mxu1 %v12644_v45  ;;  %11246 = vmatpush3.bf16.msra.mxu0 %v12645_v46  ;;  %v13590_v46 = vld [vmem:[%s15410_s2 + $0x38] sm:$0xff] }
 0x144   : > { %11231 = vmatprep.subr.bf16.mxu1 %v13022_v5  ;;  %11247 = vmatprep.subr.bf16.mxu0 %v13022_v5 }
 0x145   : > { %11233 = vmatprep.mubr.msk.bf16.mxu1 %vm13023_vm2, %v13022_v5  ;;  %11249 = vmatprep.mubr.msk.bf16.mxu0 %vm13023_vm2, %v13022_v5 }
 0x147   : > { %11232 = vmatpush3.bf16.msra.mxu1 %v12646_v47  ;;  %11248 = vmatpush3.bf16.msra.mxu0 %v12647_v48 }
 0x148   : > { %11237 = vmatprep.subr.bf16.mxu1 %v13022_v5  ;;  %11253 = vmatprep.subr.bf16.mxu0 %v13022_v5 }
 0x14a   : > { %11234 = vmatmul.mubr.msk.bf16.vlgmr.msra.gmra.mrb[16].mxu1 %vm604_vm3, %v13175_v16  ;;  %11250 = vmatmul.mubr.msk.bf16.vlgmr.msra.gmra.mrb[20].mxu0 %vm604_vm3, %v13175_v16 }
 0x14b   : > { %11238 = vmatpush3.bf16.msra.mxu1 %v12648_v49  ;;  %11254 = vmatpush3.bf16.msra.mxu0 %v12649_v50 }
 0x14c   : > { %11239 = vmatprep.subr.bf16.mxu1 %v13022_v5  ;;  %11255 = vmatprep.subr.bf16.mxu0 %v13022_v5 }
 0x14d   : > { %11241 = vmatprep.mubr.msk.bf16.mxu1 %vm13023_vm2, %v13022_v5  ;;  %11257 = vmatprep.mubr.msk.bf16.mxu0 %vm13023_vm2, %v13022_v5 }
 0x14f   : > { %11240 = vmatpush3.bf16.msra.mxu1 %v12650_v51  ;;  %11256 = vmatpush3.bf16.msra.mxu0 %v12651_v52 }
 0x150   : > { %11261 = vmatprep.subr.bf16.mxu1 %v13022_v5  ;;  %11277 = vmatprep.subr.bf16.mxu0 %v13022_v5 }
 0x156   : > { %11242 = vmatmul.mubr.msk.bf16.vlgmr.msra.gmra.mrb[16].mxu1 %vm604_vm3, %v13177_v18  ;;  %11258 = vmatmul.mubr.msk.bf16.vlgmr.msra.gmra.mrb[20].mxu0 %vm604_vm3, %v13177_v18 }
 0x157   : > { %11262 = vmatpush3.bf16.msra.mxu1 %v12652_v53  ;;  %11278 = vmatpush3.bf16.msra.mxu0 %v12653_v54 }
 0x158   : > { %11263 = vmatprep.subr.bf16.mxu1 %v13022_v5  ;;  %11279 = vmatprep.subr.bf16.mxu0 %v13022_v5 }
 0x159   : > { %11265 = vmatprep.mubr.msk.bf16.mxu1 %vm13023_vm2, %v13022_v5  ;;  %11281 = vmatprep.mubr.msk.bf16.mxu0 %vm13023_vm2, %v13022_v5 }
 0x15b   : > { %11264 = vmatpush3.bf16.msra.mxu1 %v12654_v55  ;;  %11280 = vmatpush3.bf16.msra.mxu0 %v12655_v56 }
 0x15c   : > { %11269 = vmatprep.subr.bf16.mxu1 %v13022_v5  ;;  %11285 = vmatprep.subr.bf16.mxu0 %v13022_v5 }
 0x15e   : > { %11266 = vmatmul.mubr.msk.bf16.vlgmr.msra.gmra.mrb[20].mxu1 %vm604_vm3, %v13175_v16  ;;  %11282 = vmatmul.mubr.msk.bf16.vlgmr.msra.gmra.mrb[24].mxu0 %vm604_vm3, %v13175_v16 }
 0x15f   : > { %11270 = vmatpush3.bf16.msra.mxu1 %v12656_v57  ;;  %11286 = vmatpush3.bf16.msra.mxu0 %v12657_v58  ;;  %v12676_v57 = vld [vmem:[%s15413_s5 + $0x10] sm:$0xff]   ;;  %v13601_v58 = vld [vmem:[%s15410_s2 + $0x40] sm:$0xff] }
 0x160   : > { %11271 = vmatprep.subr.bf16.mxu1 %v13022_v5  ;;  %11287 = vmatprep.subr.bf16.mxu0 %v13022_v5 }
 0x161   : > { %11273 = vmatprep.mubr.msk.bf16.mxu1 %vm13023_vm2, %v13022_v5  ;;  %11289 = vmatprep.mubr.msk.bf16.mxu0 %vm13023_vm2, %v13022_v5 }
 0x163   : > { %11272 = vmatpush3.bf16.msra.mxu1 %v12658_v59  ;;  %11288 = vmatpush3.bf16.msra.mxu0 %v12659_v60  ;;  %v13607_v60 = vld [vmem:[%s15410_s2 + $0x50] sm:$0xff] }
 0x164   : > { %11293 = vmatprep.subr.bf16.mxu1 %v13022_v5  ;;  %11309 = vmatprep.subr.bf16.mxu0 %v13022_v5 }
 0x16a   : > { %11274 = vmatmul.mubr.msk.bf16.vlgmr.msra.gmra.mrb[20].mxu1 %vm604_vm3, %v13177_v18  ;;  %11290 = vmatmul.mubr.msk.bf16.vlgmr.msra.gmra.mrb[24].mxu0 %vm604_vm3, %v13177_v18 }
 0x16b   : > { %11294 = vmatpush3.bf16.msra.mxu1 %v12660_v61  ;;  %11310 = vmatpush3.bf16.msra.mxu0 %v12661_v62  ;;  %v13612_v62 = vld [vmem:[%s15410_s2 + $0x48] sm:$0xff] }
 0x16c   : > { %11295 = vmatprep.subr.bf16.mxu1 %v13022_v5  ;;  %11311 = vmatprep.subr.bf16.mxu0 %v13022_v5 }
 0x16d   : > { %11297 = vmatprep.mubr.msk.bf16.mxu1 %vm13023_vm2, %v13022_v5  ;;  %11313 = vmatprep.mubr.msk.bf16.mxu0 %vm13023_vm2, %v13022_v5 }
 0x16f   : > { %11296 = vmatpush3.bf16.msra.mxu1 %v12662_v63  ;;  %11312 = vmatpush3.bf16.msra.mxu0 %v12663_v0 }
 0x170   : > { %11301 = vmatprep.subr.bf16.mxu1 %v13022_v5  ;;  %11317 = vmatprep.subr.bf16.mxu0 %v13022_v5 }
 0x172   : > { %11298 = vmatmul.mubr.msk.bf16.vlgmr.msra.gmra.mrb[24].mxu1 %vm604_vm3, %v13175_v16  ;;  %11314 = vmatmul.mubr.msk.bf16.vlgmr.msra.gmra.mrb[28].mxu0 %vm604_vm3, %v13175_v16 }
 0x173   : > { %11302 = vmatpush3.bf16.msra.mxu1 %v12664_v1  ;;  %11318 = vmatpush3.bf16.msra.mxu0 %v12665_v2 }
 0x174   : > { %11303 = vmatprep.subr.bf16.mxu1 %v13022_v5  ;;  %11319 = vmatprep.subr.bf16.mxu0 %v13022_v5 }
 0x175   : > { %11305 = vmatprep.mubr.msk.bf16.mxu1 %vm13023_vm2, %v13022_v5  ;;  %11321 = vmatprep.mubr.msk.bf16.mxu0 %vm13023_vm2, %v13022_v5 }
 0x177   : > { %11304 = vmatpush3.bf16.msra.mxu1 %v12666_v3  ;;  %11320 = vmatpush3.bf16.msra.mxu0 %v12667_v4  ;;  %v13618_v3 = vld [vmem:[%s15410_s2 + $0x58] sm:$0xff] }
 0x178   : > { %11325 = vmatprep.subr.bf16.mxu1 %v13022_v5  ;;  %11341 = vmatprep.subr.bf16.mxu0 %v13022_v5 }
 0x17e   : > { %11306 = vmatmul.mubr.msk.bf16.vlgmr.msra.gmra.mrb[24].mxu1 %vm604_vm3, %v13177_v18  ;;  %11322 = vmatmul.mubr.msk.bf16.vlgmr.msra.gmra.mrb[28].mxu0 %vm604_vm3, %v13177_v18 }
 0x17f   : > { %11326 = vmatpush3.bf16.msra.mxu1 %v12668_v6  ;;  %11342 = vmatpush3.bf16.msra.mxu0 %v12669_v7 }
 0x180   : > { %11327 = vmatprep.subr.bf16.mxu1 %v13022_v5  ;;  %11343 = vmatprep.subr.bf16.mxu0 %v13022_v5 }
 0x181   : > { %11329 = vmatprep.mubr.msk.bf16.mxu1 %vm13023_vm2, %v13022_v5  ;;  %11345 = vmatprep.mubr.msk.bf16.mxu0 %vm13023_vm2, %v13022_v5 }
 0x183   : > { %11328 = vmatpush3.bf16.msra.mxu1 %v12670_v8  ;;  %11344 = vmatpush3.bf16.msra.mxu0 %v12671_v9 }
 0x184   : > { %11333 = vmatprep.subr.bf16.mxu1 %v13022_v5  ;;  %11349 = vmatprep.subr.bf16.mxu0 %v13022_v5 }
 0x186   : > { %11330 = vmatmul.mubr.msk.bf16.vlgmr.msra.gmra.mrb[28].mxu1 %vm604_vm3, %v13175_v16  ;;  %11346 = vmatmul.mubr.msk.bf16.vlgmr.msra.gmra.mrb[32].mxu0 %vm604_vm3, %v13175_v16  ;;  %v504_v16 = vld [vmem:[%s13136_s14] sm:$0xff] }
 0x187   : > { %11334 = vmatpush3.bf16.msra.mxu1 %v12672_v10  ;;  %11350 = vmatpush3.bf16.msra.mxu0 %v12673_v11 }
 0x188   : > { %11335 = vmatprep.subr.bf16.mxu1 %v13022_v5  ;;  %11351 = vmatprep.subr.bf16.mxu0 %v13022_v5 }
 0x189   : > { %11337 = vmatprep.mubr.msk.bf16.mxu1 %vm13023_vm2, %v13022_v5  ;;  %11353 = vmatprep.mubr.msk.bf16.mxu0 %vm13023_vm2, %v13022_v5 }
 0x18b   : > { %11336 = vmatpush3.bf16.msra.mxu1 %v12674_v12  ;;  %11352 = vmatpush3.bf16.msra.mxu0 %v12675_v13 }
 0x18c   : > { %11363 = vmatprep.subr.bf16.mxu0 %v13022_v5 }
 0x192   : > { %11338 = vmatmul.mubr.msk.bf16.vlgmr.msra.gmra.mrb[28].mxu1 %vm604_vm3, %v13177_v18  ;;  %11354 = vmatmul.mubr.msk.bf16.vlgmr.msra.gmra.mrb[32].mxu0 %vm604_vm3, %v13177_v18  ;;  %v13554_v18 = vld [vmem:[%s15410_s2 + $0x10] sm:$0xff] }
 0x193   : > { %11359 = vmatprep.mubr.msk.bf16.mxu1 %vm525_vm1, %v13539_v14  ;;  %11367 = vmatprep.mubr.msk.bf16.mxu0 %vm13023_vm2, %v13022_v5 }
 0x194   : > { %11364 = vmatpush3.bf16.msra.mxu0 %v12676_v57 }
 0x195   : > { %11365 = vmatprep.subr.bf16.mxu0 %v13022_v5 }
 0x1d9   : > { %v698_v17 = vpop.f32.mrb[0].mxu1  ;;  %v818_v19 = vpop.f32.mrb[4].mxu0 }
 0x1da   : > { %v705_v21 = vmul.f32 %v698_v17, %v13548_v15  ;;  %v11115_v22 = vpop.f32.mrb[1].mxu1  ;;  %v11131_v23 = vpop.f32.mrb[5].mxu0  ;;  %v825_v29 = vmul.f32 %v13554_v18, %v818_v19  ;;  %v13626_v17 = vld [vmem:[%s15410_s2 + $0x60] sm:$0xff] }
 0x1db   : > { %v701_v25 = vpop.f32.mrb[2].mxu1  ;;  %v821_v27 = vpop.f32.mrb[6].mxu0  ;;  %v13636_v23 = vld [vmem:[%s15410_s2 + $0x68] sm:$0xff] }
 0x1dc   : > { %v707_v28 = vadd.f32 %v705_v21, %v504_v16  ;;  %v706_v30 = vmul.f32 %v701_v25, %v13559_v20  ;;  %v11116_v31 = vpop.f32.mrb[3].mxu1  ;;  %v11132_v32 = vpop.f32.mrb[7].mxu0  ;;  %v826_v35 = vmul.f32 %v13566_v26, %v821_v27  ;;  %v13631_v21 = vld [vmem:[%s15410_s2 + $0x70] sm:$0xff] }
 0x1de   : > { %v827_v33 = vadd.f32 %v825_v29, %v707_v28  ;;  %v708_v34 = vadd.f32 %v706_v30, %v505_v24  ;;  %v13642_v29 = vld [vmem:[%s15410_s2 + $0x78] sm:$0xff] }
 0x1e0   : > { %v828_v36 = vadd.f32 %v826_v35, %v708_v34 }
 0x1ed   : > { %v938_v38 = vpop.f32.mrb[4].mxu1  ;;  %v1058_v40 = vpop.f32.mrb[8].mxu0 }
 0x1ee   : > { %v945_v42 = vmul.f32 %v13574_v37, %v938_v38  ;;  %v11147_v43 = vpop.f32.mrb[5].mxu1  ;;  %v11163_v44 = vpop.f32.mrb[9].mxu0  ;;  %v1065_v49 = vmul.f32 %v13579_v39, %v1058_v40 }
 0x1ef   : > { %v941_v45 = vpop.f32.mrb[6].mxu1  ;;  %v1061_v47 = vpop.f32.mrb[10].mxu0 }
 0x1f0   : > { %v947_v48 = vadd.f32 %v945_v42, %v827_v33  ;;  %v946_v50 = vmul.f32 %v13584_v41, %v941_v45  ;;  %v11148_v51 = vpop.f32.mrb[7].mxu1  ;;  %v11164_v52 = vpop.f32.mrb[11].mxu0  ;;  %v1066_v55 = vmul.f32 %v13590_v46, %v1061_v47 }
 0x1f2   : > { %v1067_v53 = vadd.f32 %v1065_v49, %v947_v48  ;;  %v948_v54 = vadd.f32 %v946_v50, %v828_v36  ;;  %v9644_v48 = vld [vmem:[%s13136_s14 + $0x10] sm:$0xff] }
 0x1f4   : > { %v1068_v56 = vadd.f32 %v1066_v55, %v948_v54 }
 0x201   : > { %v1178_v59 = vpop.f32.mrb[8].mxu1  ;;  %v1298_v61 = vpop.f32.mrb[12].mxu0 }
 0x202   : > { %v1185_v63 = vmul.f32 %v13601_v58, %v1178_v59  ;;  %v11179_v0 = vpop.f32.mrb[9].mxu1  ;;  %v11195_v1 = vpop.f32.mrb[13].mxu0  ;;  %v1305_v7 = vmul.f32 %v13607_v60, %v1298_v61 }
 0x203   : > { %v1181_v2 = vpop.f32.mrb[10].mxu1  ;;  %v1301_v4 = vpop.f32.mrb[14].mxu0 }
 0x204   : > { %v1187_v6 = vadd.f32 %v1185_v63, %v1067_v53  ;;  %v1186_v8 = vmul.f32 %v13612_v62, %v1181_v2  ;;  %v11180_v9 = vpop.f32.mrb[11].mxu1  ;;  %v11196_v10 = vpop.f32.mrb[15].mxu0  ;;  %v1306_v13 = vmul.f32 %v13618_v3, %v1301_v4 }
 0x206   : > { %v1307_v11 = vadd.f32 %v1305_v7, %v1187_v6  ;;  %v1188_v12 = vadd.f32 %v1186_v8, %v1068_v56  ;;  %v9645_v56 = vld [vmem:[%s13136_s14 + $0x18] sm:$0xff] }
 0x208   : > { %v1308_v16 = vadd.f32 %v1306_v13, %v1188_v12  ;;  %v13656_v13 = vld [vmem:[#allocation2 + $0x8] sm:$0xff] }
 0x215   : > { %v1418_v19 = vpop.f32.mrb[12].mxu1  ;;  %v1538_v22 = vpop.f32.mrb[16].mxu0 }
 0x216   : > { %v1425_v24 = vmul.f32 %v13626_v17, %v1418_v19  ;;  %v11211_v25 = vpop.f32.mrb[13].mxu1  ;;  %v11227_v27 = vpop.f32.mrb[17].mxu0  ;;  %v1545_v32 = vmul.f32 %v13631_v21, %v1538_v22 }
 0x217   : > { %v1421_v28 = vpop.f32.mrb[14].mxu1  ;;  %v1541_v30 = vpop.f32.mrb[18].mxu0  ;;  %v12677_v25 = vld [vmem:[%s15413_s5 + $0x30] sm:$0xff]  }
 0x218   : > { %v1427_v31 = vadd.f32 %v1425_v24, %v1307_v11  ;;  %v1426_v33 = vmul.f32 %v13636_v23, %v1421_v28  ;;  %v11212_v34 = vpop.f32.mrb[15].mxu1  ;;  %v11228_v35 = vpop.f32.mrb[19].mxu0  ;;  %v1546_v40 = vmul.f32 %v13642_v29, %v1541_v30  ;;  %v13653_v11 = vld [vmem:[#allocation2] sm:$0xff] }
 0x21a   : > { %v1547_v36 = vadd.f32 %v1545_v32, %v1427_v31  ;;  %v1428_v38 = vadd.f32 %v1426_v33, %v1308_v16 }
 0x21c   : > { %v9760_v42 = vmul.f32 -1.442695, %v1547_v36  ;;  %v1548_v43 = vadd.f32 %v1546_v40, %v1428_v38  ;;  %v13669_v40 = vld [vmem:[%s15409_s1 + $0x8] sm:$0xff]  }
 0x21e   : > { %12900 = vpow2.f32 %v9760_v42  ;;  %v9761_v44 = vmul.f32 -1.442695, %v1548_v43 }
 0x220   : > { %12902 = vpow2.f32 %v9761_v44 }
 0x228   : > { %v12901_v45 = vpop.eup %12900 }
 0x229   : > { %v1555_v47 = vadd.f32 1.0, %v12901_v45  ;;  %v1669_v49 = vpop.f32.mrb[16].mxu1  ;;  %v1789_v50 = vpop.f32.mrb[20].mxu0 }
 0x22a   : > { %v12903_v51 = vpop.eup %12902  ;;  %v1676_v52 = vmul.f32 %v1669_v49, %v13548_v15  ;;  %v11243_v53 = vpop.f32.mrb[17].mxu1  ;;  %v1796_v63 = vmul.f32 %v13554_v18, %v1789_v50 }
 0x22b   : > { %v11259_v54 = vpop.f32.mrb[21].mxu0  ;;  %12904 = vrcp.f32 %v1555_v47  ;;  %v1556_v55 = vadd.f32 1.0, %v12903_v51  ;;  %v1672_v57 = vpop.f32.mrb[18].mxu1 }
 0x22c   : > { %v1792_v59 = vpop.f32.mrb[22].mxu0  ;;  %v1678_v61 = vadd.f32 %v9644_v48, %v1676_v52  ;;  %v1677_v0 = vmul.f32 %v1672_v57, %v13559_v20  ;;  %v11244_v1 = vpop.f32.mrb[19].mxu1 }
 0x22d   : > { %v11260_v2 = vpop.f32.mrb[23].mxu0  ;;  %12906 = vrcp.f32 %v1556_v55  ;;  %v1797_v7 = vmul.f32 %v13566_v26, %v1792_v59 }
 0x22e   : > { %v1798_v4 = vadd.f32 %v1796_v63, %v1678_v61  ;;  %v1679_v6 = vadd.f32 %v9645_v56, %v1677_v0 }
 0x230   : > { %v1799_v8 = vadd.f32 %v1797_v7, %v1679_v6 }
 0x235   : > { %v12905_v9 = vpop.eup %12904 }
 0x236   : > { %v2532_v12 = vmul.f32 %v13653_v11, %v12905_v9 }
 0x237   : > { %v12907_v10 = vpop.eup %12906 }
 0x238   : > { %v2533_v16 = vmul.f32 %v13656_v13, %v12907_v10 }
 0x23a   : > { %v2534_v19 = vpack.c.bf16 %v2533_v16, %v2532_v12 }
 0x23c   : > { %11357 = vmatprep.subr.bf16.mxu1 %v2534_v19 }
 0x23d   : > { %v1909_v22 = vpop.f32.mrb[20].mxu1  ;;  %v2029_v24 = vpop.f32.mrb[24].mxu0  ;;  %11358 = vmatpush3.bf16.msra.mxu1 %v2534_v19 }
 0x23e   : > { %v1916_v27 = vmul.f32 %v13574_v37, %v1909_v22  ;;  %v11275_v28 = vpop.f32.mrb[21].mxu1  ;;  %v11291_v30 = vpop.f32.mrb[25].mxu0  ;;  %11379 = vmatprep.subr.bf16.mxu1 %v13022_v5  ;;  %v2036_v34 = vmul.f32 %v13579_v39, %v2029_v24 }
 0x23f   : > { %v1912_v31 = vpop.f32.mrb[22].mxu1  ;;  %v2032_v32 = vpop.f32.mrb[26].mxu0 }
 0x240   : > { %v1918_v33 = vadd.f32 %v1916_v27, %v1798_v4  ;;  %v1917_v35 = vmul.f32 %v13584_v41, %v1912_v31  ;;  %v11276_v36 = vpop.f32.mrb[23].mxu1  ;;  %v11292_v38 = vpop.f32.mrb[27].mxu0  ;;  %11360 = vmatmul.mubr.msk.bf16.vlgmr.msra.gmra.mrb[32].mxu1 %vm525_vm1, %v13669_v40  ;;  %v2037_v44 = vmul.f32 %v13590_v46, %v2032_v32  ;;  %v12678_v31 = vld [vmem:[%s15413_s5 + $0x18] sm:$0xff]  }
 0x241   : > { %11380 = vmatpush3.bf16.msra.mxu1 %v12677_v25  ;;  %11383 = vmatprep.mubr.msk.bf16.mxu1 %vm13023_vm2, %v13022_v5  ;;  %v12679_v32 = vld [vmem:[%s15413_s5 + $0x38] sm:$0xff]   ;;  %v12680_v36 = vld [vmem:[%s15413_s5] sm:$0xff]  }
 0x242   : > { %v2038_v42 = vadd.f32 %v2036_v34, %v1918_v33  ;;  %v1919_v43 = vadd.f32 %v1917_v35, %v1799_v8  ;;  %11381 = vmatprep.subr.bf16.mxu1 %v13022_v5  ;;  %11366 = vmatpush3.bf16.msra.mxu0 %v12678_v31  ;;  %v12681_v38 = vld [vmem:[%s15413_s5 + $0x20] sm:$0xff]  }
 0x243   : > { %11371 = vmatprep.subr.bf16.mxu0 %v13022_v5 }
 0x244   : > { %v2039_v45 = vadd.f32 %v2037_v44, %v1919_v43 }
 0x245   : > { %11382 = vmatpush3.bf16.msra.mxu1 %v12679_v32 }
 0x246   : > { %11387 = vmatprep.subr.bf16.mxu1 %v13022_v5 }
 0x251   : > { %v2149_v47 = vpop.f32.mrb[24].mxu1  ;;  %v2269_v48 = vpop.f32.mrb[28].mxu0 }
 0x252   : > { %v2156_v49 = vmul.f32 %v13601_v58, %v2149_v47  ;;  %v11307_v50 = vpop.f32.mrb[25].mxu1  ;;  %v11323_v51 = vpop.f32.mrb[29].mxu0  ;;  %v2276_v55 = vmul.f32 %v13607_v60, %v2269_v48  ;;  %v12683_v47 = vld [vmem:[%s15413_s5 + $0x28] sm:$0xff]   ;;  %v12684_v48 = vld [vmem:[%s15413_s5 + $0x50] sm:$0xff]  }
 0x253   : > { %v2152_v52 = vpop.f32.mrb[26].mxu1  ;;  %v2272_v53 = vpop.f32.mrb[30].mxu0  ;;  %v12686_v50 = vld [vmem:[%s15413_s5 + $0x58] sm:$0xff]  }
 0x254   : > { %v2158_v54 = vadd.f32 %v2156_v49, %v2038_v42  ;;  %v2157_v56 = vmul.f32 %v13612_v62, %v2152_v52  ;;  %v11308_v57 = vpop.f32.mrb[27].mxu1  ;;  %v11324_v59 = vpop.f32.mrb[31].mxu0  ;;  %v2277_v0 = vmul.f32 %v13618_v3, %v2272_v53  ;;  %v12685_v49 = vld [vmem:[%s15413_s5 + $0x70] sm:$0xff]   ;;  %v12687_v51 = vld [vmem:[%s15413_s5 + $0x78] sm:$0xff]   ;;  %v12688_v52 = vld [vmem:[%s15413_s5 + $0x40] sm:$0xff]  }
 0x255   : > { %v12689_v53 = vld [vmem:[%s15413_s5 + $0x60] sm:$0xff]   ;;  %v12693_v57 = vld [vmem:[%s15413_s5 + $0xb0] sm:$0xff]   ;;  %v12694_v59 = vld [vmem:[%s15413_s5 + $0x98] sm:$0xff]  }
 0x256   : > { %v2278_v61 = vadd.f32 %v2276_v55, %v2158_v54  ;;  %v2159_v63 = vadd.f32 %v2157_v56, %v2039_v45  ;;  %v12682_v45 = vld [vmem:[%s15413_s5 + $0x8] sm:$0xff]   ;;  %v12692_v56 = vld [vmem:[%s15413_s5 + $0x90] sm:$0xff]  }
 0x257   : > { %v12690_v54 = vld [vmem:[%s15413_s5 + $0x48] sm:$0xff]  }
 0x258   : > { %v2279_v1 = vadd.f32 %v2277_v0, %v2159_v63  ;;  %v12691_v55 = vld [vmem:[%s15413_s5 + $0x68] sm:$0xff]   ;;  %v12696_v63 = vld [vmem:[%s15413_s5 + $0x80] sm:$0xff]  }
 0x259   : > { %v12697_v0 = vld [vmem:[%s15413_s5 + $0xa0] sm:$0xff]  }
 0x265   : > { %v2389_v2 = vpop.f32.mrb[28].mxu1  ;;  %v2509_v4 = vpop.f32.mrb[32].mxu0 }
 0x266   : > { %v2396_v6 = vmul.f32 %v13626_v17, %v2389_v2  ;;  %v11339_v7 = vpop.f32.mrb[29].mxu1  ;;  %v11355_v8 = vpop.f32.mrb[33].mxu0  ;;  %v2516_v16 = vmul.f32 %v13631_v21, %v2509_v4  ;;  %v12699_v2 = vld [vmem:[%s15413_s5 + $0xa8] sm:$0xff]   ;;  %v12700_v4 = vld [vmem:[%s15413_s5 + $0xd0] sm:$0xff]  }
 0x267   : > { %v2392_v9 = vpop.f32.mrb[30].mxu1  ;;  %v2512_v10 = vpop.f32.mrb[34].mxu0  ;;  %v12702_v7 = vld [vmem:[%s15413_s5 + $0xd8] sm:$0xff]  }
 0x268   : > { %v2398_v12 = vadd.f32 %v2396_v6, %v2278_v61  ;;  %v2397_v19 = vmul.f32 %v13636_v23, %v2392_v9  ;;  %v11340_v22 = vpop.f32.mrb[31].mxu1  ;;  %v11356_v24 = vpop.f32.mrb[35].mxu0  ;;  %v2517_v28 = vmul.f32 %v13642_v29, %v2512_v10  ;;  %v12695_v61 = vld [vmem:[%s15413_s5 + $0xb8] sm:$0xff]   ;;  %v12701_v6 = vld [vmem:[%s15413_s5 + $0xf0] sm:$0xff]   ;;  %v12704_v9 = vld [vmem:[%s15413_s5 + $0xc0] sm:$0xff]  }
 0x269   : > { %v12703_v8 = vld [vmem:[%s15413_s5 + $0xf8] sm:$0xff]   ;;  %v12705_v10 = vld [vmem:[%s15413_s5 + $0xe0] sm:$0xff]  }
 0x26a   : > { %v13684_v25 = vadd.f32 %v2516_v16, %v2398_v12  ;;  %v2399_v27 = vadd.f32 %v2397_v19, %v2279_v1  ;;  %v12698_v1 = vld [vmem:[%s15413_s5 + $0x88] sm:$0xff]   ;;  %v12708_v19 = vld [vmem:[%s15414_s6 + $0x10] sm:$0xff]   ;;  %v9646_v22 = vld [vmem:[%s13136_s14 + $0x20] sm:$0xff] }
 0x26b   : > { %v12706_v12 = vld [vmem:[%s15413_s5 + $0xc8] sm:$0xff]  }
 0x26c   : > { %v13687_v30 = vadd.f32 %v2517_v28, %v2399_v27  ;;  %v12707_v16 = vld [vmem:[%s15413_s5 + $0xe8] sm:$0xff]  }
 0x313   : > { %v11361_v33 = vpop.f32.mrb[32].mxu1 }
 0x314   : > { %v2569_v34 = vpop.f32.mrb[33].mxu1 }
 0x315   : > { %v11362_v35 = vpop.f32.mrb[34].mxu1 }
 0x316   : > { %v13703_v42 = vpack.c.bf16 %v11362_v35, %v11361_v33  ;;  %v2572_v43 = vpop.f32.mrb[35].mxu1  ;;  %v9647_v33 = vld [vmem:[%s13136_s14 + $0x28] sm:$0xff] }
 0x317   : > { %v13705_v44 = vpack.c.bf16 %v2572_v43, %v2569_v34 }
 0x318   : > { %11368 = vmatmul.mubr.msk.bf16.vlgmr.msra.gmra.mrb[36].mxu0 %vm604_vm3, %v13703_v42  ;;  %11384 = vmatmul.mubr.msk.bf16.vlgmr.msra.gmra.mrb[36].mxu1 %vm604_vm3, %v13703_v42 }
 0x319   : > { %11372 = vmatpush3.bf16.msra.mxu0 %v12680_v36  ;;  %11388 = vmatpush3.bf16.msra.mxu1 %v12681_v38 }
 0x31a   : > { %11373 = vmatprep.subr.bf16.mxu0 %v13022_v5  ;;  %11389 = vmatprep.subr.bf16.mxu1 %v13022_v5 }
 0x31b   : > { %11375 = vmatprep.mubr.msk.bf16.mxu0 %vm13023_vm2, %v13022_v5  ;;  %11391 = vmatprep.mubr.msk.bf16.mxu1 %vm13023_vm2, %v13022_v5 }
 0x31d   : > { %11374 = vmatpush3.bf16.msra.mxu0 %v12682_v45  ;;  %11390 = vmatpush3.bf16.msra.mxu1 %v12683_v47 }
 0x31e   : > { %11395 = vmatprep.subr.bf16.mxu0 %v13022_v5  ;;  %11411 = vmatprep.subr.bf16.mxu1 %v13022_v5 }
 0x324   : > { %11376 = vmatmul.mubr.msk.bf16.vlgmr.msra.gmra.mrb[36].mxu0 %vm604_vm3, %v13705_v44  ;;  %11392 = vmatmul.mubr.msk.bf16.vlgmr.msra.gmra.mrb[36].mxu1 %vm604_vm3, %v13705_v44 }
 0x325   : > { %11396 = vmatpush3.bf16.msra.mxu0 %v12684_v48  ;;  %11412 = vmatpush3.bf16.msra.mxu1 %v12685_v49 }
 0x326   : > { %11397 = vmatprep.subr.bf16.mxu0 %v13022_v5  ;;  %11413 = vmatprep.subr.bf16.mxu1 %v13022_v5 }
 0x327   : > { %11399 = vmatprep.mubr.msk.bf16.mxu0 %vm13023_vm2, %v13022_v5  ;;  %11415 = vmatprep.mubr.msk.bf16.mxu1 %vm13023_vm2, %v13022_v5 }
 0x329   : > { %11398 = vmatpush3.bf16.msra.mxu0 %v12686_v50  ;;  %11414 = vmatpush3.bf16.msra.mxu1 %v12687_v51 }
 0x32a   : > { %11403 = vmatprep.subr.bf16.mxu0 %v13022_v5  ;;  %11419 = vmatprep.subr.bf16.mxu1 %v13022_v5 }
 0x32c   : > { %11400 = vmatmul.mubr.msk.bf16.vlgmr.msra.gmra.mrb[40].mxu0 %vm604_vm3, %v13703_v42  ;;  %11416 = vmatmul.mubr.msk.bf16.vlgmr.msra.gmra.mrb[40].mxu1 %vm604_vm3, %v13703_v42 }
 0x32d   : > { %11404 = vmatpush3.bf16.msra.mxu0 %v12688_v52  ;;  %11420 = vmatpush3.bf16.msra.mxu1 %v12689_v53 }
 0x32e   : > { %11405 = vmatprep.subr.bf16.mxu0 %v13022_v5  ;;  %11421 = vmatprep.subr.bf16.mxu1 %v13022_v5 }
 0x32f   : > { %11407 = vmatprep.mubr.msk.bf16.mxu0 %vm13023_vm2, %v13022_v5  ;;  %11423 = vmatprep.mubr.msk.bf16.mxu1 %vm13023_vm2, %v13022_v5 }
 0x331   : > { %11406 = vmatpush3.bf16.msra.mxu0 %v12690_v54  ;;  %11422 = vmatpush3.bf16.msra.mxu1 %v12691_v55 }
 0x332   : > { %11427 = vmatprep.subr.bf16.mxu0 %v13022_v5  ;;  %11443 = vmatprep.subr.bf16.mxu1 %v13022_v5 }
 0x338   : > { %11408 = vmatmul.mubr.msk.bf16.vlgmr.msra.gmra.mrb[40].mxu0 %vm604_vm3, %v13705_v44  ;;  %11424 = vmatmul.mubr.msk.bf16.vlgmr.msra.gmra.mrb[40].mxu1 %vm604_vm3, %v13705_v44 }
 0x339   : > { %11428 = vmatpush3.bf16.msra.mxu0 %v12692_v56  ;;  %11444 = vmatpush3.bf16.msra.mxu1 %v12693_v57 }
 0x33a   : > { %11429 = vmatprep.subr.bf16.mxu0 %v13022_v5  ;;  %11445 = vmatprep.subr.bf16.mxu1 %v13022_v5 }
 0x33b   : > { %11431 = vmatprep.mubr.msk.bf16.mxu0 %vm13023_vm2, %v13022_v5  ;;  %11447 = vmatprep.mubr.msk.bf16.mxu1 %vm13023_vm2, %v13022_v5 }
 0x33d   : > { %11430 = vmatpush3.bf16.msra.mxu0 %v12694_v59  ;;  %11446 = vmatpush3.bf16.msra.mxu1 %v12695_v61 }
 0x33e   : > { %11435 = vmatprep.subr.bf16.mxu0 %v13022_v5  ;;  %11451 = vmatprep.subr.bf16.mxu1 %v13022_v5 }
 0x340   : > { %11432 = vmatmul.mubr.msk.bf16.vlgmr.msra.gmra.mrb[44].mxu0 %vm604_vm3, %v13703_v42  ;;  %11448 = vmatmul.mubr.msk.bf16.vlgmr.msra.gmra.mrb[44].mxu1 %vm604_vm3, %v13703_v42 }
 0x341   : > { %11436 = vmatpush3.bf16.msra.mxu0 %v12696_v63  ;;  %11452 = vmatpush3.bf16.msra.mxu1 %v12697_v0 }
 0x342   : > { %11437 = vmatprep.subr.bf16.mxu0 %v13022_v5  ;;  %11453 = vmatprep.subr.bf16.mxu1 %v13022_v5 }
 0x343   : > { %11439 = vmatprep.mubr.msk.bf16.mxu0 %vm13023_vm2, %v13022_v5  ;;  %11455 = vmatprep.mubr.msk.bf16.mxu1 %vm13023_vm2, %v13022_v5 }
 0x345   : > { %11438 = vmatpush3.bf16.msra.mxu0 %v12698_v1  ;;  %11454 = vmatpush3.bf16.msra.mxu1 %v12699_v2 }
 0x346   : > { %11459 = vmatprep.subr.bf16.mxu0 %v13022_v5  ;;  %11475 = vmatprep.subr.bf16.mxu1 %v13022_v5 }
 0x34c   : > { %11440 = vmatmul.mubr.msk.bf16.vlgmr.msra.gmra.mrb[44].mxu0 %vm604_vm3, %v13705_v44  ;;  %11456 = vmatmul.mubr.msk.bf16.vlgmr.msra.gmra.mrb[44].mxu1 %vm604_vm3, %v13705_v44 }
 0x34d   : > { %11460 = vmatpush3.bf16.msra.mxu0 %v12700_v4  ;;  %11476 = vmatpush3.bf16.msra.mxu1 %v12701_v6  ;;  %v9870_v6 = vmul.f32 -1.442695, %v13684_v25 }
 0x34e   : > { %11461 = vmatprep.subr.bf16.mxu0 %v13022_v5  ;;  %11477 = vmatprep.subr.bf16.mxu1 %v13022_v5 }
 0x34f   : > { %11463 = vmatprep.mubr.msk.bf16.mxu0 %vm13023_vm2, %v13022_v5  ;;  %11479 = vmatprep.mubr.msk.bf16.mxu1 %vm13023_vm2, %v13022_v5  ;;  %12908 = vpow2.f32 %v9870_v6  ;;  %v12720_v6 = vld [vmem:[%s15414_s6 + $0x40] sm:$0xff]  }
 0x351   : > { %11462 = vmatpush3.bf16.msra.mxu0 %v12702_v7  ;;  %11478 = vmatpush3.bf16.msra.mxu1 %v12703_v8 }
 0x352   : > { %11467 = vmatprep.subr.bf16.mxu0 %v13022_v5  ;;  %11483 = vmatprep.subr.bf16.mxu1 %v13022_v5 }
 0x354   : > { %11464 = vmatmul.mubr.msk.bf16.vlgmr.msra.gmra.mrb[48].mxu0 %vm604_vm3, %v13703_v42  ;;  %11480 = vmatmul.mubr.msk.bf16.vlgmr.msra.gmra.mrb[48].mxu1 %vm604_vm3, %v13703_v42 }
 0x355   : > { %11468 = vmatpush3.bf16.msra.mxu0 %v12704_v9  ;;  %11484 = vmatpush3.bf16.msra.mxu1 %v12705_v10 }
 0x356   : > { %11469 = vmatprep.subr.bf16.mxu0 %v13022_v5  ;;  %11485 = vmatprep.subr.bf16.mxu1 %v13022_v5 }
 0x357   : > { %11471 = vmatprep.mubr.msk.bf16.mxu0 %vm13023_vm2, %v13022_v5  ;;  %11487 = vmatprep.mubr.msk.bf16.mxu1 %vm13023_vm2, %v13022_v5 }
 0x359   : > { %11470 = vmatpush3.bf16.msra.mxu0 %v12706_v12  ;;  %11486 = vmatpush3.bf16.msra.mxu1 %v12707_v16 }
 0x35a   : > { %11497 = vmatprep.subr.bf16.mxu1 %v13022_v5 }
 0x360   : > { %11472 = vmatmul.mubr.msk.bf16.vlgmr.msra.gmra.mrb[48].mxu0 %vm604_vm3, %v13705_v44  ;;  %11488 = vmatmul.mubr.msk.bf16.vlgmr.msra.gmra.mrb[48].mxu1 %vm604_vm3, %v13705_v44 }
 0x361   : > { %11493 = vmatprep.mubr.msk.bf16.mxu0 %vm525_vm1, %v13539_v14  ;;  %11501 = vmatprep.mubr.msk.bf16.mxu1 %vm13023_vm2, %v13022_v5 }
 0x362   : > { %11498 = vmatpush3.bf16.msra.mxu1 %v12708_v19 }
 0x363   : > { %11499 = vmatprep.subr.bf16.mxu1 %v13022_v5 }
 0x3f7   : > { %v2700_v24 = vpop.f32.mrb[36].mxu0  ;;  %v2820_v27 = vpop.f32.mrb[36].mxu1 }
 0x3f8   : > { %v2707_v28 = vmul.f32 %v2700_v24, %v13548_v15  ;;  %v11377_v31 = vpop.f32.mrb[37].mxu0  ;;  %v11393_v32 = vpop.f32.mrb[37].mxu1  ;;  %v2827_v36 = vmul.f32 %v13554_v18, %v2820_v27 }
 0x3f9   : > { %v2703_v34 = vpop.f32.mrb[38].mxu0  ;;  %v2823_v14 = vpop.f32.mrb[38].mxu1 }
 0x3fa   : > { %v2709_v35 = vadd.f32 %v9646_v22, %v2707_v28  ;;  %v2708_v38 = vmul.f32 %v2703_v34, %v13559_v20  ;;  %v11378_v42 = vpop.f32.mrb[39].mxu0  ;;  %v11394_v43 = vpop.f32.mrb[39].mxu1  ;;  %v2828_v47 = vmul.f32 %v13566_v26, %v2823_v14 }
 0x3fb   : > { %v12909_v24 = vpop.eup %12908 }
 0x3fc   : > { %v2829_v44 = vadd.f32 %v2827_v36, %v2709_v35  ;;  %v2710_v45 = vadd.f32 %v9647_v33, %v2708_v38  ;;  %v2526_v27 = vadd.f32 1.0, %v12909_v24  ;;  %v12733_v24 = vld [vmem:[%s15414_s6 + $0xf0] sm:$0xff]  }
 0x3fe   : > { %v2830_v48 = vadd.f32 %v2828_v47, %v2710_v45 }
 0x40b   : > { %v2940_v49 = vpop.f32.mrb[40].mxu0  ;;  %v3060_v50 = vpop.f32.mrb[40].mxu1 }
 0x40c   : > { %v2947_v15 = vmul.f32 %v13574_v37, %v2940_v49  ;;  %v11409_v51 = vpop.f32.mrb[41].mxu0  ;;  %v11425_v52 = vpop.f32.mrb[41].mxu1  ;;  %v3067_v18 = vmul.f32 %v13579_v39, %v3060_v50 }
 0x40d   : > { %v2943_v53 = vpop.f32.mrb[42].mxu0  ;;  %v3063_v54 = vpop.f32.mrb[42].mxu1 }
 0x40e   : > { %v2949_v55 = vadd.f32 %v2947_v15, %v2829_v44  ;;  %v2948_v20 = vmul.f32 %v13584_v41, %v2943_v53  ;;  %v11410_v56 = vpop.f32.mrb[43].mxu0  ;;  %v11426_v57 = vpop.f32.mrb[43].mxu1  ;;  %v3068_v26 = vmul.f32 %v13590_v46, %v3063_v54  ;;  %v9871_v46 = vmul.f32 -1.442695, %v13687_v30 }
 0x40f   : > { %v12712_v56 = vld [vmem:[%s15414_s6] sm:$0xff]  }
 0x410   : > { %v3069_v59 = vadd.f32 %v3067_v18, %v2949_v55  ;;  %v2950_v61 = vadd.f32 %v2948_v20, %v2830_v48  ;;  %12910 = vpow2.f32 %v9871_v46  ;;  %v12709_v55 = vld [vmem:[%s15414_s6 + $0x30] sm:$0xff]   ;;  %v12713_v57 = vld [vmem:[%s15414_s6 + $0x20] sm:$0xff]  }
 0x411   : > { %12912 = vrcp.f32 %v2526_v27  ;;  %v12728_v46 = vld [vmem:[%s15414_s6 + $0x80] sm:$0xff]   ;;  %v12735_v27 = vld [vmem:[%s15414_s6 + $0xf8] sm:$0xff]  }
 0x412   : > { %v3070_v63 = vadd.f32 %v3068_v26, %v2950_v61 }
 0x41a   : > { %v12911_v25 = vpop.eup %12910 }
 0x41b   : > { %v2527_v32 = vadd.f32 1.0, %v12911_v25  ;;  %v12734_v25 = vld [vmem:[%s15414_s6 + $0xd8] sm:$0xff]  }
 0x41d   : > { %12914 = vrcp.f32 %v2527_v32  ;;  %v12738_v32 = vld [vmem:[%s15414_s6 + $0xc8] sm:$0xff]  }
 0x41f   : > { %v3180_v0 = vpop.f32.mrb[44].mxu0  ;;  %v3300_v1 = vpop.f32.mrb[44].mxu1 }
 0x420   : > { %v3187_v37 = vmul.f32 %v13601_v58, %v3180_v0  ;;  %v11441_v2 = vpop.f32.mrb[45].mxu0  ;;  %v11457_v4 = vpop.f32.mrb[45].mxu1  ;;  %v3307_v41 = vmul.f32 %v13607_v60, %v3300_v1  ;;  %v12715_v0 = vld [vmem:[%s15414_s6 + $0x28] sm:$0xff]   ;;  %v12716_v1 = vld [vmem:[%s15414_s6 + $0x50] sm:$0xff]  }
 0x421   : > { %v3183_v7 = vpop.f32.mrb[46].mxu0  ;;  %v3303_v8 = vpop.f32.mrb[46].mxu1  ;;  %v12718_v2 = vld [vmem:[%s15414_s6 + $0x58] sm:$0xff]  }
 0x422   : > { %v3189_v39 = vadd.f32 %v3187_v37, %v3069_v59  ;;  %v3188_v9 = vmul.f32 %v13612_v62, %v3183_v7  ;;  %v11442_v10 = vpop.f32.mrb[47].mxu0  ;;  %v11458_v12 = vpop.f32.mrb[47].mxu1  ;;  %v3308_v22 = vmul.f32 %v13618_v3, %v3303_v8  ;;  %v12717_v37 = vld [vmem:[%s15414_s6 + $0x70] sm:$0xff]   ;;  %v12719_v4 = vld [vmem:[%s15414_s6 + $0x78] sm:$0xff]   ;;  %v12721_v7 = vld [vmem:[%s15414_s6 + $0x60] sm:$0xff]  }
 0x423   : > { %v12722_v8 = vld [vmem:[%s15414_s6 + $0x48] sm:$0xff]   ;;  %v12726_v10 = vld [vmem:[%s15414_s6 + $0x98] sm:$0xff]  }
 0x424   : > { %v3309_v16 = vadd.f32 %v3307_v41, %v3189_v39  ;;  %v3190_v19 = vadd.f32 %v3188_v9, %v3070_v63  ;;  %v12714_v63 = vld [vmem:[%s15414_s6 + $0x8] sm:$0xff]   ;;  %v12724_v41 = vld [vmem:[%s15414_s6 + $0x90] sm:$0xff]   ;;  %v12727_v12 = vld [vmem:[%s15414_s6 + $0xb8] sm:$0xff]  }
 0x425   : > { %v12723_v39 = vld [vmem:[%s15414_s6 + $0x68] sm:$0xff]   ;;  %v12725_v9 = vld [vmem:[%s15414_s6 + $0xb0] sm:$0xff]  }
 0x426   : > { %v3310_v58 = vadd.f32 %v3308_v22, %v3190_v19  ;;  %v12730_v19 = vld [vmem:[%s15414_s6 + $0x88] sm:$0xff]  }
 0x427   : > { %v12731_v22 = vld [vmem:[%s15414_s6 + $0xa8] sm:$0xff]  }
 0x433   : > { %v3420_v28 = vpop.f32.mrb[48].mxu0  ;;  %v3540_v31 = vpop.f32.mrb[48].mxu1 }
 0x434   : > { %v3427_v60 = vmul.f32 %v13626_v17, %v3420_v28  ;;  %v11473_v62 = vpop.f32.mrb[49].mxu0  ;;  %v11489_v33 = vpop.f32.mrb[49].mxu1  ;;  %v3547_v35 = vmul.f32 %v13631_v21, %v3540_v31  ;;  %v12736_v28 = vld [vmem:[%s15414_s6 + $0xc0] sm:$0xff]  }
 0x435   : > { %v3423_v34 = vpop.f32.mrb[50].mxu0  ;;  %v3543_v14 = vpop.f32.mrb[50].mxu1  ;;  %v12737_v31 = vld [vmem:[%s15414_s6 + $0xe0] sm:$0xff]   ;;  %v12740_v62 = vld [vmem:[%s15415_s7 + $0x10] sm:$0xff]  }
 0x436   : > { %v3429_v30 = vadd.f32 %v3427_v60, %v3309_v16  ;;  %v3428_v3 = vmul.f32 %v13636_v23, %v3423_v34  ;;  %v11474_v36 = vpop.f32.mrb[51].mxu0  ;;  %v11490_v38 = vpop.f32.mrb[51].mxu1  ;;  %v3548_v44 = vmul.f32 %v13642_v29, %v3543_v14  ;;  %v12729_v16 = vld [vmem:[%s15414_s6 + $0xa0] sm:$0xff]   ;;  %v12739_v60 = vld [vmem:[%s15414_s6 + $0xe8] sm:$0xff]   ;;  %v12741_v33 = vld [vmem:[%s15415_s7 + $0x30] sm:$0xff]  }
 0x437   : > { %v12913_v17 = vpop.eup %12912  ;;  %v12742_v34 = vld [vmem:[%s15415_s7 + $0x18] sm:$0xff]   ;;  %v12747_v36 = vld [vmem:[%s15415_s7 + $0x28] sm:$0xff]   ;;  %v12748_v38 = vld [vmem:[%s15415_s7 + $0x50] sm:$0xff]  }
 0x438   : > { %v3549_v42 = vadd.f32 %v3547_v35, %v3429_v30  ;;  %v3430_v43 = vadd.f32 %v3428_v3, %v3310_v58  ;;  %v12915_v47 = vpop.eup %12914  ;;  %v3555_v48 = vsub.f32 1.0, %v12913_v17  ;;  %v3553_v50 = vmul.f32 %v13653_v11, %v12913_v17  ;;  %v12710_v11 = vld [vmem:[%s15414_s6 + $0x18] sm:$0xff]   ;;  %v12732_v58 = vld [vmem:[%s15414_s6 + $0xd0] sm:$0xff]   ;;  %v12744_v30 = vld [vmem:[%s15415_s7] sm:$0xff]  }
 0x439   : > { %v3556_v15 = vsub.f32 1.0, %v12915_v47  ;;  %v3554_v23 = vmul.f32 %v13656_v13, %v12915_v47  ;;  %v12711_v13 = vld [vmem:[%s15414_s6 + $0x38] sm:$0xff]   ;;  %11500 = vmatpush3.bf16.msra.mxu1 %v12710_v11  ;;  %v12745_v35 = vld [vmem:[%s15415_s7 + $0x20] sm:$0xff]   ;;  %v12746_v3 = vld [vmem:[%s15415_s7 + $0x8] sm:$0xff]  }
 0x43a   : > { %12916 = vtanh.f32 %v3549_v42  ;;  %v3550_v45 = vadd.f32 %v3548_v44, %v3430_v43  ;;  %11505 = vmatprep.subr.bf16.mxu1 %v13022_v5  ;;  %v12743_v14 = vld [vmem:[%s15415_s7 + $0x38] sm:$0xff]   ;;  %v12749_v42 = vld [vmem:[%s15415_s7 + $0x70] sm:$0xff]   ;;  %v12753_v17 = vld [vmem:[%s15415_s7 + $0x60] sm:$0xff]  }
 0x43b   : > { %v12750_v43 = vld [vmem:[%s15415_s7 + $0x58] sm:$0xff]   ;;  %v12754_v47 = vld [vmem:[%s15415_s7 + $0x48] sm:$0xff]  }
 0x43c   : > { %12918 = vtanh.f32 %v3550_v45  ;;  %v12751_v44 = vld [vmem:[%s15415_s7 + $0x78] sm:$0xff]   ;;  %v12752_v45 = vld [vmem:[%s15415_s7 + $0x40] sm:$0xff]  }
 0x43d   : > { %v12767_v11 = vld [vmem:[%s15415_s7 + $0xf8] sm:$0xff]  }
 0x444   : > { %v12917_v49 = vpop.eup %12916 }
 0x445   : > { %v3557_v21 = vmul.f32 %v12917_v49, %v3555_v48  ;;  %v12755_v48 = vld [vmem:[%s15415_s7 + $0x68] sm:$0xff]   ;;  %v12756_v49 = vld [vmem:[%s15415_s7 + $0x90] sm:$0xff]  }
 0x446   : > { %v12919_v51 = vpop.eup %12918 }
 0x447   : > { %v3558_v52 = vmul.f32 %v12919_v51, %v3556_v15  ;;  %v3559_v53 = vadd.f32 %v3557_v21, %v3553_v50  ;;  %v12757_v50 = vld [vmem:[%s15415_s7 + $0xb0] sm:$0xff]   ;;  %v12758_v15 = vld [vmem:[%s15415_s7 + $0x98] sm:$0xff]   ;;  %v12760_v51 = vld [vmem:[%s15415_s7 + $0x80] sm:$0xff]  }
 0x448   : > { %v12759_v21 = vld [vmem:[%s15415_s7 + $0xb8] sm:$0xff]  }
 0x449   : > { %v3560_v54 = vadd.f32 %v3558_v52, %v3554_v23  ;;  %3561 = vst.msk [vmem:[#allocation2] sm:$0xff] %vm604_vm3, %v3559_v53  ;;  %v12761_v23 = vld [vmem:[%s15415_s7 + $0xa0] sm:$0xff]   ;;  %v12762_v52 = vld [vmem:[%s15415_s7 + $0x88] sm:$0xff]  }
 0x44b   : > { %3562 = vst.msk [vmem:[#allocation2 + $0x8] sm:$0xff] %vm604_vm3, %v3560_v54  ;;  %v3563_v29 = vpack.c.bf16 %v3560_v54, %v3559_v53  ;;  %v12763_v53 = vld [vmem:[%s15415_s7 + $0xa8] sm:$0xff]   ;;  %v12764_v54 = vld [vmem:[%s15415_s7 + $0xd0] sm:$0xff]  }
 0x44d   : > { %11491 = vmatprep.subr.bf16.mxu0 %v3563_v29 }
 0x44e   : > { %11492 = vmatpush3.bf16.msra.mxu0 %v3563_v29  ;;  %v12765_v29 = vld [vmem:[%s15415_s7 + $0xf0] sm:$0xff]  }
 0x44f   : > { %11513 = vmatprep.subr.bf16.mxu0 %v13022_v5 }
 0x451   : > { %11494 = vmatmul.mubr.msk.bf16.vlgmr.msra.gmra.mrb[52].mxu0 %vm525_vm1, %v13669_v40 }
 0x452   : > { %11514 = vmatpush3.bf16.msra.mxu0 %v12709_v55  ;;  %11517 = vmatprep.mubr.msk.bf16.mxu0 %vm13023_vm2, %v13022_v5  ;;  %v12766_v55 = vld [vmem:[%s15415_s7 + $0xd8] sm:$0xff]  }
 0x453   : > { %11515 = vmatprep.subr.bf16.mxu0 %v13022_v5 }
 0x456   : > { %11516 = vmatpush3.bf16.msra.mxu0 %v12711_v13  ;;  %v12768_v13 = vld [vmem:[%s15415_s7 + $0xc0] sm:$0xff]  }
 0x457   : > { %11521 = vmatprep.subr.bf16.mxu0 %v13022_v5 }
 0x524   : > { %v11495_v40 = vpop.f32.mrb[52].mxu0 }
 0x525   : > { %v3598_v18 = vpop.f32.mrb[53].mxu0 }
 0x526   : > { %v11496_v20 = vpop.f32.mrb[54].mxu0 }
 0x527   : > { %v13927_v59 = vpack.c.bf16 %v11496_v20, %v11495_v40  ;;  %v3601_v61 = vpop.f32.mrb[55].mxu0  ;;  %v12769_v40 = vld [vmem:[%s15415_s7 + $0xe0] sm:$0xff]   ;;  %v12771_v20 = vld [vmem:[%s15415_s7 + $0xe8] sm:$0xff]  }
 0x528   : > { %v13929_v26 = vpack.c.bf16 %v3601_v61, %v3598_v18  ;;  %v12770_v18 = vld [vmem:[%s15415_s7 + $0xc8] sm:$0xff]   ;;  %v12774_v61 = vld [vmem:[%s15416_s8 + $0x18] sm:$0xff]  }
 0x529   : > { %11502 = vmatmul.mubr.msk.bf16.vlgmr.msra.gmra.mrb[52].mxu1 %vm604_vm3, %v13927_v59  ;;  %11518 = vmatmul.mubr.msk.bf16.vlgmr.msra.gmra.mrb[56].mxu0 %vm604_vm3, %v13927_v59 }
 0x52a   : > { %11506 = vmatpush3.bf16.msra.mxu1 %v12712_v56  ;;  %11522 = vmatpush3.bf16.msra.mxu0 %v12713_v57  ;;  %v12772_v56 = vld [vmem:[%s15416_s8 + $0x10] sm:$0xff]  }
 0x52b   : > { %11507 = vmatprep.subr.bf16.mxu1 %v13022_v5  ;;  %11523 = vmatprep.subr.bf16.mxu0 %v13022_v5  ;;  %v12773_v57 = vld [vmem:[%s15416_s8 + $0x30] sm:$0xff]  }
 0x52c   : > { %11509 = vmatprep.mubr.msk.bf16.mxu1 %vm13023_vm2, %v13022_v5  ;;  %11525 = vmatprep.mubr.msk.bf16.mxu0 %vm13023_vm2, %v13022_v5 }
 0x52e   : > { %11508 = vmatpush3.bf16.msra.mxu1 %v12714_v63  ;;  %11524 = vmatpush3.bf16.msra.mxu0 %v12715_v0  ;;  %v12775_v63 = vld [vmem:[%s15416_s8 + $0x38] sm:$0xff]   ;;  %v12776_v0 = vld [vmem:[%s15416_s8] sm:$0xff]  }
 0x52f   : > { %11529 = vmatprep.subr.bf16.mxu1 %v13022_v5  ;;  %11545 = vmatprep.subr.bf16.mxu0 %v13022_v5 }
 0x535   : > { %11510 = vmatmul.mubr.msk.bf16.vlgmr.msra.gmra.mrb[52].mxu1 %vm604_vm3, %v13929_v26  ;;  %11526 = vmatmul.mubr.msk.bf16.vlgmr.msra.gmra.mrb[56].mxu0 %vm604_vm3, %v13929_v26 }
 0x536   : > { %11530 = vmatpush3.bf16.msra.mxu1 %v12716_v1  ;;  %11546 = vmatpush3.bf16.msra.mxu0 %v12717_v37  ;;  %v12777_v1 = vld [vmem:[%s15416_s8 + $0x20] sm:$0xff]   ;;  %v12778_v37 = vld [vmem:[%s15416_s8 + $0x8] sm:$0xff]  }
 0x537   : > { %11531 = vmatprep.subr.bf16.mxu1 %v13022_v5  ;;  %11547 = vmatprep.subr.bf16.mxu0 %v13022_v5 }
 0x538   : > { %11533 = vmatprep.mubr.msk.bf16.mxu1 %vm13023_vm2, %v13022_v5  ;;  %11549 = vmatprep.mubr.msk.bf16.mxu0 %vm13023_vm2, %v13022_v5 }
 0x53a   : > { %11532 = vmatpush3.bf16.msra.mxu1 %v12718_v2  ;;  %11548 = vmatpush3.bf16.msra.mxu0 %v12719_v4  ;;  %v12779_v2 = vld [vmem:[%s15416_s8 + $0x28] sm:$0xff]   ;;  %v12780_v4 = vld [vmem:[%s15416_s8 + $0x50] sm:$0xff]  }
 0x53b   : > { %11537 = vmatprep.subr.bf16.mxu1 %v13022_v5  ;;  %11553 = vmatprep.subr.bf16.mxu0 %v13022_v5 }
 0x53d   : > { %11534 = vmatmul.mubr.msk.bf16.vlgmr.msra.gmra.mrb[56].mxu1 %vm604_vm3, %v13927_v59  ;;  %11550 = vmatmul.mubr.msk.bf16.vlgmr.msra.gmra.mrb[60].mxu0 %vm604_vm3, %v13927_v59 }
 0x53e   : > { %11538 = vmatpush3.bf16.msra.mxu1 %v12720_v6  ;;  %11554 = vmatpush3.bf16.msra.mxu0 %v12721_v7  ;;  %v12781_v6 = vld [vmem:[%s15416_s8 + $0x70] sm:$0xff]   ;;  %v12782_v7 = vld [vmem:[%s15416_s8 + $0x58] sm:$0xff]  }
 0x53f   : > { %11539 = vmatprep.subr.bf16.mxu1 %v13022_v5  ;;  %11555 = vmatprep.subr.bf16.mxu0 %v13022_v5 }
 0x540   : > { %11541 = vmatprep.mubr.msk.bf16.mxu1 %vm13023_vm2, %v13022_v5  ;;  %11557 = vmatprep.mubr.msk.bf16.mxu0 %vm13023_vm2, %v13022_v5 }
 0x542   : > { %11540 = vmatpush3.bf16.msra.mxu1 %v12722_v8  ;;  %11556 = vmatpush3.bf16.msra.mxu0 %v12723_v39  ;;  %v12783_v8 = vld [vmem:[%s15416_s8 + $0x78] sm:$0xff]   ;;  %v12784_v39 = vld [vmem:[%s15416_s8 + $0x40] sm:$0xff]  }
 0x543   : > { %11561 = vmatprep.subr.bf16.mxu1 %v13022_v5  ;;  %11577 = vmatprep.subr.bf16.mxu0 %v13022_v5 }
 0x549   : > { %11542 = vmatmul.mubr.msk.bf16.vlgmr.msra.gmra.mrb[56].mxu1 %vm604_vm3, %v13929_v26  ;;  %11558 = vmatmul.mubr.msk.bf16.vlgmr.msra.gmra.mrb[60].mxu0 %vm604_vm3, %v13929_v26 }
 0x54a   : > { %11562 = vmatpush3.bf16.msra.mxu1 %v12724_v41  ;;  %11578 = vmatpush3.bf16.msra.mxu0 %v12725_v9  ;;  %v12785_v41 = vld [vmem:[%s15416_s8 + $0x60] sm:$0xff]   ;;  %v12786_v9 = vld [vmem:[%s15416_s8 + $0x48] sm:$0xff]  }
 0x54b   : > { %11563 = vmatprep.subr.bf16.mxu1 %v13022_v5  ;;  %11579 = vmatprep.subr.bf16.mxu0 %v13022_v5 }
 0x54c   : > { %11565 = vmatprep.mubr.msk.bf16.mxu1 %vm13023_vm2, %v13022_v5  ;;  %11581 = vmatprep.mubr.msk.bf16.mxu0 %vm13023_vm2, %v13022_v5 }
 0x54e   : > { %11564 = vmatpush3.bf16.msra.mxu1 %v12726_v10  ;;  %11580 = vmatpush3.bf16.msra.mxu0 %v12727_v12  ;;  %v12787_v10 = vld [vmem:[%s15416_s8 + $0x68] sm:$0xff]   ;;  %v12788_v12 = vld [vmem:[%s15416_s8 + $0x90] sm:$0xff]  }
 0x54f   : > { %11569 = vmatprep.subr.bf16.mxu1 %v13022_v5  ;;  %11585 = vmatprep.subr.bf16.mxu0 %v13022_v5 }
 0x551   : > { %11566 = vmatmul.mubr.msk.bf16.vlgmr.msra.gmra.mrb[60].mxu1 %vm604_vm3, %v13927_v59  ;;  %11582 = vmatmul.mubr.msk.bf16.vlgmr.msra.gmra.mrb[64].mxu0 %vm604_vm3, %v13927_v59 }
 0x552   : > { %11570 = vmatpush3.bf16.msra.mxu1 %v12728_v46  ;;  %11586 = vmatpush3.bf16.msra.mxu0 %v12729_v16  ;;  %v12789_v46 = vld [vmem:[%s15416_s8 + $0xb0] sm:$0xff]   ;;  %v12790_v16 = vld [vmem:[%s15416_s8 + $0x98] sm:$0xff]  }
 0x553   : > { %11571 = vmatprep.subr.bf16.mxu1 %v13022_v5  ;;  %11587 = vmatprep.subr.bf16.mxu0 %v13022_v5 }
 0x554   : > { %11573 = vmatprep.mubr.msk.bf16.mxu1 %vm13023_vm2, %v13022_v5  ;;  %11589 = vmatprep.mubr.msk.bf16.mxu0 %vm13023_vm2, %v13022_v5 }
 0x556   : > { %11572 = vmatpush3.bf16.msra.mxu1 %v12730_v19  ;;  %11588 = vmatpush3.bf16.msra.mxu0 %v12731_v22  ;;  %v12791_v19 = vld [vmem:[%s15416_s8 + $0xb8] sm:$0xff]   ;;  %v12792_v22 = vld [vmem:[%s15416_s8 + $0x80] sm:$0xff]  }
 0x557   : > { %11593 = vmatprep.subr.bf16.mxu1 %v13022_v5  ;;  %11609 = vmatprep.subr.bf16.mxu0 %v13022_v5 }
 0x55d   : > { %11574 = vmatmul.mubr.msk.bf16.vlgmr.msra.gmra.mrb[60].mxu1 %vm604_vm3, %v13929_v26  ;;  %11590 = vmatmul.mubr.msk.bf16.vlgmr.msra.gmra.mrb[64].mxu0 %vm604_vm3, %v13929_v26 }
 0x55e   : > { %11594 = vmatpush3.bf16.msra.mxu1 %v12732_v58  ;;  %11610 = vmatpush3.bf16.msra.mxu0 %v12733_v24  ;;  %v12793_v58 = vld [vmem:[%s15416_s8 + $0xa0] sm:$0xff]   ;;  %v12794_v24 = vld [vmem:[%s15416_s8 + $0x88] sm:$0xff]  }
 0x55f   : > { %11595 = vmatprep.subr.bf16.mxu1 %v13022_v5  ;;  %11611 = vmatprep.subr.bf16.mxu0 %v13022_v5 }
 0x560   : > { %11597 = vmatprep.mubr.msk.bf16.mxu1 %vm13023_vm2, %v13022_v5  ;;  %11613 = vmatprep.mubr.msk.bf16.mxu0 %vm13023_vm2, %v13022_v5 }
 0x562   : > { %11596 = vmatpush3.bf16.msra.mxu1 %v12734_v25  ;;  %11612 = vmatpush3.bf16.msra.mxu0 %v12735_v27  ;;  %v12795_v25 = vld [vmem:[%s15416_s8 + $0xa8] sm:$0xff]   ;;  %v12796_v27 = vld [vmem:[%s15416_s8 + $0xd0] sm:$0xff]  }
 0x563   : > { %11601 = vmatprep.subr.bf16.mxu1 %v13022_v5  ;;  %11617 = vmatprep.subr.bf16.mxu0 %v13022_v5 }
 0x565   : > { %11598 = vmatmul.mubr.msk.bf16.vlgmr.msra.gmra.mrb[64].mxu1 %vm604_vm3, %v13927_v59  ;;  %11614 = vmatmul.mubr.msk.bf16.vlgmr.msra.gmra.mrb[68].mxu0 %vm604_vm3, %v13927_v59 }
 0x566   : > { %11602 = vmatpush3.bf16.msra.mxu1 %v12736_v28  ;;  %11618 = vmatpush3.bf16.msra.mxu0 %v12737_v31  ;;  %v12797_v28 = vld [vmem:[%s15416_s8 + $0xf0] sm:$0xff]   ;;  %v12798_v31 = vld [vmem:[%s15416_s8 + $0xd8] sm:$0xff]  }
 0x567   : > { %11603 = vmatprep.subr.bf16.mxu1 %v13022_v5  ;;  %11619 = vmatprep.subr.bf16.mxu0 %v13022_v5 }
 0x568   : > { %11605 = vmatprep.mubr.msk.bf16.mxu1 %vm13023_vm2, %v13022_v5  ;;  %11621 = vmatprep.mubr.msk.bf16.mxu0 %vm13023_vm2, %v13022_v5 }
 0x56a   : > { %11604 = vmatpush3.bf16.msra.mxu1 %v12738_v32  ;;  %11620 = vmatpush3.bf16.msra.mxu0 %v12739_v60  ;;  %v12799_v32 = vld [vmem:[%s15416_s8 + $0xf8] sm:$0xff]   ;;  %v12800_v60 = vld [vmem:[%s15416_s8 + $0xc0] sm:$0xff]  }
 0x56b   : > { %11625 = vmatprep.subr.bf16.mxu1 %v13022_v5  ;;  %11641 = vmatprep.subr.bf16.mxu0 %v13022_v5 }
 0x571   : > { %11606 = vmatmul.mubr.msk.bf16.vlgmr.msra.gmra.mrb[64].mxu1 %vm604_vm3, %v13929_v26  ;;  %11622 = vmatmul.mubr.msk.bf16.vlgmr.msra.gmra.mrb[68].mxu0 %vm604_vm3, %v13929_v26 }
 0x572   : > { %11626 = vmatpush3.bf16.msra.mxu1 %v12740_v62  ;;  %11642 = vmatpush3.bf16.msra.mxu0 %v12741_v33  ;;  %v12801_v62 = vld [vmem:[%s15416_s8 + $0xe0] sm:$0xff]   ;;  %v6507_v33 = vld [vmem:[#allocation2 + $0x10] sm:$0xff] }
 0x573   : > { %11627 = vmatprep.subr.bf16.mxu1 %v13022_v5  ;;  %11643 = vmatprep.subr.bf16.mxu0 %v13022_v5 }
 0x574   : > { %11629 = vmatprep.mubr.msk.bf16.mxu1 %vm13023_vm2, %v13022_v5  ;;  %11645 = vmatprep.mubr.msk.bf16.mxu0 %vm13023_vm2, %v13022_v5 }
 0x576   : > { %11628 = vmatpush3.bf16.msra.mxu1 %v12742_v34  ;;  %11644 = vmatpush3.bf16.msra.mxu0 %v12743_v14  ;;  %v6508_v34 = vld [vmem:[#allocation2 + $0x18] sm:$0xff]  ;;  %v12802_v14 = vld [vmem:[%s15416_s8 + $0xc8] sm:$0xff]  }
 0x577   : > { %11633 = vmatprep.subr.bf16.mxu1 %v13022_v5  ;;  %11649 = vmatprep.subr.bf16.mxu0 %v13022_v5 }
 0x579   : > { %11630 = vmatmul.mubr.msk.bf16.vlgmr.msra.gmra.mrb[68].mxu1 %vm604_vm3, %v13927_v59  ;;  %11646 = vmatmul.mubr.msk.bf16.vlgmr.msra.gmra.mrb[72].mxu0 %vm604_vm3, %v13927_v59 }
 0x57a   : > { %11634 = vmatpush3.bf16.msra.mxu1 %v12744_v30  ;;  %11650 = vmatpush3.bf16.msra.mxu0 %v12745_v35  ;;  %v12803_v30 = vld [vmem:[%s15416_s8 + $0xe8] sm:$0xff]   ;;  %v6509_v35 = vpack.c.bf16 %v6508_v34, %v6507_v33 }
 0x57b   : > { %11635 = vmatprep.subr.bf16.mxu1 %v13022_v5  ;;  %11651 = vmatprep.subr.bf16.mxu0 %v13022_v5 }
 0x57c   : > { %11637 = vmatprep.mubr.msk.bf16.mxu1 %vm13023_vm2, %v13022_v5  ;;  %11653 = vmatprep.mubr.msk.bf16.mxu0 %vm13023_vm2, %v13022_v5 }
 0x57e   : > { %11636 = vmatpush3.bf16.msra.mxu1 %v12746_v3  ;;  %11652 = vmatpush3.bf16.msra.mxu0 %v12747_v36  ;;  %v3615_v3 = vld [vmem:[%s15417_s9] sm:$0xff] }
 0x57f   : > { %11657 = vmatprep.subr.bf16.mxu1 %v13022_v5  ;;  %11673 = vmatprep.subr.bf16.mxu0 %v13022_v5 }
 0x585   : > { %11638 = vmatmul.mubr.msk.bf16.vlgmr.msra.gmra.mrb[68].mxu1 %vm604_vm3, %v13929_v26  ;;  %11654 = vmatmul.mubr.msk.bf16.vlgmr.msra.gmra.mrb[72].mxu0 %vm604_vm3, %v13929_v26 }
 0x586   : > { %11658 = vmatpush3.bf16.msra.mxu1 %v12748_v38  ;;  %11674 = vmatpush3.bf16.msra.mxu0 %v12749_v42  ;;  %v14481_v38 = vld [vmem:[%s15410_s2] sm:$0xff] }
 0x587   : > { %11659 = vmatprep.subr.bf16.mxu1 %v13022_v5  ;;  %11675 = vmatprep.subr.bf16.mxu0 %v13022_v5 }
 0x588   : > { %11661 = vmatprep.mubr.msk.bf16.mxu1 %vm13023_vm2, %v13022_v5  ;;  %11677 = vmatprep.mubr.msk.bf16.mxu0 %vm13023_vm2, %v13022_v5 }
 0x58a   : > { %11660 = vmatpush3.bf16.msra.mxu1 %v12750_v43  ;;  %11676 = vmatpush3.bf16.msra.mxu0 %v12751_v44 }
 0x58b   : > { %11665 = vmatprep.subr.bf16.mxu1 %v13022_v5  ;;  %11681 = vmatprep.subr.bf16.mxu0 %v13022_v5 }
 0x58d   : > { %11662 = vmatmul.mubr.msk.bf16.vlgmr.msra.gmra.mrb[72].mxu1 %vm604_vm3, %v13927_v59  ;;  %11678 = vmatmul.mubr.msk.bf16.vlgmr.msra.gmra.mrb[76].mxu0 %vm604_vm3, %v13927_v59 }
 0x58e   : > { %11666 = vmatpush3.bf16.msra.mxu1 %v12752_v45  ;;  %11682 = vmatpush3.bf16.msra.mxu0 %v12753_v17  ;;  %v3616_v45 = vld [vmem:[%s15417_s9 + $0x8] sm:$0xff] }
 0x58f   : > { %11667 = vmatprep.subr.bf16.mxu1 %v13022_v5  ;;  %11683 = vmatprep.subr.bf16.mxu0 %v13022_v5 }
 0x590   : > { %11669 = vmatprep.mubr.msk.bf16.mxu1 %vm13023_vm2, %v13022_v5  ;;  %11685 = vmatprep.mubr.msk.bf16.mxu0 %vm13023_vm2, %v13022_v5 }
 0x592   : > { %11668 = vmatpush3.bf16.msra.mxu1 %v12754_v47  ;;  %11684 = vmatpush3.bf16.msra.mxu0 %v12755_v48 }
 0x593   : > { %11689 = vmatprep.subr.bf16.mxu1 %v13022_v5  ;;  %11705 = vmatprep.subr.bf16.mxu0 %v13022_v5 }
 0x599   : > { %11670 = vmatmul.mubr.msk.bf16.vlgmr.msra.gmra.mrb[72].mxu1 %vm604_vm3, %v13929_v26  ;;  %11686 = vmatmul.mubr.msk.bf16.vlgmr.msra.gmra.mrb[76].mxu0 %vm604_vm3, %v13929_v26 }
 0x59a   : > { %11690 = vmatpush3.bf16.msra.mxu1 %v12756_v49  ;;  %11706 = vmatpush3.bf16.msra.mxu0 %v12757_v50  ;;  %v14490_v49 = vld [vmem:[%s15410_s2 + $0x10] sm:$0xff] }
 0x59b   : > { %11691 = vmatprep.subr.bf16.mxu1 %v13022_v5  ;;  %11707 = vmatprep.subr.bf16.mxu0 %v13022_v5 }
 0x59c   : > { %11693 = vmatprep.mubr.msk.bf16.mxu1 %vm13023_vm2, %v13022_v5  ;;  %11709 = vmatprep.mubr.msk.bf16.mxu0 %vm13023_vm2, %v13022_v5 }
 0x59e   : > { %11692 = vmatpush3.bf16.msra.mxu1 %v12758_v15  ;;  %11708 = vmatpush3.bf16.msra.mxu0 %v12759_v21  ;;  %v14496_v15 = vld [vmem:[%s15410_s2 + $0x8] sm:$0xff] }
 0x59f   : > { %11697 = vmatprep.subr.bf16.mxu1 %v13022_v5  ;;  %11713 = vmatprep.subr.bf16.mxu0 %v13022_v5 }
 0x5a1   : > { %11694 = vmatmul.mubr.msk.bf16.vlgmr.msra.gmra.mrb[76].mxu1 %vm604_vm3, %v13927_v59  ;;  %11710 = vmatmul.mubr.msk.bf16.vlgmr.msra.gmra.mrb[80].mxu0 %vm604_vm3, %v13927_v59 }
 0x5a2   : > { %11698 = vmatpush3.bf16.msra.mxu1 %v12760_v51  ;;  %11714 = vmatpush3.bf16.msra.mxu0 %v12761_v23 }
 0x5a3   : > { %11699 = vmatprep.subr.bf16.mxu1 %v13022_v5  ;;  %11715 = vmatprep.subr.bf16.mxu0 %v13022_v5 }
 0x5a4   : > { %11701 = vmatprep.mubr.msk.bf16.mxu1 %vm13023_vm2, %v13022_v5  ;;  %11717 = vmatprep.mubr.msk.bf16.mxu0 %vm13023_vm2, %v13022_v5 }
 0x5a6   : > { %11700 = vmatpush3.bf16.msra.mxu1 %v12762_v52  ;;  %11716 = vmatpush3.bf16.msra.mxu0 %v12763_v53 }
 0x5a7   : > { %11721 = vmatprep.subr.bf16.mxu1 %v13022_v5  ;;  %11737 = vmatprep.subr.bf16.mxu0 %v13022_v5 }
 0x5ad   : > { %11702 = vmatmul.mubr.msk.bf16.vlgmr.msra.gmra.mrb[76].mxu1 %vm604_vm3, %v13929_v26  ;;  %11718 = vmatmul.mubr.msk.bf16.vlgmr.msra.gmra.mrb[80].mxu0 %vm604_vm3, %v13929_v26 }
 0x5ae   : > { %11722 = vmatpush3.bf16.msra.mxu1 %v12764_v54  ;;  %11738 = vmatpush3.bf16.msra.mxu0 %v12765_v29  ;;  %v14503_v54 = vld [vmem:[%s15410_s2 + $0x18] sm:$0xff] }
 0x5af   : > { %11723 = vmatprep.subr.bf16.mxu1 %v13022_v5  ;;  %11739 = vmatprep.subr.bf16.mxu0 %v13022_v5 }
 0x5b0   : > { %11725 = vmatprep.mubr.msk.bf16.mxu1 %vm13023_vm2, %v13022_v5  ;;  %11741 = vmatprep.mubr.msk.bf16.mxu0 %vm13023_vm2, %v13022_v5 }
 0x5b2   : > { %11724 = vmatpush3.bf16.msra.mxu1 %v12766_v55  ;;  %11740 = vmatpush3.bf16.msra.mxu0 %v12767_v11  ;;  %v14513_v11 = vld [vmem:[%s15409_s1] sm:$0xff]  }
 0x5b3   : > { %11729 = vmatprep.subr.bf16.mxu1 %v13022_v5  ;;  %11745 = vmatprep.subr.bf16.mxu0 %v13022_v5 }
 0x5b5   : > { %11726 = vmatmul.mubr.msk.bf16.vlgmr.msra.gmra.mrb[80].mxu1 %vm604_vm3, %v13927_v59  ;;  %11742 = vmatmul.mubr.msk.bf16.vlgmr.msra.gmra.mrb[84].mxu0 %vm604_vm3, %v13927_v59 }
 0x5b6   : > { %11730 = vmatpush3.bf16.msra.mxu1 %v12768_v13  ;;  %11746 = vmatpush3.bf16.msra.mxu0 %v12769_v40  ;;  %v12949_v13 = vld [vmem:[%s15409_s1 + $0x8] sm:$0xff]  }
 0x5b7   : > { %11731 = vmatprep.subr.bf16.mxu1 %v13022_v5  ;;  %11747 = vmatprep.subr.bf16.mxu0 %v13022_v5 }
 0x5b8   : > { %11733 = vmatprep.mubr.msk.bf16.mxu1 %vm13023_vm2, %v13022_v5  ;;  %11749 = vmatprep.mubr.msk.bf16.mxu0 %vm13023_vm2, %v13022_v5 }
 0x5ba   : > { %11732 = vmatpush3.bf16.msra.mxu1 %v12770_v18  ;;  %11748 = vmatpush3.bf16.msra.mxu0 %v12771_v20  ;;  %v14529_v18 = vld [vmem:[%s15410_s2 + $0x20] sm:$0xff] }
 0x5bb   : > { %11753 = vmatprep.subr.bf16.mxu1 %v13022_v5  ;;  %11769 = vmatprep.subr.bf16.mxu0 %v13022_v5 }
 0x5c1   : > { %11734 = vmatmul.mubr.msk.bf16.vlgmr.msra.gmra.mrb[80].mxu1 %vm604_vm3, %v13929_v26  ;;  %11750 = vmatmul.mubr.msk.bf16.vlgmr.msra.gmra.mrb[84].mxu0 %vm604_vm3, %v13929_v26 }
 0x5c2   : > { %11754 = vmatpush3.bf16.msra.mxu1 %v12772_v56  ;;  %11770 = vmatpush3.bf16.msra.mxu0 %v12773_v57 }
 0x5c3   : > { %11755 = vmatprep.subr.bf16.mxu1 %v13022_v5  ;;  %11771 = vmatprep.subr.bf16.mxu0 %v13022_v5 }
 0x5c4   : > { %11757 = vmatprep.mubr.msk.bf16.mxu1 %vm13023_vm2, %v13022_v5  ;;  %11773 = vmatprep.mubr.msk.bf16.mxu0 %vm13023_vm2, %v13022_v5 }
 0x5c6   : > { %11756 = vmatpush3.bf16.msra.mxu1 %v12774_v61  ;;  %11772 = vmatpush3.bf16.msra.mxu0 %v12775_v63 }
 0x5c7   : > { %11761 = vmatprep.subr.bf16.mxu1 %v13022_v5  ;;  %11777 = vmatprep.subr.bf16.mxu0 %v13022_v5 }
 0x5c9   : > { %11758 = vmatmul.mubr.msk.bf16.vlgmr.msra.gmra.mrb[84].mxu1 %vm604_vm3, %v13927_v59  ;;  %11774 = vmatmul.mubr.msk.bf16.vlgmr.msra.gmra.mrb[88].mxu0 %vm604_vm3, %v13927_v59 }
 0x5ca   : > { %11762 = vmatpush3.bf16.msra.mxu1 %v12776_v0  ;;  %11778 = vmatpush3.bf16.msra.mxu0 %v12777_v1  ;;  %v14535_v1 = vld [vmem:[%s15410_s2 + $0x30] sm:$0xff] }
 0x5cb   : > { %11763 = vmatprep.subr.bf16.mxu1 %v13022_v5  ;;  %11779 = vmatprep.subr.bf16.mxu0 %v13022_v5 }
 0x5cc   : > { %11765 = vmatprep.mubr.msk.bf16.mxu1 %vm13023_vm2, %v13022_v5  ;;  %11781 = vmatprep.mubr.msk.bf16.mxu0 %vm13023_vm2, %v13022_v5 }
 0x5ce   : > { %11764 = vmatpush3.bf16.msra.mxu1 %v12778_v37  ;;  %11780 = vmatpush3.bf16.msra.mxu0 %v12779_v2  ;;  %v14541_v2 = vld [vmem:[%s15410_s2 + $0x28] sm:$0xff] }
 0x5cf   : > { %11785 = vmatprep.subr.bf16.mxu1 %v13022_v5  ;;  %11801 = vmatprep.subr.bf16.mxu0 %v13022_v5 }
 0x5d5   : > { %11766 = vmatmul.mubr.msk.bf16.vlgmr.msra.gmra.mrb[84].mxu1 %vm604_vm3, %v13929_v26  ;;  %11782 = vmatmul.mubr.msk.bf16.vlgmr.msra.gmra.mrb[88].mxu0 %vm604_vm3, %v13929_v26 }
 0x5d6   : > { %11786 = vmatpush3.bf16.msra.mxu1 %v12780_v4  ;;  %11802 = vmatpush3.bf16.msra.mxu0 %v12781_v6 }
 0x5d7   : > { %11787 = vmatprep.subr.bf16.mxu1 %v13022_v5  ;;  %11803 = vmatprep.subr.bf16.mxu0 %v13022_v5 }
 0x5d8   : > { %11789 = vmatprep.mubr.msk.bf16.mxu1 %vm13023_vm2, %v13022_v5  ;;  %11805 = vmatprep.mubr.msk.bf16.mxu0 %vm13023_vm2, %v13022_v5 }
 0x5da   : > { %11788 = vmatpush3.bf16.msra.mxu1 %v12782_v7  ;;  %11804 = vmatpush3.bf16.msra.mxu0 %v12783_v8 }
 0x5db   : > { %11793 = vmatprep.subr.bf16.mxu1 %v13022_v5  ;;  %11809 = vmatprep.subr.bf16.mxu0 %v13022_v5 }
 0x5dd   : > { %11790 = vmatmul.mubr.msk.bf16.vlgmr.msra.gmra.mrb[88].mxu1 %vm604_vm3, %v13927_v59  ;;  %11806 = vmatmul.mubr.msk.bf16.vlgmr.msra.gmra.mrb[92].mxu0 %vm604_vm3, %v13927_v59 }
 0x5de   : > { %11794 = vmatpush3.bf16.msra.mxu1 %v12784_v39  ;;  %11810 = vmatpush3.bf16.msra.mxu0 %v12785_v41  ;;  %v14547_v41 = vld [vmem:[%s15410_s2 + $0x38] sm:$0xff] }
 0x5df   : > { %11795 = vmatprep.subr.bf16.mxu1 %v13022_v5  ;;  %11811 = vmatprep.subr.bf16.mxu0 %v13022_v5 }
 0x5e0   : > { %11797 = vmatprep.mubr.msk.bf16.mxu1 %vm13023_vm2, %v13022_v5  ;;  %11813 = vmatprep.mubr.msk.bf16.mxu0 %vm13023_vm2, %v13022_v5 }
 0x5e2   : > { %11796 = vmatpush3.bf16.msra.mxu1 %v12786_v9  ;;  %11812 = vmatpush3.bf16.msra.mxu0 %v12787_v10 }
 0x5e3   : > { %11817 = vmatprep.subr.bf16.mxu1 %v13022_v5  ;;  %11833 = vmatprep.subr.bf16.mxu0 %v13022_v5 }
 0x5e9   : > { %11798 = vmatmul.mubr.msk.bf16.vlgmr.msra.gmra.mrb[88].mxu1 %vm604_vm3, %v13929_v26  ;;  %11814 = vmatmul.mubr.msk.bf16.vlgmr.msra.gmra.mrb[92].mxu0 %vm604_vm3, %v13929_v26 }
 0x5ea   : > { %11818 = vmatpush3.bf16.msra.mxu1 %v12788_v12  ;;  %11834 = vmatpush3.bf16.msra.mxu0 %v12789_v46 }
 0x5eb   : > { %11819 = vmatprep.subr.bf16.mxu1 %v13022_v5  ;;  %11835 = vmatprep.subr.bf16.mxu0 %v13022_v5 }
 0x5ec   : > { %11821 = vmatprep.mubr.msk.bf16.mxu1 %vm13023_vm2, %v13022_v5  ;;  %11837 = vmatprep.mubr.msk.bf16.mxu0 %vm13023_vm2, %v13022_v5 }
 0x5ee   : > { %11820 = vmatpush3.bf16.msra.mxu1 %v12790_v16  ;;  %11836 = vmatpush3.bf16.msra.mxu0 %v12791_v19  ;;  %v14553_v16 = vld [vmem:[%s15410_s2 + $0x40] sm:$0xff] }
 0x5ef   : > { %11825 = vmatprep.subr.bf16.mxu1 %v13022_v5  ;;  %11841 = vmatprep.subr.bf16.mxu0 %v13022_v5 }
 0x5f1   : > { %11822 = vmatmul.mubr.msk.bf16.vlgmr.msra.gmra.mrb[92].mxu1 %vm604_vm3, %v13927_v59  ;;  %11838 = vmatmul.mubr.msk.bf16.vlgmr.msra.gmra.mrb[96].mxu0 %vm604_vm3, %v13927_v59 }
 0x5f2   : > { %11826 = vmatpush3.bf16.msra.mxu1 %v12792_v22  ;;  %11842 = vmatpush3.bf16.msra.mxu0 %v12793_v58 }
 0x5f3   : > { %11827 = vmatprep.subr.bf16.mxu1 %v13022_v5  ;;  %11843 = vmatprep.subr.bf16.mxu0 %v13022_v5 }
 0x5f4   : > { %11829 = vmatprep.mubr.msk.bf16.mxu1 %vm13023_vm2, %v13022_v5  ;;  %11845 = vmatprep.mubr.msk.bf16.mxu0 %vm13023_vm2, %v13022_v5 }
 0x5f6   : > { %11828 = vmatpush3.bf16.msra.mxu1 %v12794_v24  ;;  %11844 = vmatpush3.bf16.msra.mxu0 %v12795_v25 }
 0x5f7   : > { %11849 = vmatprep.subr.bf16.mxu1 %v13022_v5  ;;  %11865 = vmatprep.subr.bf16.mxu0 %v13022_v5 }
 0x5fd   : > { %11830 = vmatmul.mubr.msk.bf16.vlgmr.msra.gmra.mrb[92].mxu1 %vm604_vm3, %v13929_v26  ;;  %11846 = vmatmul.mubr.msk.bf16.vlgmr.msra.gmra.mrb[96].mxu0 %vm604_vm3, %v13929_v26 }
 0x5fe   : > { %11850 = vmatpush3.bf16.msra.mxu1 %v12796_v27  ;;  %11866 = vmatpush3.bf16.msra.mxu0 %v12797_v28  ;;  %v14559_v28 = vld [vmem:[%s15410_s2 + $0x50] sm:$0xff] }
 0x5ff   : > { %11851 = vmatprep.subr.bf16.mxu1 %v13022_v5  ;;  %11867 = vmatprep.subr.bf16.mxu0 %v13022_v5 }
 0x600   : > { %11853 = vmatprep.mubr.msk.bf16.mxu1 %vm13023_vm2, %v13022_v5  ;;  %11869 = vmatprep.mubr.msk.bf16.mxu0 %vm13023_vm2, %v13022_v5 }
 0x602   : > { %11852 = vmatpush3.bf16.msra.mxu1 %v12798_v31  ;;  %11868 = vmatpush3.bf16.msra.mxu0 %v12799_v32  ;;  %v14565_v32 = vld [vmem:[%s15410_s2 + $0x48] sm:$0xff] }
 0x603   : > { %11857 = vmatprep.subr.bf16.mxu1 %v13022_v5  ;;  %11873 = vmatprep.subr.bf16.mxu0 %v13022_v5 }
 0x605   : > { %11854 = vmatmul.mubr.msk.bf16.vlgmr.msra.gmra.mrb[96].mxu1 %vm604_vm3, %v13927_v59  ;;  %11870 = vmatmul.mubr.msk.bf16.vlgmr.msra.gmra.mrb[100].mxu0 %vm604_vm3, %v13927_v59 }
 0x606   : > { %11858 = vmatpush3.bf16.msra.mxu1 %v12800_v60  ;;  %11874 = vmatpush3.bf16.msra.mxu0 %v12801_v62 }
 0x607   : > { %11859 = vmatprep.subr.bf16.mxu1 %v13022_v5  ;;  %11875 = vmatprep.subr.bf16.mxu0 %v13022_v5 }
 0x608   : > { %v3731_v59 = vpop.f32.mrb[52].mxu1  ;;  %v3851_v36 = vpop.f32.mrb[56].mxu0  ;;  %11861 = vmatprep.mubr.msk.bf16.mxu1 %vm13023_vm2, %v13022_v5  ;;  %11877 = vmatprep.mubr.msk.bf16.mxu0 %vm13023_vm2, %v13022_v5 }
 0x609   : > { %v3738_v42 = vmul.f32 %v14481_v38, %v3731_v59  ;;  %v11511_v43 = vpop.f32.mrb[53].mxu1  ;;  %v11527_v44 = vpop.f32.mrb[57].mxu0  ;;  %v3858_v50 = vmul.f32 %v14490_v49, %v3851_v36 }
 0x60a   : > { %v3734_v17 = vpop.f32.mrb[54].mxu1  ;;  %v3854_v47 = vpop.f32.mrb[58].mxu0  ;;  %11860 = vmatpush3.bf16.msra.mxu1 %v12802_v14  ;;  %11876 = vmatpush3.bf16.msra.mxu0 %v12803_v30  ;;  %v14571_v30 = vld [vmem:[%s15410_s2 + $0x58] sm:$0xff] }
 0x60b   : > { %v3740_v48 = vadd.f32 %v3738_v42, %v3615_v3  ;;  %v3739_v21 = vmul.f32 %v14496_v15, %v3734_v17  ;;  %v11512_v51 = vpop.f32.mrb[55].mxu1  ;;  %v11528_v23 = vpop.f32.mrb[59].mxu0  ;;  %11881 = vmatprep.subr.bf16.mxu1 %v6509_v35  ;;  %11887 = vmatprep.subr.bf16.mxu0 %v13022_v5  ;;  %v3859_v29 = vmul.f32 %v14503_v54, %v3854_v47  ;;  %v14577_v42 = vld [vmem:[%s15410_s2 + $0x60] sm:$0xff] }
 0x60c   : > { %v14589_v51 = vld [vmem:[%s15410_s2 + $0x68] sm:$0xff] }
 0x60d   : > { %v3860_v52 = vadd.f32 %v3858_v50, %v3740_v48  ;;  %v3741_v53 = vadd.f32 %v3739_v21, %v3616_v45  ;;  %v14583_v50 = vld [vmem:[%s15410_s2 + $0x70] sm:$0xff] }
 0x60f   : > { %v3861_v55 = vadd.f32 %v3859_v29, %v3741_v53 }
 0x611   : > { %11862 = vmatmul.mubr.msk.bf16.vlgmr.msra.gmra.mrb[96].mxu1 %vm604_vm3, %v13929_v26  ;;  %11878 = vmatmul.mubr.msk.bf16.vlgmr.msra.gmra.mrb[100].mxu0 %vm604_vm3, %v13929_v26 }
 0x612   : > { %11882 = vmatpush3.bf16.msra.mxu1 %v6509_v35  ;;  %11883 = vmatprep.mubr.msk.bf16.mxu1 %vm525_vm1, %v14513_v11 }
 0x613   : > { %11903 = vmatprep.subr.bf16.mxu1 %v13022_v5  ;;  %11891 = vmatprep.mubr.msk.bf16.mxu0 %vm13023_vm2, %v13022_v5 }
 0x619   : > { %11884 = vmatmul.mubr.msk.bf16.vlgmr.msra.gmra.mrb[100].mxu1 %vm525_vm1, %v12949_v13  ;;  %v14597_v13 = vld [vmem:[%s15410_s2 + $0x78] sm:$0xff] }
 0x61a   : > { %11907 = vmatprep.mubr.msk.bf16.mxu1 %vm13023_vm2, %v13022_v5 }
 0x61c   : > { %v3971_v26 = vpop.f32.mrb[56].mxu1  ;;  %v4091_v40 = vpop.f32.mrb[60].mxu0 }
 0x61d   : > { %v3978_v20 = vmul.f32 %v14529_v18, %v3971_v26  ;;  %v11543_v56 = vpop.f32.mrb[57].mxu1  ;;  %v11559_v57 = vpop.f32.mrb[61].mxu0  ;;  %v4098_v37 = vmul.f32 %v14535_v1, %v4091_v40 }
 0x61e   : > { %v3974_v61 = vpop.f32.mrb[58].mxu1  ;;  %v4094_v63 = vpop.f32.mrb[62].mxu0 }
 0x61f   : > { %v3980_v0 = vadd.f32 %v3978_v20, %v3860_v52  ;;  %v3979_v4 = vmul.f32 %v14541_v2, %v3974_v61  ;;  %v11544_v6 = vpop.f32.mrb[59].mxu1  ;;  %v11560_v7 = vpop.f32.mrb[63].mxu0  ;;  %v4099_v9 = vmul.f32 %v14547_v41, %v4094_v63  ;;  %v10092_v20 = vld [vmem:[%s15417_s9 + $0x10] sm:$0xff] }
 0x621   : > { %v4100_v8 = vadd.f32 %v4098_v37, %v3980_v0  ;;  %v3981_v39 = vadd.f32 %v3979_v4, %v3861_v55  ;;  %v10093_v37 = vld [vmem:[%s15417_s9 + $0x18] sm:$0xff] }
 0x623   : > { %v4101_v10 = vadd.f32 %v4099_v9, %v3981_v39 }
 0x630   : > { %v4211_v12 = vpop.f32.mrb[60].mxu1  ;;  %v4331_v46 = vpop.f32.mrb[64].mxu0 }
 0x631   : > { %v4218_v19 = vmul.f32 %v14553_v16, %v4211_v12  ;;  %v11575_v22 = vpop.f32.mrb[61].mxu1  ;;  %v11591_v58 = vpop.f32.mrb[65].mxu0  ;;  %v4338_v31 = vmul.f32 %v14559_v28, %v4331_v46 }
 0x632   : > { %v4214_v24 = vpop.f32.mrb[62].mxu1  ;;  %v4334_v25 = vpop.f32.mrb[66].mxu0  ;;  %v12804_v58 = vld [vmem:[%s15418_s10 + $0x10] sm:$0xff]  }
 0x633   : > { %v4220_v27 = vadd.f32 %v4218_v19, %v4100_v8  ;;  %v4219_v60 = vmul.f32 %v14565_v32, %v4214_v24  ;;  %v11576_v62 = vpop.f32.mrb[63].mxu1  ;;  %v11592_v33 = vpop.f32.mrb[67].mxu0  ;;  %v4339_v35 = vmul.f32 %v14571_v30, %v4334_v25  ;;  %v12805_v24 = vld [vmem:[%s15418_s10 + $0x30] sm:$0xff]   ;;  %11888 = vmatpush3.bf16.msra.mxu0 %v12804_v58 }
 0x634   : > { %11904 = vmatpush3.bf16.msra.mxu1 %v12805_v24  ;;  %11889 = vmatprep.subr.bf16.mxu0 %v13022_v5 }
 0x635   : > { %v4340_v34 = vadd.f32 %v4338_v31, %v4220_v27  ;;  %v4221_v14 = vadd.f32 %v4219_v60, %v4101_v10  ;;  %11905 = vmatprep.subr.bf16.mxu1 %v13022_v5  ;;  %v12806_v31 = vld [vmem:[%s15418_s10 + $0x18] sm:$0xff]  }
 0x636   : > { %v12807_v60 = vld [vmem:[%s15418_s10 + $0x38] sm:$0xff]  }
 0x637   : > { %v4341_v3 = vadd.f32 %v4339_v35, %v4221_v14  ;;  %11890 = vmatpush3.bf16.msra.mxu0 %v12806_v31 }
 0x638   : > { %11906 = vmatpush3.bf16.msra.mxu1 %v12807_v60  ;;  %11895 = vmatprep.subr.bf16.mxu0 %v13022_v5 }
 0x639   : > { %11911 = vmatprep.subr.bf16.mxu1 %v13022_v5 }
 0x644   : > { %v4451_v59 = vpop.f32.mrb[64].mxu1  ;;  %v4571_v36 = vpop.f32.mrb[68].mxu0 }
 0x645   : > { %v4458_v43 = vmul.f32 %v14577_v42, %v4451_v59  ;;  %v11607_v44 = vpop.f32.mrb[65].mxu1  ;;  %v11623_v45 = vpop.f32.mrb[69].mxu0  ;;  %v4578_v21 = vmul.f32 %v14583_v50, %v4571_v36 }
 0x646   : > { %v4454_v17 = vpop.f32.mrb[66].mxu1  ;;  %v4574_v47 = vpop.f32.mrb[70].mxu0 }
 0x647   : > { %v4460_v48 = vadd.f32 %v4458_v43, %v4340_v34  ;;  %v4459_v23 = vmul.f32 %v14589_v51, %v4454_v17  ;;  %v11608_v52 = vpop.f32.mrb[67].mxu1  ;;  %v11624_v53 = vpop.f32.mrb[71].mxu0  ;;  %v4579_v26 = vmul.f32 %v14597_v13, %v4574_v47 }
 0x649   : > { %v14592_v29 = vadd.f32 %v4578_v21, %v4460_v48  ;;  %v4461_v55 = vadd.f32 %v4459_v23, %v4341_v3 }
 0x64b   : > { %v14600_v40 = vadd.f32 %v4579_v26, %v4461_v55 }
 0x658   : > { %v4693_v56 = vpop.f32.mrb[68].mxu1  ;;  %v4813_v57 = vpop.f32.mrb[72].mxu0 }
 0x659   : > { %v4700_v61 = vmul.f32 %v14481_v38, %v4693_v56  ;;  %v11639_v63 = vpop.f32.mrb[69].mxu1  ;;  %v11655_v0 = vpop.f32.mrb[73].mxu0  ;;  %v4820_v8 = vmul.f32 %v14490_v49, %v4813_v57 }
 0x65a   : > { %v4696_v4 = vpop.f32.mrb[70].mxu1  ;;  %v4816_v6 = vpop.f32.mrb[74].mxu0 }
 0x65b   : > { %v4702_v7 = vadd.f32 %v10092_v20, %v4700_v61  ;;  %v4701_v39 = vmul.f32 %v14496_v15, %v4696_v4  ;;  %v11640_v9 = vpop.f32.mrb[71].mxu1  ;;  %v11656_v10 = vpop.f32.mrb[75].mxu0  ;;  %v4821_v19 = vmul.f32 %v14503_v54, %v4816_v6 }
 0x65d   : > { %v4822_v12 = vadd.f32 %v4820_v8, %v4702_v7  ;;  %v4703_v46 = vadd.f32 %v10093_v37, %v4701_v39 }
 0x65f   : > { %v4823_v22 = vadd.f32 %v4821_v19, %v4703_v46 }
 0x66c   : > { %v4933_v25 = vpop.f32.mrb[72].mxu1  ;;  %v5053_v27 = vpop.f32.mrb[76].mxu0 }
 0x66d   : > { %v4940_v62 = vmul.f32 %v14529_v18, %v4933_v25  ;;  %v11671_v33 = vpop.f32.mrb[73].mxu1  ;;  %v11687_v34 = vpop.f32.mrb[77].mxu0  ;;  %v5060_v59 = vmul.f32 %v14535_v1, %v5053_v27 }
 0x66e   : > { %v4936_v14 = vpop.f32.mrb[74].mxu1  ;;  %v5056_v35 = vpop.f32.mrb[78].mxu0  ;;  %v10202_v34 = vld [vmem:[%s15417_s9 + $0x20] sm:$0xff] }
 0x66f   : > { %v4942_v3 = vadd.f32 %v4940_v62, %v4822_v12  ;;  %v4941_v36 = vmul.f32 %v14541_v2, %v4936_v14  ;;  %v11672_v43 = vpop.f32.mrb[75].mxu1  ;;  %v11688_v44 = vpop.f32.mrb[79].mxu0  ;;  %v5061_v47 = vmul.f32 %v14547_v41, %v5056_v35 }
 0x670   : > { %v10203_v43 = vld [vmem:[%s15417_s9 + $0x28] sm:$0xff] }
 0x671   : > { %v5062_v45 = vadd.f32 %v5060_v59, %v4942_v3  ;;  %v4943_v17 = vadd.f32 %v4941_v36, %v4823_v22 }
 0x673   : > { %v5063_v48 = vadd.f32 %v5061_v47, %v4943_v17 }
 0x680   : > { %v5173_v21 = vpop.f32.mrb[76].mxu1  ;;  %v5293_v23 = vpop.f32.mrb[80].mxu0 }
 0x681   : > { %v5180_v52 = vmul.f32 %v14553_v16, %v5173_v21  ;;  %v11703_v53 = vpop.f32.mrb[77].mxu1  ;;  %v11719_v55 = vpop.f32.mrb[81].mxu0  ;;  %v5300_v57 = vmul.f32 %v14559_v28, %v5293_v23 }
 0x682   : > { %v5176_v26 = vpop.f32.mrb[78].mxu1  ;;  %v5296_v20 = vpop.f32.mrb[82].mxu0 }
 0x683   : > { %v5182_v56 = vadd.f32 %v5180_v52, %v5062_v45  ;;  %v5181_v61 = vmul.f32 %v14565_v32, %v5176_v26  ;;  %v11704_v63 = vpop.f32.mrb[79].mxu1  ;;  %v11720_v0 = vpop.f32.mrb[83].mxu0  ;;  %v5301_v6 = vmul.f32 %v14571_v30, %v5296_v20 }
 0x685   : > { %v5302_v37 = vadd.f32 %v5300_v57, %v5182_v56  ;;  %v5183_v4 = vadd.f32 %v5181_v61, %v5063_v48 }
 0x687   : > { %v5303_v7 = vadd.f32 %v5301_v6, %v5183_v4 }
 0x694   : > { %v5413_v8 = vpop.f32.mrb[80].mxu1  ;;  %v5533_v39 = vpop.f32.mrb[84].mxu0 }
 0x695   : > { %v5420_v9 = vmul.f32 %v14577_v42, %v5413_v8  ;;  %v11735_v10 = vpop.f32.mrb[81].mxu1  ;;  %v11751_v12 = vpop.f32.mrb[85].mxu0  ;;  %v5540_v58 = vmul.f32 %v14583_v50, %v5533_v39 }
 0x696   : > { %v5416_v46 = vpop.f32.mrb[82].mxu1  ;;  %v5536_v19 = vpop.f32.mrb[86].mxu0 }
 0x697   : > { %v5422_v22 = vadd.f32 %v5420_v9, %v5302_v37  ;;  %v5421_v24 = vmul.f32 %v14589_v51, %v5416_v46  ;;  %v11736_v25 = vpop.f32.mrb[83].mxu1  ;;  %v11752_v27 = vpop.f32.mrb[87].mxu0  ;;  %v5541_v62 = vmul.f32 %v14597_v13, %v5536_v19 }
 0x699   : > { %v14639_v31 = vadd.f32 %v5540_v58, %v5422_v22  ;;  %v5423_v60 = vadd.f32 %v5421_v24, %v5303_v7 }
 0x69b   : > { %v14642_v33 = vadd.f32 %v5541_v62, %v5423_v60 }
 0x6a8   : > { %v5655_v14 = vpop.f32.mrb[84].mxu1  ;;  %v5775_v35 = vpop.f32.mrb[88].mxu0 }
 0x6a9   : > { %v5662_v3 = vmul.f32 %v14481_v38, %v5655_v14  ;;  %v11767_v59 = vpop.f32.mrb[85].mxu1  ;;  %v11783_v36 = vpop.f32.mrb[89].mxu0  ;;  %v5782_v47 = vmul.f32 %v14490_v49, %v5775_v35 }
 0x6aa   : > { %v5658_v44 = vpop.f32.mrb[86].mxu1  ;;  %v5778_v45 = vpop.f32.mrb[90].mxu0 }
 0x6ab   : > { %v5664_v17 = vadd.f32 %v10202_v34, %v5662_v3  ;;  %v5663_v48 = vmul.f32 %v14496_v15, %v5658_v44  ;;  %v11768_v21 = vpop.f32.mrb[87].mxu1  ;;  %v11784_v23 = vpop.f32.mrb[91].mxu0  ;;  %v5783_v55 = vmul.f32 %v14503_v54, %v5778_v45 }
 0x6ad   : > { %v5784_v52 = vadd.f32 %v5782_v47, %v5664_v17  ;;  %v5665_v53 = vadd.f32 %v10203_v43, %v5663_v48 }
 0x6af   : > { %v5785_v26 = vadd.f32 %v5783_v55, %v5665_v53 }
 0x6bc   : > { %v5895_v20 = vpop.f32.mrb[88].mxu1  ;;  %v6015_v56 = vpop.f32.mrb[92].mxu0 }
 0x6bd   : > { %v5902_v57 = vmul.f32 %v14529_v18, %v5895_v20  ;;  %v11799_v61 = vpop.f32.mrb[89].mxu1  ;;  %v11815_v63 = vpop.f32.mrb[93].mxu0  ;;  %v6022_v6 = vmul.f32 %v14535_v1, %v6015_v56 }
 0x6be   : > { %v5898_v0 = vpop.f32.mrb[90].mxu1  ;;  %v6018_v37 = vpop.f32.mrb[94].mxu0 }
 0x6bf   : > { %v5904_v4 = vadd.f32 %v5902_v57, %v5784_v52  ;;  %v5903_v7 = vmul.f32 %v14541_v2, %v5898_v0  ;;  %v11800_v8 = vpop.f32.mrb[91].mxu1  ;;  %v11816_v39 = vpop.f32.mrb[95].mxu0  ;;  %v6023_v12 = vmul.f32 %v14547_v41, %v6018_v37 }
 0x6c0   : > { %v12809_v8 = vld [vmem:[%s15418_s10 + $0x20] sm:$0xff]  }
 0x6c1   : > { %v6024_v9 = vadd.f32 %v6022_v6, %v5904_v4  ;;  %v5905_v10 = vadd.f32 %v5903_v7, %v5785_v26  ;;  %v12808_v7 = vld [vmem:[%s15418_s10] sm:$0xff]  }
 0x6c3   : > { %v6025_v46 = vadd.f32 %v6023_v12, %v5905_v10  ;;  %v12810_v12 = vld [vmem:[%s15418_s10 + $0x8] sm:$0xff]  }
 0x6d0   : > { %v6135_v19 = vpop.f32.mrb[92].mxu1  ;;  %v6255_v22 = vpop.f32.mrb[96].mxu0 }
 0x6d1   : > { %v6142_v58 = vmul.f32 %v14553_v16, %v6135_v19  ;;  %v11831_v24 = vpop.f32.mrb[93].mxu1  ;;  %v11847_v25 = vpop.f32.mrb[97].mxu0  ;;  %v6262_v34 = vmul.f32 %v14559_v28, %v6255_v22  ;;  %v12812_v19 = vld [vmem:[%s15418_s10 + $0x50] sm:$0xff]  }
 0x6d2   : > { %v6138_v27 = vpop.f32.mrb[94].mxu1  ;;  %v6258_v60 = vpop.f32.mrb[98].mxu0  ;;  %v12813_v22 = vld [vmem:[%s15418_s10 + $0x70] sm:$0xff]   ;;  %v12815_v24 = vld [vmem:[%s15418_s10 + $0x78] sm:$0xff]   ;;  %v12816_v25 = vld [vmem:[%s15418_s10 + $0x40] sm:$0xff]  }
 0x6d3   : > { %v6144_v62 = vadd.f32 %v6142_v58, %v6024_v9  ;;  %v6143_v14 = vmul.f32 %v14565_v32, %v6138_v27  ;;  %v11832_v35 = vpop.f32.mrb[95].mxu1  ;;  %v11848_v3 = vpop.f32.mrb[99].mxu0  ;;  %v6263_v43 = vmul.f32 %v14571_v30, %v6258_v60  ;;  %v12814_v58 = vld [vmem:[%s15418_s10 + $0x58] sm:$0xff]   ;;  %v12817_v27 = vld [vmem:[%s15418_s10 + $0x60] sm:$0xff]   ;;  %v12818_v60 = vld [vmem:[%s15418_s10 + $0x48] sm:$0xff]  }
 0x6d4   : > { %v12822_v35 = vld [vmem:[%s15418_s10 + $0x98] sm:$0xff]  }
 0x6d5   : > { %v6264_v59 = vadd.f32 %v6262_v34, %v6144_v62  ;;  %v6145_v36 = vadd.f32 %v6143_v14, %v6025_v46  ;;  %v12811_v46 = vld [vmem:[%s15418_s10 + $0x28] sm:$0xff]   ;;  %v12820_v34 = vld [vmem:[%s15418_s10 + $0x90] sm:$0xff]   ;;  %v12823_v3 = vld [vmem:[%s15418_s10 + $0xb8] sm:$0xff]  }
 0x6d6   : > { %v12819_v62 = vld [vmem:[%s15418_s10 + $0x68] sm:$0xff]   ;;  %v12821_v14 = vld [vmem:[%s15418_s10 + $0xb0] sm:$0xff]  }
 0x6d7   : > { %v6265_v44 = vadd.f32 %v6263_v43, %v6145_v36  ;;  %v12825_v36 = vld [vmem:[%s15418_s10 + $0xa0] sm:$0xff]   ;;  %v12826_v43 = vld [vmem:[%s15418_s10 + $0x88] sm:$0xff]  }
 0x6e4   : > { %v6375_v45 = vpop.f32.mrb[96].mxu1  ;;  %v6495_v17 = vpop.f32.mrb[100].mxu0 }
 0x6e5   : > { %v6382_v47 = vmul.f32 %v14577_v42, %v6375_v45  ;;  %v11863_v48 = vpop.f32.mrb[97].mxu1  ;;  %v11879_v21 = vpop.f32.mrb[101].mxu0  ;;  %v6502_v55 = vmul.f32 %v14583_v50, %v6495_v17  ;;  %v12828_v45 = vld [vmem:[%s15418_s10 + $0xd0] sm:$0xff]  }
 0x6e6   : > { %v6378_v23 = vpop.f32.mrb[98].mxu1  ;;  %v6498_v52 = vpop.f32.mrb[102].mxu0  ;;  %v12829_v17 = vld [vmem:[%s15418_s10 + $0xf0] sm:$0xff]   ;;  %v12831_v48 = vld [vmem:[%s15418_s10 + $0xf8] sm:$0xff]   ;;  %v12832_v21 = vld [vmem:[%s15418_s10 + $0xc0] sm:$0xff]  }
 0x6e7   : > { %v6384_v53 = vadd.f32 %v6382_v47, %v6264_v59  ;;  %v6383_v26 = vmul.f32 %v14589_v51, %v6378_v23  ;;  %v11864_v20 = vpop.f32.mrb[99].mxu1  ;;  %v11880_v56 = vpop.f32.mrb[103].mxu0  ;;  %v6503_v63 = vmul.f32 %v14597_v13, %v6498_v52  ;;  %v12824_v59 = vld [vmem:[%s15418_s10 + $0x80] sm:$0xff]   ;;  %v12830_v47 = vld [vmem:[%s15418_s10 + $0xd8] sm:$0xff]   ;;  %v12834_v52 = vld [vmem:[%s15418_s10 + $0xc8] sm:$0xff]  }
 0x6e8   : > { %v12833_v23 = vld [vmem:[%s15418_s10 + $0xe0] sm:$0xff]   ;;  %v12838_v20 = vld [vmem:[%s15419_s11 + $0x18] sm:$0xff]  }
 0x6e9   : > { %v14665_v57 = vadd.f32 %v6502_v55, %v6384_v53  ;;  %v6385_v61 = vadd.f32 %v6383_v26, %v6265_v44  ;;  %v12827_v44 = vld [vmem:[%s15418_s10 + $0xa8] sm:$0xff]   ;;  %v12836_v55 = vld [vmem:[%s15419_s11 + $0x10] sm:$0xff]   ;;  %v12839_v56 = vld [vmem:[%s15419_s11 + $0x38] sm:$0xff]  }
 0x6ea   : > { %v12835_v53 = vld [vmem:[%s15418_s10 + $0xe8] sm:$0xff]   ;;  %v12837_v26 = vld [vmem:[%s15419_s11 + $0x30] sm:$0xff]  }
 0x6eb   : > { %v14668_v0 = vadd.f32 %v6503_v63, %v6385_v61  ;;  %v12840_v61 = vld [vmem:[%s15419_s11] sm:$0xff]  }
 0x6ec   : > { %v11885_v37 = vpop.f32.mrb[100].mxu1  ;;  %v12841_v63 = vld [vmem:[%s15419_s11 + $0x20] sm:$0xff]  }
 0x6ed   : > { %v6544_v4 = vpop.f32.mrb[101].mxu1 }
 0x6ee   : > { %v11886_v6 = vpop.f32.mrb[102].mxu1 }
 0x6ef   : > { %v14676_v39 = vpack.c.bf16 %v11886_v6, %v11885_v37  ;;  %v6547_v9 = vpop.f32.mrb[103].mxu1  ;;  %v12842_v37 = vld [vmem:[%s15419_s11 + $0x8] sm:$0xff]   ;;  %v12844_v6 = vld [vmem:[%s15419_s11 + $0x50] sm:$0xff]  }
 0x6f0   : > { %v14678_v10 = vpack.c.bf16 %v6547_v9, %v6544_v4  ;;  %v12843_v4 = vld [vmem:[%s15419_s11 + $0x28] sm:$0xff]   ;;  %v12847_v9 = vld [vmem:[%s15419_s11 + $0x78] sm:$0xff]  }
 0x6f1   : > { %11892 = vmatmul.mubr.msk.bf16.vlgmr.msra.gmra.mrb[104].mxu0 %vm604_vm3, %v14676_v39  ;;  %11908 = vmatmul.mubr.msk.bf16.vlgmr.msra.gmra.mrb[104].mxu1 %vm604_vm3, %v14676_v39 }
 0x6f2   : > { %11896 = vmatpush3.bf16.msra.mxu0 %v12808_v7  ;;  %11912 = vmatpush3.bf16.msra.mxu1 %v12809_v8  ;;  %v12845_v7 = vld [vmem:[%s15419_s11 + $0x70] sm:$0xff]   ;;  %v12846_v8 = vld [vmem:[%s15419_s11 + $0x58] sm:$0xff]  }
 0x6f3   : > { %11897 = vmatprep.subr.bf16.mxu0 %v13022_v5  ;;  %11913 = vmatprep.subr.bf16.mxu1 %v13022_v5 }
 0x6f4   : > { %11899 = vmatprep.mubr.msk.bf16.mxu0 %vm13023_vm2, %v13022_v5  ;;  %11915 = vmatprep.mubr.msk.bf16.mxu1 %vm13023_vm2, %v13022_v5 }
 0x6f6   : > { %11898 = vmatpush3.bf16.msra.mxu0 %v12810_v12  ;;  %11914 = vmatpush3.bf16.msra.mxu1 %v12811_v46  ;;  %v12848_v12 = vld [vmem:[%s15419_s11 + $0x40] sm:$0xff]  }
 0x6f7   : > { %11919 = vmatprep.subr.bf16.mxu0 %v13022_v5  ;;  %11935 = vmatprep.subr.bf16.mxu1 %v13022_v5  ;;  %v12849_v46 = vld [vmem:[%s15419_s11 + $0x60] sm:$0xff]  }
 0x6fd   : > { %11900 = vmatmul.mubr.msk.bf16.vlgmr.msra.gmra.mrb[104].mxu0 %vm604_vm3, %v14678_v10  ;;  %11916 = vmatmul.mubr.msk.bf16.vlgmr.msra.gmra.mrb[104].mxu1 %vm604_vm3, %v14678_v10 }
 0x6fe   : > { %11920 = vmatpush3.bf16.msra.mxu0 %v12812_v19  ;;  %11936 = vmatpush3.bf16.msra.mxu1 %v12813_v22  ;;  %v12850_v19 = vld [vmem:[%s15419_s11 + $0x48] sm:$0xff]  }
 0x6ff   : > { %11921 = vmatprep.subr.bf16.mxu0 %v13022_v5  ;;  %11937 = vmatprep.subr.bf16.mxu1 %v13022_v5  ;;  %v12851_v22 = vld [vmem:[%s15419_s11 + $0x68] sm:$0xff]  }
 0x700   : > { %11923 = vmatprep.mubr.msk.bf16.mxu0 %vm13023_vm2, %v13022_v5  ;;  %11939 = vmatprep.mubr.msk.bf16.mxu1 %vm13023_vm2, %v13022_v5 }
 0x702   : > { %11922 = vmatpush3.bf16.msra.mxu0 %v12814_v58  ;;  %11938 = vmatpush3.bf16.msra.mxu1 %v12815_v24  ;;  %v12852_v58 = vld [vmem:[%s15419_s11 + $0x90] sm:$0xff]  }
 0x703   : > { %11927 = vmatprep.subr.bf16.mxu0 %v13022_v5  ;;  %11943 = vmatprep.subr.bf16.mxu1 %v13022_v5  ;;  %v12853_v24 = vld [vmem:[%s15419_s11 + $0xb0] sm:$0xff]  }
 0x705   : > { %11924 = vmatmul.mubr.msk.bf16.vlgmr.msra.gmra.mrb[108].mxu0 %vm604_vm3, %v14676_v39  ;;  %11940 = vmatmul.mubr.msk.bf16.vlgmr.msra.gmra.mrb[108].mxu1 %vm604_vm3, %v14676_v39 }
 0x706   : > { %11928 = vmatpush3.bf16.msra.mxu0 %v12816_v25  ;;  %11944 = vmatpush3.bf16.msra.mxu1 %v12817_v27  ;;  %v12854_v25 = vld [vmem:[%s15419_s11 + $0x98] sm:$0xff]  }
 0x707   : > { %11929 = vmatprep.subr.bf16.mxu0 %v13022_v5  ;;  %11945 = vmatprep.subr.bf16.mxu1 %v13022_v5  ;;  %v12855_v27 = vld [vmem:[%s15419_s11 + $0xb8] sm:$0xff]  }
 0x708   : > { %11931 = vmatprep.mubr.msk.bf16.mxu0 %vm13023_vm2, %v13022_v5  ;;  %11947 = vmatprep.mubr.msk.bf16.mxu1 %vm13023_vm2, %v13022_v5 }
 0x70a   : > { %11930 = vmatpush3.bf16.msra.mxu0 %v12818_v60  ;;  %11946 = vmatpush3.bf16.msra.mxu1 %v12819_v62  ;;  %v12856_v60 = vld [vmem:[%s15419_s11 + $0x80] sm:$0xff]  }
 0x70b   : > { %11951 = vmatprep.subr.bf16.mxu0 %v13022_v5  ;;  %11967 = vmatprep.subr.bf16.mxu1 %v13022_v5  ;;  %v12857_v62 = vld [vmem:[%s15419_s11 + $0xa0] sm:$0xff]  }
 0x711   : > { %11932 = vmatmul.mubr.msk.bf16.vlgmr.msra.gmra.mrb[108].mxu0 %vm604_vm3, %v14678_v10  ;;  %11948 = vmatmul.mubr.msk.bf16.vlgmr.msra.gmra.mrb[108].mxu1 %vm604_vm3, %v14678_v10 }
 0x712   : > { %11952 = vmatpush3.bf16.msra.mxu0 %v12820_v34  ;;  %11968 = vmatpush3.bf16.msra.mxu1 %v12821_v14  ;;  %v12858_v34 = vld [vmem:[%s15419_s11 + $0x88] sm:$0xff]  }
 0x713   : > { %11953 = vmatprep.subr.bf16.mxu0 %v13022_v5  ;;  %11969 = vmatprep.subr.bf16.mxu1 %v13022_v5  ;;  %v12859_v14 = vld [vmem:[%s15419_s11 + $0xa8] sm:$0xff]  }
 0x714   : > { %11955 = vmatprep.mubr.msk.bf16.mxu0 %vm13023_vm2, %v13022_v5  ;;  %11971 = vmatprep.mubr.msk.bf16.mxu1 %vm13023_vm2, %v13022_v5 }
 0x716   : > { %11954 = vmatpush3.bf16.msra.mxu0 %v12822_v35  ;;  %11970 = vmatpush3.bf16.msra.mxu1 %v12823_v3  ;;  %v12860_v35 = vld [vmem:[%s15419_s11 + $0xd0] sm:$0xff]  }
 0x717   : > { %11959 = vmatprep.subr.bf16.mxu0 %v13022_v5  ;;  %11975 = vmatprep.subr.bf16.mxu1 %v13022_v5  ;;  %v12861_v3 = vld [vmem:[%s15419_s11 + $0xf0] sm:$0xff]  }
 0x719   : > { %11956 = vmatmul.mubr.msk.bf16.vlgmr.msra.gmra.mrb[112].mxu0 %vm604_vm3, %v14676_v39  ;;  %11972 = vmatmul.mubr.msk.bf16.vlgmr.msra.gmra.mrb[112].mxu1 %vm604_vm3, %v14676_v39 }
 0x71a   : > { %11960 = vmatpush3.bf16.msra.mxu0 %v12824_v59  ;;  %11976 = vmatpush3.bf16.msra.mxu1 %v12825_v36  ;;  %v12862_v59 = vld [vmem:[%s15419_s11 + $0xd8] sm:$0xff]  }
 0x71b   : > { %11961 = vmatprep.subr.bf16.mxu0 %v13022_v5  ;;  %11977 = vmatprep.subr.bf16.mxu1 %v13022_v5  ;;  %v12863_v36 = vld [vmem:[%s15419_s11 + $0xf8] sm:$0xff]  }
 0x71c   : > { %11963 = vmatprep.mubr.msk.bf16.mxu0 %vm13023_vm2, %v13022_v5  ;;  %11979 = vmatprep.mubr.msk.bf16.mxu1 %vm13023_vm2, %v13022_v5 }
 0x71e   : > { %11962 = vmatpush3.bf16.msra.mxu0 %v12826_v43  ;;  %11978 = vmatpush3.bf16.msra.mxu1 %v12827_v44  ;;  %v12864_v43 = vld [vmem:[%s15419_s11 + $0xc0] sm:$0xff]  }
 0x71f   : > { %11983 = vmatprep.subr.bf16.mxu0 %v13022_v5  ;;  %11999 = vmatprep.subr.bf16.mxu1 %v13022_v5  ;;  %v12865_v44 = vld [vmem:[%s15419_s11 + $0xe0] sm:$0xff]  }
 0x725   : > { %11964 = vmatmul.mubr.msk.bf16.vlgmr.msra.gmra.mrb[112].mxu0 %vm604_vm3, %v14678_v10  ;;  %11980 = vmatmul.mubr.msk.bf16.vlgmr.msra.gmra.mrb[112].mxu1 %vm604_vm3, %v14678_v10 }
 0x726   : > { %11984 = vmatpush3.bf16.msra.mxu0 %v12828_v45  ;;  %12000 = vmatpush3.bf16.msra.mxu1 %v12829_v17  ;;  %v12866_v45 = vld [vmem:[%s15419_s11 + $0xc8] sm:$0xff]  }
 0x727   : > { %11985 = vmatprep.subr.bf16.mxu0 %v13022_v5  ;;  %12001 = vmatprep.subr.bf16.mxu1 %v13022_v5  ;;  %v12867_v17 = vld [vmem:[%s15419_s11 + $0xe8] sm:$0xff]  }
 0x728   : > { %11987 = vmatprep.mubr.msk.bf16.mxu0 %vm13023_vm2, %v13022_v5  ;;  %12003 = vmatprep.mubr.msk.bf16.mxu1 %vm13023_vm2, %v13022_v5 }
 0x72a   : > { %11986 = vmatpush3.bf16.msra.mxu0 %v12830_v47  ;;  %12002 = vmatpush3.bf16.msra.mxu1 %v12831_v48 }
 0x72b   : > { %11991 = vmatprep.subr.bf16.mxu0 %v13022_v5  ;;  %12007 = vmatprep.subr.bf16.mxu1 %v13022_v5 }
 0x72d   : > { %11988 = vmatmul.mubr.msk.bf16.vlgmr.msra.gmra.mrb[116].mxu0 %vm604_vm3, %v14676_v39  ;;  %12004 = vmatmul.mubr.msk.bf16.vlgmr.msra.gmra.mrb[116].mxu1 %vm604_vm3, %v14676_v39 }
 0x72e   : > { %11992 = vmatpush3.bf16.msra.mxu0 %v12832_v21  ;;  %12008 = vmatpush3.bf16.msra.mxu1 %v12833_v23 }
 0x72f   : > { %11993 = vmatprep.subr.bf16.mxu0 %v13022_v5  ;;  %12009 = vmatprep.subr.bf16.mxu1 %v13022_v5 }
 0x730   : > { %11995 = vmatprep.mubr.msk.bf16.mxu0 %vm13023_vm2, %v13022_v5  ;;  %12011 = vmatprep.mubr.msk.bf16.mxu1 %vm13023_vm2, %v13022_v5 }
 0x732   : > { %11994 = vmatpush3.bf16.msra.mxu0 %v12834_v52  ;;  %12010 = vmatpush3.bf16.msra.mxu1 %v12835_v53 }
 0x733   : > { %12015 = vmatprep.subr.bf16.mxu0 %v13022_v5  ;;  %12031 = vmatprep.subr.bf16.mxu1 %v13022_v5 }
 0x739   : > { %11996 = vmatmul.mubr.msk.bf16.vlgmr.msra.gmra.mrb[116].mxu0 %vm604_vm3, %v14678_v10  ;;  %12012 = vmatmul.mubr.msk.bf16.vlgmr.msra.gmra.mrb[116].mxu1 %vm604_vm3, %v14678_v10 }
 0x73a   : > { %12016 = vmatpush3.bf16.msra.mxu0 %v12836_v55  ;;  %12032 = vmatpush3.bf16.msra.mxu1 %v12837_v26 }
 0x73b   : > { %12017 = vmatprep.subr.bf16.mxu0 %v13022_v5  ;;  %12033 = vmatprep.subr.bf16.mxu1 %v13022_v5 }
 0x73c   : > { %12019 = vmatprep.mubr.msk.bf16.mxu0 %vm13023_vm2, %v13022_v5  ;;  %12035 = vmatprep.mubr.msk.bf16.mxu1 %vm13023_vm2, %v13022_v5 }
 0x73e   : > { %12018 = vmatpush3.bf16.msra.mxu0 %v12838_v20  ;;  %12034 = vmatpush3.bf16.msra.mxu1 %v12839_v56 }
 0x73f   : > { %12023 = vmatprep.subr.bf16.mxu0 %v13022_v5  ;;  %12039 = vmatprep.subr.bf16.mxu1 %v13022_v5 }
 0x741   : > { %12020 = vmatmul.mubr.msk.bf16.vlgmr.msra.gmra.mrb[120].mxu0 %vm604_vm3, %v14676_v39  ;;  %12036 = vmatmul.mubr.msk.bf16.vlgmr.msra.gmra.mrb[120].mxu1 %vm604_vm3, %v14676_v39 }
 0x742   : > { %12024 = vmatpush3.bf16.msra.mxu0 %v12840_v61  ;;  %12040 = vmatpush3.bf16.msra.mxu1 %v12841_v63 }
 0x743   : > { %12025 = vmatprep.subr.bf16.mxu0 %v13022_v5  ;;  %12041 = vmatprep.subr.bf16.mxu1 %v13022_v5 }
 0x744   : > { %12027 = vmatprep.mubr.msk.bf16.mxu0 %vm13023_vm2, %v13022_v5  ;;  %12043 = vmatprep.mubr.msk.bf16.mxu1 %vm13023_vm2, %v13022_v5 }
 0x746   : > { %12026 = vmatpush3.bf16.msra.mxu0 %v12842_v37  ;;  %12042 = vmatpush3.bf16.msra.mxu1 %v12843_v4 }
 0x747   : > { %12047 = vmatprep.subr.bf16.mxu0 %v13022_v5  ;;  %12063 = vmatprep.subr.bf16.mxu1 %v13022_v5 }
 0x74d   : > { %12028 = vmatmul.mubr.msk.bf16.vlgmr.msra.gmra.mrb[120].mxu0 %vm604_vm3, %v14678_v10  ;;  %12044 = vmatmul.mubr.msk.bf16.vlgmr.msra.gmra.mrb[120].mxu1 %vm604_vm3, %v14678_v10 }
 0x74e   : > { %12048 = vmatpush3.bf16.msra.mxu0 %v12844_v6  ;;  %12064 = vmatpush3.bf16.msra.mxu1 %v12845_v7 }
 0x74f   : > { %12049 = vmatprep.subr.bf16.mxu0 %v13022_v5  ;;  %12065 = vmatprep.subr.bf16.mxu1 %v13022_v5 }
 0x750   : > { %12051 = vmatprep.mubr.msk.bf16.mxu0 %vm13023_vm2, %v13022_v5  ;;  %12067 = vmatprep.mubr.msk.bf16.mxu1 %vm13023_vm2, %v13022_v5 }
 0x752   : > { %12050 = vmatpush3.bf16.msra.mxu0 %v12846_v8  ;;  %12066 = vmatpush3.bf16.msra.mxu1 %v12847_v9 }
 0x753   : > { %12055 = vmatprep.subr.bf16.mxu0 %v13022_v5  ;;  %12071 = vmatprep.subr.bf16.mxu1 %v13022_v5 }
 0x755   : > { %12052 = vmatmul.mubr.msk.bf16.vlgmr.msra.gmra.mrb[124].mxu0 %vm604_vm3, %v14676_v39  ;;  %12068 = vmatmul.mubr.msk.bf16.vlgmr.msra.gmra.mrb[124].mxu1 %vm604_vm3, %v14676_v39 }
 0x756   : > { %12056 = vmatpush3.bf16.msra.mxu0 %v12848_v12  ;;  %12072 = vmatpush3.bf16.msra.mxu1 %v12849_v46 }
 0x757   : > { %12057 = vmatprep.subr.bf16.mxu0 %v13022_v5  ;;  %12073 = vmatprep.subr.bf16.mxu1 %v13022_v5 }
 0x758   : > { %12059 = vmatprep.mubr.msk.bf16.mxu0 %vm13023_vm2, %v13022_v5  ;;  %12075 = vmatprep.mubr.msk.bf16.mxu1 %vm13023_vm2, %v13022_v5 }
 0x75a   : > { %12058 = vmatpush3.bf16.msra.mxu0 %v12850_v19  ;;  %12074 = vmatpush3.bf16.msra.mxu1 %v12851_v22 }
 0x75b   : > { %12079 = vmatprep.subr.bf16.mxu0 %v13022_v5  ;;  %12095 = vmatprep.subr.bf16.mxu1 %v13022_v5 }
 0x761   : > { %12060 = vmatmul.mubr.msk.bf16.vlgmr.msra.gmra.mrb[124].mxu0 %vm604_vm3, %v14678_v10  ;;  %12076 = vmatmul.mubr.msk.bf16.vlgmr.msra.gmra.mrb[124].mxu1 %vm604_vm3, %v14678_v10 }
 0x762   : > { %12080 = vmatpush3.bf16.msra.mxu0 %v12852_v58  ;;  %12096 = vmatpush3.bf16.msra.mxu1 %v12853_v24 }
 0x763   : > { %12081 = vmatprep.subr.bf16.mxu0 %v13022_v5  ;;  %12097 = vmatprep.subr.bf16.mxu1 %v13022_v5 }
 0x764   : > { %12083 = vmatprep.mubr.msk.bf16.mxu0 %vm13023_vm2, %v13022_v5  ;;  %12099 = vmatprep.mubr.msk.bf16.mxu1 %vm13023_vm2, %v13022_v5 }
 0x766   : > { %12082 = vmatpush3.bf16.msra.mxu0 %v12854_v25  ;;  %12098 = vmatpush3.bf16.msra.mxu1 %v12855_v27 }
 0x767   : > { %12087 = vmatprep.subr.bf16.mxu0 %v13022_v5  ;;  %12103 = vmatprep.subr.bf16.mxu1 %v13022_v5 }
 0x769   : > { %12084 = vmatmul.mubr.msk.bf16.vlgmr.msra.gmra.mrb[128].mxu0 %vm604_vm3, %v14676_v39  ;;  %12100 = vmatmul.mubr.msk.bf16.vlgmr.msra.gmra.mrb[128].mxu1 %vm604_vm3, %v14676_v39 }
 0x76a   : > { %12088 = vmatpush3.bf16.msra.mxu0 %v12856_v60  ;;  %12104 = vmatpush3.bf16.msra.mxu1 %v12857_v62 }
 0x76b   : > { %12089 = vmatprep.subr.bf16.mxu0 %v13022_v5  ;;  %12105 = vmatprep.subr.bf16.mxu1 %v13022_v5 }
 0x76c   : > { %12091 = vmatprep.mubr.msk.bf16.mxu0 %vm13023_vm2, %v13022_v5  ;;  %12107 = vmatprep.mubr.msk.bf16.mxu1 %vm13023_vm2, %v13022_v5 }
 0x76e   : > { %12090 = vmatpush3.bf16.msra.mxu0 %v12858_v34  ;;  %12106 = vmatpush3.bf16.msra.mxu1 %v12859_v14 }
 0x76f   : > { %12111 = vmatprep.subr.bf16.mxu0 %v13022_v5  ;;  %12127 = vmatprep.subr.bf16.mxu1 %v13022_v5 }
 0x775   : > { %12092 = vmatmul.mubr.msk.bf16.vlgmr.msra.gmra.mrb[128].mxu0 %vm604_vm3, %v14678_v10  ;;  %12108 = vmatmul.mubr.msk.bf16.vlgmr.msra.gmra.mrb[128].mxu1 %vm604_vm3, %v14678_v10 }
 0x776   : > { %12112 = vmatpush3.bf16.msra.mxu0 %v12860_v35  ;;  %12128 = vmatpush3.bf16.msra.mxu1 %v12861_v3 }
 0x777   : > { %12113 = vmatprep.subr.bf16.mxu0 %v13022_v5  ;;  %12129 = vmatprep.subr.bf16.mxu1 %v13022_v5 }
 0x778   : > { %12115 = vmatprep.mubr.msk.bf16.mxu0 %vm13023_vm2, %v13022_v5  ;;  %12131 = vmatprep.mubr.msk.bf16.mxu1 %vm13023_vm2, %v13022_v5 }
 0x77a   : > { %12114 = vmatpush3.bf16.msra.mxu0 %v12862_v59  ;;  %12130 = vmatpush3.bf16.msra.mxu1 %v12863_v36 }
 0x77b   : > { %12119 = vmatprep.subr.bf16.mxu0 %v13022_v5  ;;  %12135 = vmatprep.subr.bf16.mxu1 %v13022_v5 }
 0x77d   : > { %12116 = vmatmul.mubr.msk.bf16.vlgmr.msra.gmra.mrb[132].mxu0 %vm604_vm3, %v14676_v39  ;;  %12132 = vmatmul.mubr.msk.bf16.vlgmr.msra.gmra.mrb[132].mxu1 %vm604_vm3, %v14676_v39 }
 0x77e   : > { %12120 = vmatpush3.bf16.msra.mxu0 %v12864_v43  ;;  %12136 = vmatpush3.bf16.msra.mxu1 %v12865_v44 }
 0x77f   : > { %12121 = vmatprep.subr.bf16.mxu0 %v13022_v5  ;;  %12137 = vmatprep.subr.bf16.mxu1 %v13022_v5 }
 0x780   : > { %12123 = vmatprep.mubr.msk.bf16.mxu0 %vm13023_vm2, %v13022_v5  ;;  %12139 = vmatprep.mubr.msk.bf16.mxu1 %vm13023_vm2, %v13022_v5 }
 0x782   : > { %12122 = vmatpush3.bf16.msra.mxu0 %v12866_v45  ;;  %12138 = vmatpush3.bf16.msra.mxu1 %v12867_v17 }
 0x783   : > { %12149 = vmatprep.subr.bf16.mxu1 %v13022_v5 }
 0x789   : > { %12124 = vmatmul.mubr.msk.bf16.vlgmr.msra.gmra.mrb[132].mxu0 %vm604_vm3, %v14678_v10  ;;  %12140 = vmatmul.mubr.msk.bf16.vlgmr.msra.gmra.mrb[132].mxu1 %vm604_vm3, %v14678_v10 }
 0x78a   : > { %12145 = vmatprep.mubr.msk.bf16.mxu0 %vm525_vm1, %v14513_v11  ;;  %12153 = vmatprep.mubr.msk.bf16.mxu1 %vm13023_vm2, %v13022_v5 }
 0x7d0   : > { %v6675_v39 = vpop.f32.mrb[104].mxu0  ;;  %v6795_v47 = vpop.f32.mrb[104].mxu1 }
 0x7d1   : > { %v6682_v48 = vmul.f32 %v14481_v38, %v6675_v39  ;;  %v11901_v21 = vpop.f32.mrb[105].mxu0  ;;  %v11917_v23 = vpop.f32.mrb[105].mxu1  ;;  %v6802_v26 = vmul.f32 %v14490_v49, %v6795_v47 }
 0x7d2   : > { %v6678_v52 = vpop.f32.mrb[106].mxu0  ;;  %v6798_v53 = vpop.f32.mrb[106].mxu1 }
 0x7d3   : > { %v6684_v55 = vadd.f32 %v6682_v48, %v14592_v29  ;;  %v6683_v10 = vmul.f32 %v14496_v15, %v6678_v52  ;;  %v11902_v20 = vpop.f32.mrb[107].mxu0  ;;  %v11918_v56 = vpop.f32.mrb[107].mxu1  ;;  %v6803_v63 = vmul.f32 %v14503_v54, %v6798_v53 }
 0x7d5   : > { %v6804_v11 = vadd.f32 %v6802_v26, %v6684_v55  ;;  %v6685_v61 = vadd.f32 %v6683_v10, %v14600_v40 }
 0x7d7   : > { %v6805_v37 = vadd.f32 %v6803_v63, %v6685_v61 }
 0x7e4   : > { %v6915_v4 = vpop.f32.mrb[108].mxu0  ;;  %v7035_v38 = vpop.f32.mrb[108].mxu1 }
 0x7e5   : > { %v6922_v6 = vmul.f32 %v14529_v18, %v6915_v4  ;;  %v11933_v7 = vpop.f32.mrb[109].mxu0  ;;  %v11949_v8 = vpop.f32.mrb[109].mxu1  ;;  %v7042_v49 = vmul.f32 %v14535_v1, %v7035_v38 }
 0x7e6   : > { %v6918_v9 = vpop.f32.mrb[110].mxu0  ;;  %v7038_v29 = vpop.f32.mrb[110].mxu1 }
 0x7e7   : > { %v6924_v12 = vadd.f32 %v6922_v6, %v6804_v11  ;;  %v6923_v15 = vmul.f32 %v14541_v2, %v6918_v9  ;;  %v11934_v46 = vpop.f32.mrb[111].mxu0  ;;  %v11950_v19 = vpop.f32.mrb[111].mxu1  ;;  %v7043_v54 = vmul.f32 %v14547_v41, %v7038_v29  ;;  %v15073_v9 = vld [vmem:[%s15410_s2 + $0x10] sm:$0xff] }
 0x7e9   : > { %v7044_v22 = vadd.f32 %v7042_v49, %v6924_v12  ;;  %v6925_v40 = vadd.f32 %v6923_v15, %v6805_v37  ;;  %v15079_v12 = vld [vmem:[%s15410_s2 + $0x8] sm:$0xff] }
 0x7eb   : > { %v7045_v58 = vadd.f32 %v7043_v54, %v6925_v40 }
 0x7f8   : > { %v7155_v24 = vpop.f32.mrb[112].mxu0  ;;  %v7275_v25 = vpop.f32.mrb[112].mxu1 }
 0x7f9   : > { %v7162_v18 = vmul.f32 %v14553_v16, %v7155_v24  ;;  %v11965_v27 = vpop.f32.mrb[113].mxu0  ;;  %v11981_v60 = vpop.f32.mrb[113].mxu1  ;;  %v7282_v1 = vmul.f32 %v14559_v28, %v7275_v25  ;;  %v12868_v16 = vld [vmem:[%s15420_s12 + $0x10] sm:$0xff]  }
 0x7fa   : > { %v7158_v62 = vpop.f32.mrb[114].mxu0  ;;  %v7278_v34 = vpop.f32.mrb[114].mxu1  ;;  %12150 = vmatpush3.bf16.msra.mxu1 %v12868_v16  ;;  %v15089_v25 = vld [vmem:[#allocation2 + $0x10] sm:$0xff]  ;;  %v15092_v27 = vld [vmem:[#allocation2 + $0x18] sm:$0xff] }
 0x7fb   : > { %v7164_v14 = vadd.f32 %v7162_v18, %v7044_v22  ;;  %v7163_v2 = vmul.f32 %v14565_v32, %v7158_v62  ;;  %v11966_v35 = vpop.f32.mrb[115].mxu0  ;;  %v11982_v3 = vpop.f32.mrb[115].mxu1  ;;  %v7283_v41 = vmul.f32 %v14571_v30, %v7278_v34  ;;  %12151 = vmatprep.subr.bf16.mxu1 %v13022_v5  ;;  %v15086_v22 = vld [vmem:[%s15410_s2 + $0x18] sm:$0xff] }
 0x7fd   : > { %v7284_v59 = vadd.f32 %v7282_v1, %v7164_v14  ;;  %v7165_v36 = vadd.f32 %v7163_v2, %v7045_v58  ;;  %v12869_v14 = vld [vmem:[%s15420_s12 + $0x30] sm:$0xff]   ;;  %v15101_v1 = vld [vmem:[%s15410_s2 + $0x20] sm:$0xff] }
 0x7ff   : > { %v7285_v43 = vadd.f32 %v7283_v41, %v7165_v36 }
 0x80c   : > { %v7395_v44 = vpop.f32.mrb[116].mxu0  ;;  %v7515_v45 = vpop.f32.mrb[116].mxu1 }
 0x80d   : > { %v7402_v28 = vmul.f32 %v14577_v42, %v7395_v44  ;;  %v11997_v17 = vpop.f32.mrb[117].mxu0  ;;  %v12013_v32 = vpop.f32.mrb[117].mxu1  ;;  %v7522_v21 = vmul.f32 %v14583_v50, %v7515_v45  ;;  %v15066_v50 = vld [vmem:[%s15410_s2] sm:$0xff]  ;;  %v15114_v44 = vld [vmem:[%s15410_s2 + $0x28] sm:$0xff] }
 0x80e   : > { %v7398_v39 = vpop.f32.mrb[118].mxu0  ;;  %v7518_v47 = vpop.f32.mrb[118].mxu1  ;;  %v12971_v32 = vld [vmem:[%s15409_s1 + $0x8] sm:$0xff]  }
 0x80f   : > { %v7404_v48 = vadd.f32 %v7402_v28, %v7284_v59  ;;  %v7403_v30 = vmul.f32 %v14589_v51, %v7398_v39  ;;  %v11998_v23 = vpop.f32.mrb[119].mxu0  ;;  %v12014_v52 = vpop.f32.mrb[119].mxu1  ;;  %v7523_v26 = vmul.f32 %v14597_v13, %v7518_v47 }
 0x811   : > { %v7524_v53 = vadd.f32 %v7522_v21, %v7404_v48  ;;  %v7405_v55 = vadd.f32 %v7403_v30, %v7285_v43  ;;  %v15108_v43 = vld [vmem:[%s15410_s2 + $0x30] sm:$0xff]  ;;  %v15126_v48 = vld [vmem:[%s15410_s2 + $0x38] sm:$0xff] }
 0x813   : > { %v10422_v10 = vmul.f32 -1.442695, %v7524_v53  ;;  %v7525_v20 = vadd.f32 %v7523_v26, %v7405_v55  ;;  %v15133_v53 = vld [vmem:[%s15410_s2 + $0x40] sm:$0xff] }
 0x815   : > { %12920 = vpow2.f32 %v10422_v10  ;;  %v10423_v56 = vmul.f32 -1.442695, %v7525_v20 }
 0x817   : > { %12922 = vpow2.f32 %v10423_v56 }
 0x81f   : > { %v12921_v42 = vpop.eup %12920 }
 0x820   : > { %v7532_v11 = vadd.f32 1.0, %v12921_v42  ;;  %v7646_v61 = vpop.f32.mrb[120].mxu0  ;;  %v7766_v63 = vpop.f32.mrb[120].mxu1 }
 0x821   : > { %v12923_v37 = vpop.eup %12922  ;;  %v7653_v51 = vmul.f32 %v15066_v50, %v7646_v61  ;;  %v12029_v4 = vpop.f32.mrb[121].mxu0  ;;  %v7773_v29 = vmul.f32 %v15073_v9, %v7766_v63  ;;  %v15145_v63 = vld [vmem:[%s15410_s2 + $0x48] sm:$0xff] }
 0x822   : > { %v12045_v38 = vpop.f32.mrb[121].mxu1  ;;  %12924 = vrcp.f32 %v7532_v11  ;;  %v7533_v13 = vadd.f32 1.0, %v12923_v37  ;;  %v7649_v6 = vpop.f32.mrb[122].mxu0  ;;  %v15139_v11 = vld [vmem:[%s15410_s2 + $0x50] sm:$0xff] }
 0x823   : > { %v7769_v7 = vpop.f32.mrb[122].mxu1  ;;  %v7655_v8 = vadd.f32 %v7653_v51, %v14639_v31  ;;  %v7654_v49 = vmul.f32 %v15079_v12, %v7649_v6  ;;  %v12030_v15 = vpop.f32.mrb[123].mxu0  ;;  %v15151_v6 = vld [vmem:[%s15410_s2 + $0x58] sm:$0xff] }
 0x824   : > { %v12046_v46 = vpop.f32.mrb[123].mxu1  ;;  %12926 = vrcp.f32 %v7533_v13  ;;  %v7774_v40 = vmul.f32 %v15086_v22, %v7769_v7  ;;  %v15157_v15 = vld [vmem:[%s15410_s2 + $0x60] sm:$0xff] }
 0x825   : > { %v7775_v19 = vadd.f32 %v7773_v29, %v7655_v8  ;;  %v7656_v31 = vadd.f32 %v7654_v49, %v14642_v33 }
 0x827   : > { %v7776_v54 = vadd.f32 %v7774_v40, %v7656_v31 }
 0x82c   : > { %v12925_v58 = vpop.eup %12924 }
 0x82d   : > { %v8509_v18 = vmul.f32 %v15089_v25, %v12925_v58 }
 0x82e   : > { %v12927_v24 = vpop.eup %12926 }
 0x82f   : > { %v8510_v60 = vmul.f32 %v15092_v27, %v12927_v24  ;;  %v15163_v24 = vld [vmem:[%s15410_s2 + $0x70] sm:$0xff] }
 0x831   : > { %v8511_v62 = vpack.c.bf16 %v8510_v60, %v8509_v18  ;;  %v15169_v60 = vld [vmem:[%s15410_s2 + $0x68] sm:$0xff] }
 0x833   : > { %12143 = vmatprep.subr.bf16.mxu0 %v8511_v62 }
 0x834   : > { %v7886_v33 = vpop.f32.mrb[124].mxu0  ;;  %v8006_v34 = vpop.f32.mrb[124].mxu1  ;;  %12144 = vmatpush3.bf16.msra.mxu0 %v8511_v62 }
 0x835   : > { %v7893_v2 = vmul.f32 %v15101_v1, %v7886_v33  ;;  %v12061_v35 = vpop.f32.mrb[125].mxu0  ;;  %v12077_v3 = vpop.f32.mrb[125].mxu1  ;;  %12165 = vmatprep.subr.bf16.mxu0 %v13022_v5  ;;  %v8013_v16 = vmul.f32 %v15108_v43, %v8006_v34 }
 0x836   : > { %v7889_v59 = vpop.f32.mrb[126].mxu0  ;;  %v8009_v36 = vpop.f32.mrb[126].mxu1  ;;  %v15177_v35 = vld [vmem:[%s15410_s2 + $0x78] sm:$0xff] }
 0x837   : > { %v7895_v41 = vadd.f32 %v7893_v2, %v7775_v19  ;;  %v7894_v45 = vmul.f32 %v15114_v44, %v7889_v59  ;;  %v12062_v28 = vpop.f32.mrb[127].mxu0  ;;  %v12078_v17 = vpop.f32.mrb[127].mxu1  ;;  %12146 = vmatmul.mubr.msk.bf16.vlgmr.msra.gmra.mrb[136].mxu0 %vm525_vm1, %v12971_v32  ;;  %v8014_v21 = vmul.f32 %v15126_v48, %v8009_v36  ;;  %v12870_v36 = vld [vmem:[%s15420_s12 + $0x18] sm:$0xff]   ;;  %v12873_v32 = vld [vmem:[%s15420_s12 + $0x20] sm:$0xff]  }
 0x838   : > { %12166 = vmatpush3.bf16.msra.mxu0 %v12869_v14  ;;  %12169 = vmatprep.mubr.msk.bf16.mxu0 %vm13023_vm2, %v13022_v5  ;;  %v12872_v17 = vld [vmem:[%s15420_s12] sm:$0xff]  }
 0x839   : > { %v8015_v39 = vadd.f32 %v8013_v16, %v7895_v41  ;;  %v7896_v47 = vadd.f32 %v7894_v45, %v7776_v54  ;;  %12167 = vmatprep.subr.bf16.mxu0 %v13022_v5  ;;  %v12871_v41 = vld [vmem:[%s15420_s12 + $0x38] sm:$0xff]   ;;  %12152 = vmatpush3.bf16.msra.mxu1 %v12870_v36 }
 0x83a   : > { %12157 = vmatprep.subr.bf16.mxu1 %v13022_v5 }
 0x83b   : > { %v8016_v30 = vadd.f32 %v8014_v21, %v7896_v47 }
 0x83c   : > { %12168 = vmatpush3.bf16.msra.mxu0 %v12871_v41 }
 0x83d   : > { %12173 = vmatprep.subr.bf16.mxu0 %v13022_v5 }
 0x848   : > { %v8126_v23 = vpop.f32.mrb[128].mxu0  ;;  %v8246_v52 = vpop.f32.mrb[128].mxu1 }
 0x849   : > { %v8133_v55 = vmul.f32 %v15133_v53, %v8126_v23  ;;  %v12093_v26 = vpop.f32.mrb[129].mxu0  ;;  %v12109_v10 = vpop.f32.mrb[129].mxu1  ;;  %v8253_v61 = vmul.f32 %v15139_v11, %v8246_v52  ;;  %v12875_v23 = vld [vmem:[%s15420_s12 + $0x28] sm:$0xff]   ;;  %v12876_v52 = vld [vmem:[%s15420_s12 + $0x50] sm:$0xff]  }
 0x84a   : > { %v8129_v20 = vpop.f32.mrb[130].mxu0  ;;  %v8249_v56 = vpop.f32.mrb[130].mxu1  ;;  %v12878_v26 = vld [vmem:[%s15420_s12 + $0x58] sm:$0xff]  }
 0x84b   : > { %v8135_v42 = vadd.f32 %v8133_v55, %v8015_v39  ;;  %v8134_v37 = vmul.f32 %v15145_v63, %v8129_v20  ;;  %v12094_v51 = vpop.f32.mrb[131].mxu0  ;;  %v12110_v4 = vpop.f32.mrb[131].mxu1  ;;  %v8254_v7 = vmul.f32 %v15151_v6, %v8249_v56  ;;  %v12877_v55 = vld [vmem:[%s15420_s12 + $0x70] sm:$0xff]   ;;  %v12879_v10 = vld [vmem:[%s15420_s12 + $0x78] sm:$0xff]   ;;  %v12880_v20 = vld [vmem:[%s15420_s12 + $0x40] sm:$0xff]  }
 0x84c   : > { %v12881_v56 = vld [vmem:[%s15420_s12 + $0x60] sm:$0xff]   ;;  %v12885_v51 = vld [vmem:[%s15420_s12 + $0xb0] sm:$0xff]   ;;  %v12886_v4 = vld [vmem:[%s15420_s12 + $0x98] sm:$0xff]  }
 0x84d   : > { %v8255_v38 = vadd.f32 %v8253_v61, %v8135_v42  ;;  %v8136_v13 = vadd.f32 %v8134_v37, %v8016_v30  ;;  %v12874_v30 = vld [vmem:[%s15420_s12 + $0x8] sm:$0xff]   ;;  %v12884_v37 = vld [vmem:[%s15420_s12 + $0x90] sm:$0xff]  }
 0x84e   : > { %v12882_v42 = vld [vmem:[%s15420_s12 + $0x48] sm:$0xff]  }
 0x84f   : > { %v8256_v8 = vadd.f32 %v8254_v7, %v8136_v13  ;;  %v12883_v61 = vld [vmem:[%s15420_s12 + $0x68] sm:$0xff]   ;;  %v12888_v13 = vld [vmem:[%s15420_s12 + $0x80] sm:$0xff]  }
 0x850   : > { %v12889_v7 = vld [vmem:[%s15420_s12 + $0xa0] sm:$0xff]  }
 0x85c   : > { %v8366_v29 = vpop.f32.mrb[132].mxu0  ;;  %v8486_v49 = vpop.f32.mrb[132].mxu1 }
 0x85d   : > { %v8373_v46 = vmul.f32 %v15157_v15, %v8366_v29  ;;  %v12125_v19 = vpop.f32.mrb[133].mxu0  ;;  %v12141_v31 = vpop.f32.mrb[133].mxu1  ;;  %v8493_v18 = vmul.f32 %v15163_v24, %v8486_v49  ;;  %v12891_v29 = vld [vmem:[%s15420_s12 + $0xa8] sm:$0xff]   ;;  %v12892_v49 = vld [vmem:[%s15420_s12 + $0xd0] sm:$0xff]  }
 0x85e   : > { %v8369_v40 = vpop.f32.mrb[134].mxu0  ;;  %v8489_v54 = vpop.f32.mrb[134].mxu1  ;;  %v12894_v19 = vld [vmem:[%s15420_s12 + $0xd8] sm:$0xff]  }
 0x85f   : > { %v8375_v58 = vadd.f32 %v8373_v46, %v8255_v38  ;;  %v8374_v62 = vmul.f32 %v15169_v60, %v8369_v40  ;;  %v12126_v33 = vpop.f32.mrb[135].mxu0  ;;  %v12142_v34 = vpop.f32.mrb[135].mxu1  ;;  %v8494_v3 = vmul.f32 %v15177_v35, %v8489_v54  ;;  %v12887_v38 = vld [vmem:[%s15420_s12 + $0xb8] sm:$0xff]   ;;  %v12893_v46 = vld [vmem:[%s15420_s12 + $0xf0] sm:$0xff]   ;;  %v12896_v40 = vld [vmem:[%s15420_s12 + $0xc0] sm:$0xff]  }
 0x860   : > { %v12895_v31 = vld [vmem:[%s15420_s12 + $0xf8] sm:$0xff]   ;;  %v12897_v54 = vld [vmem:[%s15420_s12 + $0xe0] sm:$0xff]  }
 0x861   : > { %v15172_v14 = vadd.f32 %v8493_v18, %v8375_v58  ;;  %v8376_v2 = vadd.f32 %v8374_v62, %v8256_v8  ;;  %v12890_v8 = vld [vmem:[%s15420_s12 + $0x88] sm:$0xff]  }
 0x862   : > { %v12898_v58 = vld [vmem:[%s15420_s12 + $0xc8] sm:$0xff]  }
 0x863   : > { %v15180_v59 = vadd.f32 %v8494_v3, %v8376_v2  ;;  %v12899_v18 = vld [vmem:[%s15420_s12 + $0xe8] sm:$0xff]  }
 0x90a   : > { %v12147_v16 = vpop.f32.mrb[136].mxu0 }
 0x90b   : > { %v8546_v45 = vpop.f32.mrb[137].mxu0 }
 0x90c   : > { %v12148_v28 = vpop.f32.mrb[138].mxu0 }
 0x90d   : > { %v15196_v39 = vpack.c.bf16 %v12148_v28, %v12147_v16  ;;  %v8549_v47 = vpop.f32.mrb[139].mxu0 }
 0x90e   : > { %v15198_v21 = vpack.c.bf16 %v8549_v47, %v8546_v45 }
 0x90f   : > { %12154 = vmatmul.mubr.msk.bf16.vlgmr.msra.gmra.mrb[136].mxu1 %vm604_vm3, %v15196_v39  ;;  %12170 = vmatmul.mubr.msk.bf16.vlgmr.msra.gmra.mrb[140].mxu0 %vm604_vm3, %v15196_v39 }
 0x910   : > { %12158 = vmatpush3.bf16.msra.mxu1 %v12872_v17  ;;  %12174 = vmatpush3.bf16.msra.mxu0 %v12873_v32 }
 0x911   : > { %12159 = vmatprep.subr.bf16.mxu1 %v13022_v5  ;;  %12175 = vmatprep.subr.bf16.mxu0 %v13022_v5 }
 0x912   : > { %12161 = vmatprep.mubr.msk.bf16.mxu1 %vm13023_vm2, %v13022_v5  ;;  %12177 = vmatprep.mubr.msk.bf16.mxu0 %vm13023_vm2, %v13022_v5 }
 0x914   : > { %12160 = vmatpush3.bf16.msra.mxu1 %v12874_v30  ;;  %12176 = vmatpush3.bf16.msra.mxu0 %v12875_v23 }
 0x915   : > { %12181 = vmatprep.subr.bf16.mxu1 %v13022_v5  ;;  %12197 = vmatprep.subr.bf16.mxu0 %v13022_v5 }
 0x91b   : > { %12162 = vmatmul.mubr.msk.bf16.vlgmr.msra.gmra.mrb[136].mxu1 %vm604_vm3, %v15198_v21  ;;  %12178 = vmatmul.mubr.msk.bf16.vlgmr.msra.gmra.mrb[140].mxu0 %vm604_vm3, %v15198_v21 }
 0x91c   : > { %12182 = vmatpush3.bf16.msra.mxu1 %v12876_v52  ;;  %12198 = vmatpush3.bf16.msra.mxu0 %v12877_v55 }
 0x91d   : > { %12183 = vmatprep.subr.bf16.mxu1 %v13022_v5  ;;  %12199 = vmatprep.subr.bf16.mxu0 %v13022_v5 }
 0x91e   : > { %12185 = vmatprep.mubr.msk.bf16.mxu1 %vm13023_vm2, %v13022_v5  ;;  %12201 = vmatprep.mubr.msk.bf16.mxu0 %vm13023_vm2, %v13022_v5 }
 0x920   : > { %12184 = vmatpush3.bf16.msra.mxu1 %v12878_v26  ;;  %12200 = vmatpush3.bf16.msra.mxu0 %v12879_v10 }
 0x921   : > { %12189 = vmatprep.subr.bf16.mxu1 %v13022_v5  ;;  %12205 = vmatprep.subr.bf16.mxu0 %v13022_v5 }
 0x923   : > { %12186 = vmatmul.mubr.msk.bf16.vlgmr.msra.gmra.mrb[140].mxu1 %vm604_vm3, %v15196_v39  ;;  %12202 = vmatmul.mubr.msk.bf16.vlgmr.msra.gmra.mrb[144].mxu0 %vm604_vm3, %v15196_v39 }
 0x924   : > { %12190 = vmatpush3.bf16.msra.mxu1 %v12880_v20  ;;  %12206 = vmatpush3.bf16.msra.mxu0 %v12881_v56 }
 0x925   : > { %12191 = vmatprep.subr.bf16.mxu1 %v13022_v5  ;;  %12207 = vmatprep.subr.bf16.mxu0 %v13022_v5 }
 0x926   : > { %12193 = vmatprep.mubr.msk.bf16.mxu1 %vm13023_vm2, %v13022_v5  ;;  %12209 = vmatprep.mubr.msk.bf16.mxu0 %vm13023_vm2, %v13022_v5 }
 0x928   : > { %12192 = vmatpush3.bf16.msra.mxu1 %v12882_v42  ;;  %12208 = vmatpush3.bf16.msra.mxu0 %v12883_v61 }
 0x929   : > { %12213 = vmatprep.subr.bf16.mxu1 %v13022_v5  ;;  %12229 = vmatprep.subr.bf16.mxu0 %v13022_v5 }
 0x92f   : > { %12194 = vmatmul.mubr.msk.bf16.vlgmr.msra.gmra.mrb[140].mxu1 %vm604_vm3, %v15198_v21  ;;  %12210 = vmatmul.mubr.msk.bf16.vlgmr.msra.gmra.mrb[144].mxu0 %vm604_vm3, %v15198_v21 }
 0x930   : > { %12214 = vmatpush3.bf16.msra.mxu1 %v12884_v37  ;;  %12230 = vmatpush3.bf16.msra.mxu0 %v12885_v51 }
 0x931   : > { %12215 = vmatprep.subr.bf16.mxu1 %v13022_v5  ;;  %12231 = vmatprep.subr.bf16.mxu0 %v13022_v5 }
 0x932   : > { %12217 = vmatprep.mubr.msk.bf16.mxu1 %vm13023_vm2, %v13022_v5  ;;  %12233 = vmatprep.mubr.msk.bf16.mxu0 %vm13023_vm2, %v13022_v5 }
 0x934   : > { %12216 = vmatpush3.bf16.msra.mxu1 %v12886_v4  ;;  %12232 = vmatpush3.bf16.msra.mxu0 %v12887_v38 }
 0x935   : > { %12221 = vmatprep.subr.bf16.mxu1 %v13022_v5  ;;  %12237 = vmatprep.subr.bf16.mxu0 %v13022_v5 }
 0x937   : > { %12218 = vmatmul.mubr.msk.bf16.vlgmr.msra.gmra.mrb[144].mxu1 %vm604_vm3, %v15196_v39  ;;  %12234 = vmatmul.mubr.msk.bf16.vlgmr.msra.gmra.mrb[148].mxu0 %vm604_vm3, %v15196_v39 }
 0x938   : > { %12222 = vmatpush3.bf16.msra.mxu1 %v12888_v13  ;;  %12238 = vmatpush3.bf16.msra.mxu0 %v12889_v7  ;;  %v10532_v13 = vmul.f32 -1.442695, %v15172_v14 }
 0x939   : > { %12223 = vmatprep.subr.bf16.mxu1 %v13022_v5  ;;  %12239 = vmatprep.subr.bf16.mxu0 %v13022_v5 }
 0x93a   : > { %12225 = vmatprep.mubr.msk.bf16.mxu1 %vm13023_vm2, %v13022_v5  ;;  %12241 = vmatprep.mubr.msk.bf16.mxu0 %vm13023_vm2, %v13022_v5  ;;  %12928 = vpow2.f32 %v10532_v13 }
 0x93c   : > { %12224 = vmatpush3.bf16.msra.mxu1 %v12890_v8  ;;  %12240 = vmatpush3.bf16.msra.mxu0 %v12891_v29 }
 0x93d   : > { %12245 = vmatprep.subr.bf16.mxu1 %v13022_v5  ;;  %12261 = vmatprep.subr.bf16.mxu0 %v13022_v5 }
 0x943   : > { %12226 = vmatmul.mubr.msk.bf16.vlgmr.msra.gmra.mrb[144].mxu1 %vm604_vm3, %v15198_v21  ;;  %12242 = vmatmul.mubr.msk.bf16.vlgmr.msra.gmra.mrb[148].mxu0 %vm604_vm3, %v15198_v21 }
 0x944   : > { %12246 = vmatpush3.bf16.msra.mxu1 %v12892_v49  ;;  %12262 = vmatpush3.bf16.msra.mxu0 %v12893_v46 }
 0x945   : > { %12247 = vmatprep.subr.bf16.mxu1 %v13022_v5  ;;  %12263 = vmatprep.subr.bf16.mxu0 %v13022_v5 }
 0x946   : > { %12249 = vmatprep.mubr.msk.bf16.mxu1 %vm13023_vm2, %v13022_v5  ;;  %12265 = vmatprep.mubr.msk.bf16.mxu0 %vm13023_vm2, %v13022_v5 }
 0x948   : > { %12248 = vmatpush3.bf16.msra.mxu1 %v12894_v19  ;;  %12264 = vmatpush3.bf16.msra.mxu0 %v12895_v31 }
 0x949   : > { %12253 = vmatprep.subr.bf16.mxu1 %v13022_v5  ;;  %12269 = vmatprep.subr.bf16.mxu0 %v13022_v5 }
 0x94b   : > { %12250 = vmatmul.mubr.msk.bf16.vlgmr.msra.gmra.mrb[148].mxu1 %vm604_vm3, %v15196_v39  ;;  %12266 = vmatmul.mubr.msk.bf16.vlgmr.msra.gmra.mrb[152].mxu0 %vm604_vm3, %v15196_v39 }
 0x94c   : > { %12254 = vmatpush3.bf16.msra.mxu1 %v12896_v40  ;;  %12270 = vmatpush3.bf16.msra.mxu0 %v12897_v54  ;;  %v12929_v54 = vpop.eup %12928 }
 0x94d   : > { %12255 = vmatprep.subr.bf16.mxu1 %v13022_v5  ;;  %12271 = vmatprep.subr.bf16.mxu0 %v13022_v5 }
 0x94e   : > { %12257 = vmatprep.mubr.msk.bf16.mxu1 %vm13023_vm2, %v13022_v5  ;;  %12273 = vmatprep.mubr.msk.bf16.mxu0 %vm13023_vm2, %v13022_v5 }
 0x950   : > { %12256 = vmatpush3.bf16.msra.mxu1 %v12898_v58  ;;  %12272 = vmatpush3.bf16.msra.mxu0 %v12899_v18  ;;  %v8503_v58 = vadd.f32 1.0, %v12929_v54 }
 0x957   : > { %12258 = vmatmul.mubr.msk.bf16.vlgmr.msra.gmra.mrb[148].mxu1 %vm604_vm3, %v15198_v21  ;;  %12274 = vmatmul.mubr.msk.bf16.vlgmr.msra.gmra.mrb[152].mxu0 %vm604_vm3, %v15198_v21 }
 0x9ee   : > { %v8677_v62 = vpop.f32.mrb[136].mxu1  ;;  %v8797_v33 = vpop.f32.mrb[140].mxu0 }
 0x9ef   : > { %v8684_v34 = vmul.f32 %v15066_v50, %v8677_v62  ;;  %v12163_v2 = vpop.f32.mrb[137].mxu1  ;;  %v12179_v3 = vpop.f32.mrb[141].mxu0  ;;  %v8804_v5 = vmul.f32 %v15073_v9, %v8797_v33 }
 0x9f0   : > { %v8680_v36 = vpop.f32.mrb[138].mxu1  ;;  %v8800_v41 = vpop.f32.mrb[142].mxu0 }
 0x9f1   : > { %v8686_v16 = vadd.f32 %v8684_v34, %v14665_v57  ;;  %v8685_v45 = vmul.f32 %v15079_v12, %v8680_v36  ;;  %v12164_v28 = vpop.f32.mrb[139].mxu1  ;;  %v12180_v17 = vpop.f32.mrb[143].mxu0  ;;  %v8805_v47 = vmul.f32 %v15086_v22, %v8800_v41 }
 0x9f3   : > { %v8806_v32 = vadd.f32 %v8804_v5, %v8686_v16  ;;  %v8687_v39 = vadd.f32 %v8685_v45, %v14668_v0 }
 0x9f5   : > { %v8807_v21 = vadd.f32 %v8805_v47, %v8687_v39 }
 0xa02   : > { %v8917_v30 = vpop.f32.mrb[140].mxu1  ;;  %v9037_v50 = vpop.f32.mrb[144].mxu0 }
 0xa03   : > { %v8924_v23 = vmul.f32 %v15101_v1, %v8917_v30  ;;  %v12195_v52 = vpop.f32.mrb[141].mxu1  ;;  %v12211_v55 = vpop.f32.mrb[145].mxu0  ;;  %v9044_v9 = vmul.f32 %v15108_v43, %v9037_v50 }
 0xa04   : > { %v8920_v26 = vpop.f32.mrb[142].mxu1  ;;  %v9040_v57 = vpop.f32.mrb[146].mxu0 }
 0xa05   : > { %v8926_v10 = vadd.f32 %v8924_v23, %v8806_v32  ;;  %v8925_v12 = vmul.f32 %v15114_v44, %v8920_v26  ;;  %v12196_v20 = vpop.f32.mrb[143].mxu1  ;;  %v12212_v56 = vpop.f32.mrb[147].mxu0  ;;  %v9045_v22 = vmul.f32 %v15126_v48, %v9040_v57  ;;  %v10533_v48 = vmul.f32 -1.442695, %v15180_v59 }
 0xa07   : > { %v9046_v42 = vadd.f32 %v9044_v9, %v8926_v10  ;;  %v8927_v0 = vadd.f32 %v8925_v12, %v8807_v21  ;;  %12930 = vpow2.f32 %v10533_v48 }
 0xa08   : > { %12932 = vrcp.f32 %v8503_v58 }
 0xa09   : > { %v9047_v61 = vadd.f32 %v9045_v22, %v8927_v0 }
 0xa11   : > { %v12931_v14 = vpop.eup %12930 }
 0xa12   : > { %v8504_v33 = vadd.f32 1.0, %v12931_v14 }
 0xa14   : > { %12934 = vrcp.f32 %v8504_v33 }
 0xa16   : > { %v9157_v37 = vpop.f32.mrb[144].mxu1  ;;  %v9277_v51 = vpop.f32.mrb[148].mxu0 }
 0xa17   : > { %v9164_v1 = vmul.f32 %v15133_v53, %v9157_v37  ;;  %v12227_v4 = vpop.f32.mrb[145].mxu1  ;;  %v12243_v38 = vpop.f32.mrb[149].mxu0  ;;  %v9284_v44 = vmul.f32 %v15139_v11, %v9277_v51 }
 0xa18   : > { %v9160_v7 = vpop.f32.mrb[146].mxu1  ;;  %v9280_v8 = vpop.f32.mrb[150].mxu0 }
 0xa19   : > { %v9166_v43 = vadd.f32 %v9164_v1, %v9046_v42  ;;  %v9165_v29 = vmul.f32 %v15145_v63, %v9160_v7  ;;  %v12228_v49 = vpop.f32.mrb[147].mxu1  ;;  %v12244_v46 = vpop.f32.mrb[151].mxu0  ;;  %v9285_v40 = vmul.f32 %v15151_v6, %v9280_v8 }
 0xa1b   : > { %v9286_v19 = vadd.f32 %v9284_v44, %v9166_v43  ;;  %v9167_v31 = vadd.f32 %v9165_v29, %v9047_v61 }
 0xa1d   : > { %v9287_v53 = vadd.f32 %v9285_v40, %v9167_v31 }
 0xa2a   : > { %v9397_v18 = vpop.f32.mrb[148].mxu1  ;;  %v9517_v62 = vpop.f32.mrb[152].mxu0 }
 0xa2b   : > { %v9404_v11 = vmul.f32 %v15157_v15, %v9397_v18  ;;  %v12259_v63 = vpop.f32.mrb[149].mxu1  ;;  %v12275_v34 = vpop.f32.mrb[153].mxu0  ;;  %v9524_v36 = vmul.f32 %v15163_v24, %v9517_v62 }
 0xa2c   : > { %v9400_v2 = vpop.f32.mrb[150].mxu1  ;;  %v9520_v3 = vpop.f32.mrb[154].mxu0 }
 0xa2d   : > { %v9406_v59 = vadd.f32 %v9404_v11, %v9286_v19  ;;  %v9405_v6 = vmul.f32 %v15169_v60, %v9400_v2  ;;  %v12260_v41 = vpop.f32.mrb[151].mxu1  ;;  %v12276_v16 = vpop.f32.mrb[155].mxu0  ;;  %v9525_v28 = vmul.f32 %v15177_v35, %v9520_v3 }
 0xa2e   : > { %v12933_v15 = vpop.eup %12932 }
 0xa2f   : > { %v9526_v5 = vadd.f32 %v9524_v36, %v9406_v59  ;;  %v9407_v45 = vadd.f32 %v9405_v6, %v9287_v53  ;;  %v12935_v32 = vpop.eup %12934  ;;  %v9532_v39 = vsub.f32 1.0, %v12933_v15  ;;  %v9530_v21 = vmul.f32 %v15089_v25, %v12933_v15 }
 0xa30   : > { %v9533_v24 = vsub.f32 1.0, %v12935_v32  ;;  %v9531_v60 = vmul.f32 %v15092_v27, %v12935_v32 }
 0xa31   : > { %12936 = vtanh.f32 %v9526_v5  ;;  %v9527_v17 = vadd.f32 %v9525_v28, %v9407_v45 }
 0xa33   : > { %12938 = vtanh.f32 %v9527_v17 }
 0xa3b   : > { %v12937_v47 = vpop.eup %12936 }
 0xa3c   : > { %v9534_v30 = vmul.f32 %v12937_v47, %v9532_v39  ;;  %9543 = sbr.rel (%p10644_p8) target bundleno = 2627 (0xa43), region = 80 }
 0xa3d   : > { %v12939_v50 = vpop.eup %12938 }
 0xa3e   : > { %v9536_v23 = vadd.f32 %v9534_v30, %v9530_v21  ;;  %v9535_v52 = vmul.f32 %v12939_v50, %v9533_v24 }
 0xa40   : > { %9538 = vst.msk [vmem:[#allocation2 + $0x10] sm:$0xff] %vm604_vm3, %v9536_v23  ;;  %v9537_v55 = vadd.f32 %v9535_v52, %v9531_v60  ;;  %9544 = vst.msk [vmem:[%s13131_s21] sm:$0xff] (!%p10644_p8), %vm604_vm3, %v9536_v23 }
 0xa42   : > { %9539 = vst.msk [vmem:[#allocation2 + $0x18] sm:$0xff] %vm604_vm3, %v9537_v55  ;;  %9545 = vst.msk [vmem:[%s13131_s21 + $0x8] sm:$0xff] (!%p10644_p8), %vm604_vm3, %v9537_v55 }
 0xa43 PF: > { %s23_s29 = sadd.s32 1, %s13019_s29   ;;  %s15424_s24 = sld [smem:[#allocation3_spill]] }
 0xa44   : > { %p20_p9 = scmp.ge.s32.totalorder %s23_s29, 18   ;;  %s15425_s15 = sld [smem:[#allocation4_spill]] }
 0xa45   : > { %s15426_s25 = smov %s13011_s27  ;;  %s15427_s26 = smov %s13015_s28 }
 0xa46   :  { %22 = sbr.rel (!%p20_p9) target bundleno = 3 (0x3), region = 257 }
 0xa49   : > { %s15428_s27 = smov %s15424_s24 }
 0xa4a   : > { %s15429_s28 = smov %s15425_s15 }

</bundles_post_ra>
